<compile_context>
chip_gen: v7x
topology: tpu7x:2x2x1
jax: 0.10.0
libtpu: 0.0.40
codegen_flags: <defaults>
</compile_context>

<pallas_src>
import math
import numpy as np
import jax
import jax.numpy as jnp
from jax.experimental import pallas as pl
from jax.experimental.pallas import tpu as pltpu

# ---------------- config (small, consistent with the module) ----------------
B, S        = 2, 8           # batch, target/source sequence length
D_MODEL     = 32             # d_model == d_word_vec
D_INNER     = 64
N_LAYERS    = 2
N_HEAD      = 4
D_K = D_V   = 8              # n_head * d_k == d_model
N_TRG_VOCAB = 20
TRG_PAD     = 0
N_POSITION  = 16
LN_EPS      = 1e-6
NEG_INF     = -1e9

# packed vector-slab row layout: [dec_ln_g, dec_ln_b, then per layer 8 rows]
ROW_DEC_G, ROW_DEC_B = 0, 1
# per-layer offsets: 0 slf_ln_g, 1 slf_ln_b, 2 enc_ln_g, 3 enc_ln_b,
#                    4 ffn_ln_g, 5 ffn_ln_b, 6 ffn_b1 (64-wide), 7 ffn_b2
VEC_ROWS = 2 + 8 * N_LAYERS


# ------------------------------ fused Pallas kernel ------------------------------
def lyrics_decoder_kernel(dec_in_ref, enc_out_ref, masks_ref, attn_w_ref,
                          ffn_w_ref, vecs_ref, out_ref):
    """Whole LyricsDecoderTC forward on [B*S, D] activations, weights in VMEM."""
    vecs = vecs_ref[...]                                    # [VEC_ROWS, D_INNER]

    def vec(row, width=D_MODEL):
        return vecs[row:row + 1, :width]                    # [1, width]

    def layer_norm(x, g, b):
        m = jnp.mean(x, axis=-1, keepdims=True)
        m2 = jnp.mean(x * x, axis=-1, keepdims=True)        # independent reductions
        return (x - m) * jax.lax.rsqrt(m2 - m * m + LN_EPS) * g + b

    def expand_heads(t3):
        # [B, s, D] -> [H*B, s, D] replicated across heads; leading-dim ops only
        s_len = t3.shape[1]
        return jnp.broadcast_to(
            t3[None], (N_HEAD, B, s_len, D_MODEL)).reshape(N_HEAD * B, s_len, D_MODEL)

    def mha(x2, kv2, mask_hb, l, slot, g, b):
        # Post-LN multi-head attention with per-head folded [D,D] weights:
        #   scores_h = (x @ A_h) @ kv^T ,  out = sum_h softmax(scores_h+mask) @ (kv @ C_h)
        s_q, s_kv = x2.shape[0] // B, kv2.shape[0] // B
        th = jnp.concatenate(
            [jnp.dot(x2, attn_w_ref[l, slot, h],
                     preferred_element_type=jnp.float32).reshape(B, s_q, D_MODEL)
             for h in range(N_HEAD)], axis=0)               # [H*B, s_q, D]
        uh = jnp.concatenate(
            [jnp.dot(kv2, attn_w_ref[l, slot + 1, h],
                     preferred_element_type=jnp.float32).reshape(B, s_kv, D_MODEL)
             for h in range(N_HEAD)], axis=0)               # [H*B, s_kv, D]
        kvh = expand_heads(kv2.reshape(B, s_kv, D_MODEL))   # [H*B, s_kv, D]

        sc = jnp.einsum('bqd,bkd->bqk', th, kvh,
                        preferred_element_type=jnp.float32) + mask_hb
        # single softmax for all heads & batches of this block
        sc = sc - jnp.max(sc, axis=-1, keepdims=True)
        e = jnp.exp(sc)
        p = e * pl.reciprocal(jnp.sum(e, axis=-1, keepdims=True), approx=False)

        ctx = jnp.einsum('bqk,bkd->bqd', p, uh,
                         preferred_element_type=jnp.float32)          # [H*B, s_q, D]
        out = jnp.sum(ctx.reshape(N_HEAD, B * s_q, D_MODEL), axis=0)  # head sum
        return layer_norm(out + x2, g, b)

    # additive masks, replicated across heads once (row index = h*B + b)
    masks = masks_ref[...]                                  # [2, B, S, S]
    slf_hb = jnp.broadcast_to(masks[0][None],
                              (N_HEAD, B, S, S)).reshape(N_HEAD * B, S, S)
    enc_hb = jnp.broadcast_to(masks[1][None],
                              (N_HEAD, B, S, S)).reshape(N_HEAD * B, S, S)

    # decoder-input LayerNorm (embedding + positional encoding done outside)
    x = layer_norm(dec_in_ref[...], vec(ROW_DEC_G), vec(ROW_DEC_B))
    enc = enc_out_ref[...]

    for l in range(N_LAYERS):
        base = 2 + 8 * l
        # self-attention (target mask)
        x = mha(x, x, slf_hb, l, 0, vec(base + 0), vec(base + 1))
        # encoder-decoder attention (source mask, K/V from encoder output)
        x = mha(x, enc, enc_hb, l, 2, vec(base + 2), vec(base + 3))
        # position-wise FFN + residual + LayerNorm
        h1 = jnp.maximum(
            jnp.dot(x, ffn_w_ref[l, 0], preferred_element_type=jnp.float32)
            + vec(base + 6, D_INNER), 0.0)
        y = jax.lax.dot_general(h1, ffn_w_ref[l, 1], (((1,), (1,)), ((), ())),
                                preferred_element_type=jnp.float32) + vec(base + 7)
        x = layer_norm(y + x, vec(base + 4), vec(base + 5))

    out_ref[...] = x


def pallas_lyrics_decoder(dec_in2d, enc_out2d, masks, attn_w, ffn_w, vecs):
    n_rows, d = dec_in2d.shape
    return pl.pallas_call(
        lyrics_decoder_kernel,
        out_shape=jax.ShapeDtypeStruct((n_rows, d), jnp.float32),
        # gridless single invocation: everything VMEM-resident, one launch
        in_specs=[pl.BlockSpec(memory_space=pltpu.MemorySpace.VMEM)] * 6,
        out_specs=pl.BlockSpec(memory_space=pltpu.MemorySpace.VMEM),
    )(dec_in2d, enc_out2d, masks, attn_w, ffn_w, vecs)


# ------------------------------ parameters ------------------------------
def _sinusoid_table(n_position, d_hid):
    pos = np.arange(n_position, dtype=np.float64)[:, None]
    j = np.arange(d_hid)[None, :]
    angle = pos / np.power(10000.0, 2.0 * (j // 2) / d_hid)
    table = np.zeros((n_position, d_hid), dtype=np.float64)
    table[:, 0::2] = np.sin(angle[:, 0::2])
    table[:, 1::2] = np.cos(angle[:, 1::2])
    return jnp.asarray(table, dtype=jnp.float32)


def init_params(key):
    L, H = N_LAYERS, N_HEAD
    keys = iter(jax.random.split(key, 64))

    def unif(shape, fan_in):
        bound = 1.0 / math.sqrt(fan_in)
        return jax.random.uniform(next(keys), shape, jnp.float32, -bound, bound)

    emb = jax.random.normal(next(keys), (N_TRG_VOCAB, D_MODEL), jnp.float32)
    emb = emb.at[TRG_PAD].set(0.0)      # nn.Embedding(padding_idx=pad): zero row

    def attn_folded():
        # Faithful per-module init of the bias-free q/k/v/fc projections, then
        # fold the per-head products used by the kernel:
        #   A_h = Wq_h @ Wk_h^T / sqrt(d_k),   C_h = Wv_h @ Wo_h     (both [D, D])
        wq = unif((D_MODEL, H * D_K), D_MODEL).reshape(D_MODEL, H, D_K)
        wk = unif((D_MODEL, H * D_K), D_MODEL).reshape(D_MODEL, H, D_K)
        wv = unif((D_MODEL, H * D_V), D_MODEL).reshape(D_MODEL, H, D_V)
        wo = unif((H * D_V, D_MODEL), H * D_V).reshape(H, D_V, D_MODEL)
        A = jnp.einsum('dhk,ehk->hde', wq, wk) / math.sqrt(D_K)   # [H, D, D]
        C = jnp.einsum('dhv,hvm->hdm', wv, wo)                    # [H, D, D]
        return A, C

    attn_layers = []
    for _ in range(L):
        slf_a, slf_c = attn_folded()
        enc_a, enc_c = attn_folded()
        attn_layers.append(jnp.stack([slf_a, slf_c, enc_a, enc_c], axis=0))
    attn_w = jnp.stack(attn_layers, axis=0)          # [L, 4, H, D, D]

    ffn_layers = []
    for _ in range(L):
        w1 = unif((D_MODEL, D_INNER), D_MODEL)       # [D, D_INNER]
        w2t = unif((D_MODEL, D_INNER), D_INNER)      # W2 stored transposed
        ffn_layers.append(jnp.stack([w1, w2t], axis=0))
    ffn_w = jnp.stack(ffn_layers, axis=0)            # [L, 2, D, D_INNER]

    # packed vector slab: LN gammas/betas + FFN biases, one row each
    vecs = jnp.zeros((VEC_ROWS, D_INNER), jnp.float32)
    vecs = vecs.at[ROW_DEC_G, :D_MODEL].set(1.0)
    for l in range(L):
        base = 2 + 8 * l
        for off in (0, 2, 4):                        # slf / enc / ffn LN gammas
            vecs = vecs.at[base + off, :D_MODEL].set(1.0)
        vecs = vecs.at[base + 6, :].set(unif((D_INNER,), D_MODEL))         # FFN b1
        vecs = vecs.at[base + 7, :D_MODEL].set(unif((D_MODEL,), D_INNER))  # FFN b2

    return {"trg_emb": emb, "pos_table": _sinusoid_table(N_POSITION, D_MODEL),
            "attn_w": attn_w, "ffn_w": ffn_w, "vecs": vecs}


# ------------------------------ forward ------------------------------
@jax.jit
def lyrics_decoder_tc_forward(params, trg_seq, trg_mask, enc_output, src_mask):
    """LyricsDecoderTC.forward(trg_seq, trg_mask, enc_output, src_mask) (eval)."""
    b, s_trg = trg_seq.shape
    s_src = enc_output.shape[1]
    assert s_trg == s_src, "mask slab packing assumes equal trg/src lengths"

    # target embedding + positional encoding (scale_emb=False, dropout=identity)
    dec = jnp.take(params["trg_emb"], trg_seq, axis=0)          # [B, S, D]
    dec = dec + params["pos_table"][None, :s_trg, :]

    # compact per-batch additive masks (0 keep / -1e9 drop); no block-diagonal
    slf_add = jnp.where(trg_mask, 0.0, NEG_INF).astype(jnp.float32)        # [B,S,S]
    enc_add = jnp.broadcast_to(
        jnp.where(src_mask, 0.0, NEG_INF).astype(jnp.float32), (b, s_trg, s_src))
    masks = jnp.stack([slf_add, enc_add], axis=0)               # [2, B, S, S]

    out2d = pallas_lyrics_decoder(
        dec.reshape(b * s_trg, D_MODEL),
        enc_output.reshape(b * s_src, D_MODEL),
        masks, params["attn_w"], params["ffn_w"], params["vecs"])
    return out2d.reshape(b, s_trg, D_MODEL)


# ------------------------------ main ------------------------------
if __name__ == "__main__":
    key = jax.random.PRNGKey(0)
    k_par, k_trg, k_enc = jax.random.split(key, 3)

    params = init_params(k_par)

    trg_seq = jax.random.randint(k_trg, (B, S), 1, N_TRG_VOCAB, dtype=jnp.int32)
    trg_seq = trg_seq.at[:, -1].set(TRG_PAD)            # exercise target padding

    enc_output = jax.random.normal(k_enc, (B, S, D_MODEL), dtype=jnp.float32)

    # trg_mask = pad mask & subsequent (causal) mask -> [B, S, S] bool
    pad_keep = (trg_seq != TRG_PAD)[:, None, :]
    causal = jnp.tril(jnp.ones((1, S, S), dtype=bool))
    trg_mask = jnp.logical_and(pad_keep, causal)

    # src_mask = pad mask over encoder positions -> [B, 1, S] bool (last padded)
    src_keep = jnp.ones((B, S), dtype=bool).at[:, -1].set(False)
    src_mask = src_keep[:, None, :]

    out = lyrics_decoder_tc_forward(params, trg_seq, trg_mask, enc_output, src_mask)
    out = jax.block_until_ready(out)

    assert out.shape == (B, S, D_MODEL)
    assert bool(jnp.all(jnp.isfinite(out)))
    print("KERNEL_OK")
</pallas_src>

<mosaic_0001>
module attributes {stable_mosaic.version = 11 : i64} {
  func.func @lyrics_decoder_kernel(%arg0: memref<16x32xf32, #tpu.memory_space<vmem>>, %arg1: memref<16x32xf32, #tpu.memory_space<vmem>>, %arg2: memref<2x2x8x8xf32, #tpu.memory_space<vmem>>, %arg3: memref<2x4x4x32x32xf32, #tpu.memory_space<vmem>>, %arg4: memref<2x2x32x64xf32, #tpu.memory_space<vmem>>, %arg5: memref<18x64xf32, #tpu.memory_space<vmem>>, %arg6: memref<16x32xf32, #tpu.memory_space<vmem>>) attributes {dimension_semantics = [], scalar_prefetch = 0 : i64, scratch_operands = 0 : i64, tpu.core_type = #tpu.core_type<tc>} {
    %c0 = arith.constant 0 : index
    %c0_0 = arith.constant 0 : index
    %0 = vector.load %arg5[%c0, %c0_0] : memref<18x64xf32, #tpu.memory_space<vmem>>, vector<18x64xf32>
    %c0_1 = arith.constant 0 : index
    %c0_2 = arith.constant 0 : index
    %c0_3 = arith.constant 0 : index
    %c0_4 = arith.constant 0 : index
    %1 = vector.load %arg2[%c0_1, %c0_2, %c0_3, %c0_4] : memref<2x2x8x8xf32, #tpu.memory_space<vmem>>, vector<2x2x8x8xf32>
    %2 = vector.extract_strided_slice %1 {offsets = [0, 0, 0, 0], sizes = [1, 2, 8, 8], strides = [1, 1, 1, 1]} : vector<2x2x8x8xf32> to vector<1x2x8x8xf32>
    %3 = vector.shape_cast %2 : vector<1x2x8x8xf32> to vector<2x8x8xf32>
    %4 = vector.shape_cast %3 : vector<2x8x8xf32> to vector<1x2x8x8xf32>
    %5 = vector.shape_cast %4 : vector<1x2x8x8xf32> to vector<1x2x8x8xf32>
    %6 = vector.broadcast %5 : vector<1x2x8x8xf32> to vector<4x2x8x8xf32>
    %7 = vector.shape_cast %6 : vector<4x2x8x8xf32> to vector<8x8x8xf32>
    %8 = vector.extract_strided_slice %1 {offsets = [1, 0, 0, 0], sizes = [1, 2, 8, 8], strides = [1, 1, 1, 1]} : vector<2x2x8x8xf32> to vector<1x2x8x8xf32>
    %9 = vector.shape_cast %8 : vector<1x2x8x8xf32> to vector<2x8x8xf32>
    %10 = vector.shape_cast %9 : vector<2x8x8xf32> to vector<1x2x8x8xf32>
    %11 = vector.shape_cast %10 : vector<1x2x8x8xf32> to vector<1x2x8x8xf32>
    %12 = vector.broadcast %11 : vector<1x2x8x8xf32> to vector<4x2x8x8xf32>
    %13 = vector.shape_cast %12 : vector<4x2x8x8xf32> to vector<8x8x8xf32>
    %c0_5 = arith.constant 0 : index
    %c0_6 = arith.constant 0 : index
    %14 = vector.load %arg0[%c0_5, %c0_6] : memref<16x32xf32, #tpu.memory_space<vmem>>, vector<16x32xf32>
    %15 = vector.extract_strided_slice %0 {offsets = [0, 0], sizes = [1, 32], strides = [1, 1]} : vector<18x64xf32> to vector<1x32xf32>
    %16 = vector.extract_strided_slice %0 {offsets = [1, 0], sizes = [1, 32], strides = [1, 1]} : vector<18x64xf32> to vector<1x32xf32>
    %cst = arith.constant dense<0.000000e+00> : vector<16xf32>
    %17 = vector.multi_reduction <add>, %14, %cst [1] : vector<16x32xf32> to vector<16xf32>
    %18 = vector.shape_cast %17 : vector<16xf32> to vector<16x1xf32>
    %cst_7 = arith.constant 3.200000e+01 : f32
    %19 = vector.broadcast %cst_7 : f32 to vector<16x1xf32>
    %20 = arith.divf %18, %19 : vector<16x1xf32>
    %21 = arith.mulf %14, %14 : vector<16x32xf32>
    %cst_8 = arith.constant dense<0.000000e+00> : vector<16xf32>
    %22 = vector.multi_reduction <add>, %21, %cst_8 [1] : vector<16x32xf32> to vector<16xf32>
    %23 = vector.shape_cast %22 : vector<16xf32> to vector<16x1xf32>
    %cst_9 = arith.constant 3.200000e+01 : f32
    %24 = vector.broadcast %cst_9 : f32 to vector<16x1xf32>
    %25 = arith.divf %23, %24 : vector<16x1xf32>
    %26 = vector.broadcast %20 : vector<16x1xf32> to vector<16x32xf32>
    %27 = arith.subf %14, %26 : vector<16x32xf32>
    %28 = arith.mulf %20, %20 : vector<16x1xf32>
    %29 = arith.subf %25, %28 : vector<16x1xf32>
    %cst_10 = arith.constant 9.99999997E-7 : f32
    %30 = vector.broadcast %cst_10 : f32 to vector<16x1xf32>
    %31 = arith.addf %29, %30 : vector<16x1xf32>
    %32 = math.rsqrt %31 : vector<16x1xf32>
    %33 = vector.broadcast %32 : vector<16x1xf32> to vector<16x32xf32>
    %34 = arith.mulf %27, %33 : vector<16x32xf32>
    %35 = vector.broadcast %15 : vector<1x32xf32> to vector<16x32xf32>
    %36 = arith.mulf %34, %35 : vector<16x32xf32>
    %37 = vector.broadcast %16 : vector<1x32xf32> to vector<16x32xf32>
    %38 = arith.addf %36, %37 : vector<16x32xf32>
    %c0_11 = arith.constant 0 : index
    %c0_12 = arith.constant 0 : index
    %39 = vector.load %arg1[%c0_11, %c0_12] : memref<16x32xf32, #tpu.memory_space<vmem>>, vector<16x32xf32>
    %40 = vector.extract_strided_slice %0 {offsets = [2, 0], sizes = [1, 32], strides = [1, 1]} : vector<18x64xf32> to vector<1x32xf32>
    %41 = vector.extract_strided_slice %0 {offsets = [3, 0], sizes = [1, 32], strides = [1, 1]} : vector<18x64xf32> to vector<1x32xf32>
    %c0_13 = arith.constant 0 : index
    %c0_14 = arith.constant 0 : index
    %c0_15 = arith.constant 0 : index
    %c0_16 = arith.constant 0 : index
    %c0_17 = arith.constant 0 : index
    %42 = vector.load %arg3[%c0_13, %c0_14, %c0_15, %c0_16, %c0_17] : memref<2x4x4x32x32xf32, #tpu.memory_space<vmem>>, vector<1x1x1x32x32xf32>
    %43 = vector.shape_cast %42 : vector<1x1x1x32x32xf32> to vector<32x32xf32>
    %cst_18 = arith.constant dense<0.000000e+00> : vector<16x32xf32>
    %44 = tpu.matmul %38, %43, %cst_18 {dimension_numbers = #tpu.dot_dimension_numbers<[1], [0], [0], [1], [0, 0, 1, 1], [], []>} : vector<16x32xf32>, vector<32x32xf32>, vector<16x32xf32> -> vector<16x32xf32>
    %45 = vector.shape_cast %44 : vector<16x32xf32> to vector<2x8x32xf32>
    %c0_19 = arith.constant 0 : index
    %c0_20 = arith.constant 0 : index
    %c1 = arith.constant 1 : index
    %c0_21 = arith.constant 0 : index
    %c0_22 = arith.constant 0 : index
    %46 = vector.load %arg3[%c0_19, %c0_20, %c1, %c0_21, %c0_22] : memref<2x4x4x32x32xf32, #tpu.memory_space<vmem>>, vector<1x1x1x32x32xf32>
    %47 = vector.shape_cast %46 : vector<1x1x1x32x32xf32> to vector<32x32xf32>
    %cst_23 = arith.constant dense<0.000000e+00> : vector<16x32xf32>
    %48 = tpu.matmul %38, %47, %cst_23 {dimension_numbers = #tpu.dot_dimension_numbers<[1], [0], [0], [1], [0, 0, 1, 1], [], []>} : vector<16x32xf32>, vector<32x32xf32>, vector<16x32xf32> -> vector<16x32xf32>
    %49 = vector.shape_cast %48 : vector<16x32xf32> to vector<2x8x32xf32>
    %c0_24 = arith.constant 0 : index
    %c0_25 = arith.constant 0 : index
    %c2 = arith.constant 2 : index
    %c0_26 = arith.constant 0 : index
    %c0_27 = arith.constant 0 : index
    %50 = vector.load %arg3[%c0_24, %c0_25, %c2, %c0_26, %c0_27] : memref<2x4x4x32x32xf32, #tpu.memory_space<vmem>>, vector<1x1x1x32x32xf32>
    %51 = vector.shape_cast %50 : vector<1x1x1x32x32xf32> to vector<32x32xf32>
    %cst_28 = arith.constant dense<0.000000e+00> : vector<16x32xf32>
    %52 = tpu.matmul %38, %51, %cst_28 {dimension_numbers = #tpu.dot_dimension_numbers<[1], [0], [0], [1], [0, 0, 1, 1], [], []>} : vector<16x32xf32>, vector<32x32xf32>, vector<16x32xf32> -> vector<16x32xf32>
    %53 = vector.shape_cast %52 : vector<16x32xf32> to vector<2x8x32xf32>
    %c0_29 = arith.constant 0 : index
    %c0_30 = arith.constant 0 : index
    %c3 = arith.constant 3 : index
    %c0_31 = arith.constant 0 : index
    %c0_32 = arith.constant 0 : index
    %54 = vector.load %arg3[%c0_29, %c0_30, %c3, %c0_31, %c0_32] : memref<2x4x4x32x32xf32, #tpu.memory_space<vmem>>, vector<1x1x1x32x32xf32>
    %55 = vector.shape_cast %54 : vector<1x1x1x32x32xf32> to vector<32x32xf32>
    %cst_33 = arith.constant dense<0.000000e+00> : vector<16x32xf32>
    %56 = tpu.matmul %38, %55, %cst_33 {dimension_numbers = #tpu.dot_dimension_numbers<[1], [0], [0], [1], [0, 0, 1, 1], [], []>} : vector<16x32xf32>, vector<32x32xf32>, vector<16x32xf32> -> vector<16x32xf32>
    %57 = vector.shape_cast %56 : vector<16x32xf32> to vector<2x8x32xf32>
    %58 = tpu.concatenate %45, %49, %53, %57 in 0 : vector<2x8x32xf32>, vector<2x8x32xf32>, vector<2x8x32xf32>, vector<2x8x32xf32> -> vector<8x8x32xf32>
    %c0_34 = arith.constant 0 : index
    %c1_35 = arith.constant 1 : index
    %c0_36 = arith.constant 0 : index
    %c0_37 = arith.constant 0 : index
    %c0_38 = arith.constant 0 : index
    %59 = vector.load %arg3[%c0_34, %c1_35, %c0_36, %c0_37, %c0_38] : memref<2x4x4x32x32xf32, #tpu.memory_space<vmem>>, vector<1x1x1x32x32xf32>
    %60 = vector.shape_cast %59 : vector<1x1x1x32x32xf32> to vector<32x32xf32>
    %cst_39 = arith.constant dense<0.000000e+00> : vector<16x32xf32>
    %61 = tpu.matmul %38, %60, %cst_39 {dimension_numbers = #tpu.dot_dimension_numbers<[1], [0], [0], [1], [0, 0, 1, 1], [], []>} : vector<16x32xf32>, vector<32x32xf32>, vector<16x32xf32> -> vector<16x32xf32>
    %62 = vector.shape_cast %61 : vector<16x32xf32> to vector<2x8x32xf32>
    %c0_40 = arith.constant 0 : index
    %c1_41 = arith.constant 1 : index
    %c1_42 = arith.constant 1 : index
    %c0_43 = arith.constant 0 : index
    %c0_44 = arith.constant 0 : index
    %63 = vector.load %arg3[%c0_40, %c1_41, %c1_42, %c0_43, %c0_44] : memref<2x4x4x32x32xf32, #tpu.memory_space<vmem>>, vector<1x1x1x32x32xf32>
    %64 = vector.shape_cast %63 : vector<1x1x1x32x32xf32> to vector<32x32xf32>
    %cst_45 = arith.constant dense<0.000000e+00> : vector<16x32xf32>
    %65 = tpu.matmul %38, %64, %cst_45 {dimension_numbers = #tpu.dot_dimension_numbers<[1], [0], [0], [1], [0, 0, 1, 1], [], []>} : vector<16x32xf32>, vector<32x32xf32>, vector<16x32xf32> -> vector<16x32xf32>
    %66 = vector.shape_cast %65 : vector<16x32xf32> to vector<2x8x32xf32>
    %c0_46 = arith.constant 0 : index
    %c1_47 = arith.constant 1 : index
    %c2_48 = arith.constant 2 : index
    %c0_49 = arith.constant 0 : index
    %c0_50 = arith.constant 0 : index
    %67 = vector.load %arg3[%c0_46, %c1_47, %c2_48, %c0_49, %c0_50] : memref<2x4x4x32x32xf32, #tpu.memory_space<vmem>>, vector<1x1x1x32x32xf32>
    %68 = vector.shape_cast %67 : vector<1x1x1x32x32xf32> to vector<32x32xf32>
    %cst_51 = arith.constant dense<0.000000e+00> : vector<16x32xf32>
    %69 = tpu.matmul %38, %68, %cst_51 {dimension_numbers = #tpu.dot_dimension_numbers<[1], [0], [0], [1], [0, 0, 1, 1], [], []>} : vector<16x32xf32>, vector<32x32xf32>, vector<16x32xf32> -> vector<16x32xf32>
    %70 = vector.shape_cast %69 : vector<16x32xf32> to vector<2x8x32xf32>
    %c0_52 = arith.constant 0 : index
    %c1_53 = arith.constant 1 : index
    %c3_54 = arith.constant 3 : index
    %c0_55 = arith.constant 0 : index
    %c0_56 = arith.constant 0 : index
    %71 = vector.load %arg3[%c0_52, %c1_53, %c3_54, %c0_55, %c0_56] : memref<2x4x4x32x32xf32, #tpu.memory_space<vmem>>, vector<1x1x1x32x32xf32>
    %72 = vector.shape_cast %71 : vector<1x1x1x32x32xf32> to vector<32x32xf32>
    %cst_57 = arith.constant dense<0.000000e+00> : vector<16x32xf32>
    %73 = tpu.matmul %38, %72, %cst_57 {dimension_numbers = #tpu.dot_dimension_numbers<[1], [0], [0], [1], [0, 0, 1, 1], [], []>} : vector<16x32xf32>, vector<32x32xf32>, vector<16x32xf32> -> vector<16x32xf32>
    %74 = vector.shape_cast %73 : vector<16x32xf32> to vector<2x8x32xf32>
    %75 = tpu.concatenate %62, %66, %70, %74 in 0 : vector<2x8x32xf32>, vector<2x8x32xf32>, vector<2x8x32xf32>, vector<2x8x32xf32> -> vector<8x8x32xf32>
    %76 = vector.shape_cast %38 : vector<16x32xf32> to vector<2x8x32xf32>
    %77 = vector.shape_cast %76 : vector<2x8x32xf32> to vector<1x2x8x32xf32>
    %78 = vector.shape_cast %77 : vector<1x2x8x32xf32> to vector<1x2x8x32xf32>
    %79 = vector.broadcast %78 : vector<1x2x8x32xf32> to vector<4x2x8x32xf32>
    %80 = vector.shape_cast %79 : vector<4x2x8x32xf32> to vector<8x8x32xf32>
    "tpu.trace_start"() <{level = 10 : i32, message = "bqd,bkd->bqk"}> : () -> ()
    %cst_58 = arith.constant dense<0.000000e+00> : vector<8x8x8xf32>
    %81 = tpu.matmul %58, %80, %cst_58 {dimension_numbers = #tpu.dot_dimension_numbers<[2], [2], [1], [1], [0, 0, 0, 1, 1, 1], [0], [0]>} : vector<8x8x32xf32>, vector<8x8x32xf32>, vector<8x8x8xf32> -> vector<8x8x8xf32>
    "tpu.trace_stop"() : () -> ()
    %82 = arith.addf %81, %7 : vector<8x8x8xf32>
    %cst_59 = arith.constant dense<0xFF800000> : vector<8x8xf32>
    %83 = vector.multi_reduction <maximumf>, %82, %cst_59 [2] : vector<8x8x8xf32> to vector<8x8xf32>
    %84 = vector.shape_cast %83 : vector<8x8xf32> to vector<8x8x1xf32>
    %85 = vector.broadcast %84 : vector<8x8x1xf32> to vector<8x8x8xf32>
    %86 = arith.subf %82, %85 : vector<8x8x8xf32>
    %87 = math.exp %86 : vector<8x8x8xf32>
    %cst_60 = arith.constant dense<0.000000e+00> : vector<8x8xf32>
    %88 = vector.multi_reduction <add>, %87, %cst_60 [2] : vector<8x8x8xf32> to vector<8x8xf32>
    %89 = vector.shape_cast %88 : vector<8x8xf32> to vector<8x8x1xf32>
    %90 = tpu.reciprocal %89 : vector<8x8x1xf32> -> vector<8x8x1xf32>
    %91 = vector.broadcast %90 : vector<8x8x1xf32> to vector<8x8x8xf32>
    %92 = arith.mulf %87, %91 : vector<8x8x8xf32>
    "tpu.trace_start"() <{level = 10 : i32, message = "bqk,bkd->bqd"}> : () -> ()
    %cst_61 = arith.constant dense<0.000000e+00> : vector<8x8x32xf32>
    %93 = tpu.matmul %92, %75, %cst_61 {dimension_numbers = #tpu.dot_dimension_numbers<[2], [1], [1], [2], [0, 0, 0, 1, 1, 2], [0], [0]>} : vector<8x8x8xf32>, vector<8x8x32xf32>, vector<8x8x32xf32> -> vector<8x8x32xf32>
    "tpu.trace_stop"() : () -> ()
    %94 = vector.shape_cast %93 : vector<8x8x32xf32> to vector<4x16x32xf32>
    %cst_62 = arith.constant dense<0.000000e+00> : vector<16x32xf32>
    %95 = vector.multi_reduction <add>, %94, %cst_62 [0] : vector<4x16x32xf32> to vector<16x32xf32>
    %96 = arith.addf %95, %38 : vector<16x32xf32>
    %cst_63 = arith.constant dense<0.000000e+00> : vector<16xf32>
    %97 = vector.multi_reduction <add>, %96, %cst_63 [1] : vector<16x32xf32> to vector<16xf32>
    %98 = vector.shape_cast %97 : vector<16xf32> to vector<16x1xf32>
    %cst_64 = arith.constant 3.200000e+01 : f32
    %99 = vector.broadcast %cst_64 : f32 to vector<16x1xf32>
    %100 = arith.divf %98, %99 : vector<16x1xf32>
    %101 = arith.mulf %96, %96 : vector<16x32xf32>
    %cst_65 = arith.constant dense<0.000000e+00> : vector<16xf32>
    %102 = vector.multi_reduction <add>, %101, %cst_65 [1] : vector<16x32xf32> to vector<16xf32>
    %103 = vector.shape_cast %102 : vector<16xf32> to vector<16x1xf32>
    %cst_66 = arith.constant 3.200000e+01 : f32
    %104 = vector.broadcast %cst_66 : f32 to vector<16x1xf32>
    %105 = arith.divf %103, %104 : vector<16x1xf32>
    %106 = vector.broadcast %100 : vector<16x1xf32> to vector<16x32xf32>
    %107 = arith.subf %96, %106 : vector<16x32xf32>
    %108 = arith.mulf %100, %100 : vector<16x1xf32>
    %109 = arith.subf %105, %108 : vector<16x1xf32>
    %cst_67 = arith.constant 9.99999997E-7 : f32
    %110 = vector.broadcast %cst_67 : f32 to vector<16x1xf32>
    %111 = arith.addf %109, %110 : vector<16x1xf32>
    %112 = math.rsqrt %111 : vector<16x1xf32>
    %113 = vector.broadcast %112 : vector<16x1xf32> to vector<16x32xf32>
    %114 = arith.mulf %107, %113 : vector<16x32xf32>
    %115 = vector.broadcast %40 : vector<1x32xf32> to vector<16x32xf32>
    %116 = arith.mulf %114, %115 : vector<16x32xf32>
    %117 = vector.broadcast %41 : vector<1x32xf32> to vector<16x32xf32>
    %118 = arith.addf %116, %117 : vector<16x32xf32>
    %119 = vector.extract_strided_slice %0 {offsets = [4, 0], sizes = [1, 32], strides = [1, 1]} : vector<18x64xf32> to vector<1x32xf32>
    %120 = vector.extract_strided_slice %0 {offsets = [5, 0], sizes = [1, 32], strides = [1, 1]} : vector<18x64xf32> to vector<1x32xf32>
    %c0_68 = arith.constant 0 : index
    %c2_69 = arith.constant 2 : index
    %c0_70 = arith.constant 0 : index
    %c0_71 = arith.constant 0 : index
    %c0_72 = arith.constant 0 : index
    %121 = vector.load %arg3[%c0_68, %c2_69, %c0_70, %c0_71, %c0_72] : memref<2x4x4x32x32xf32, #tpu.memory_space<vmem>>, vector<1x1x1x32x32xf32>
    %122 = vector.shape_cast %121 : vector<1x1x1x32x32xf32> to vector<32x32xf32>
    %cst_73 = arith.constant dense<0.000000e+00> : vector<16x32xf32>
    %123 = tpu.matmul %118, %122, %cst_73 {dimension_numbers = #tpu.dot_dimension_numbers<[1], [0], [0], [1], [0, 0, 1, 1], [], []>} : vector<16x32xf32>, vector<32x32xf32>, vector<16x32xf32> -> vector<16x32xf32>
    %124 = vector.shape_cast %123 : vector<16x32xf32> to vector<2x8x32xf32>
    %c0_74 = arith.constant 0 : index
    %c2_75 = arith.constant 2 : index
    %c1_76 = arith.constant 1 : index
    %c0_77 = arith.constant 0 : index
    %c0_78 = arith.constant 0 : index
    %125 = vector.load %arg3[%c0_74, %c2_75, %c1_76, %c0_77, %c0_78] : memref<2x4x4x32x32xf32, #tpu.memory_space<vmem>>, vector<1x1x1x32x32xf32>
    %126 = vector.shape_cast %125 : vector<1x1x1x32x32xf32> to vector<32x32xf32>
    %cst_79 = arith.constant dense<0.000000e+00> : vector<16x32xf32>
    %127 = tpu.matmul %118, %126, %cst_79 {dimension_numbers = #tpu.dot_dimension_numbers<[1], [0], [0], [1], [0, 0, 1, 1], [], []>} : vector<16x32xf32>, vector<32x32xf32>, vector<16x32xf32> -> vector<16x32xf32>
    %128 = vector.shape_cast %127 : vector<16x32xf32> to vector<2x8x32xf32>
    %c0_80 = arith.constant 0 : index
    %c2_81 = arith.constant 2 : index
    %c2_82 = arith.constant 2 : index
    %c0_83 = arith.constant 0 : index
    %c0_84 = arith.constant 0 : index
    %129 = vector.load %arg3[%c0_80, %c2_81, %c2_82, %c0_83, %c0_84] : memref<2x4x4x32x32xf32, #tpu.memory_space<vmem>>, vector<1x1x1x32x32xf32>
    %130 = vector.shape_cast %129 : vector<1x1x1x32x32xf32> to vector<32x32xf32>
    %cst_85 = arith.constant dense<0.000000e+00> : vector<16x32xf32>
    %131 = tpu.matmul %118, %130, %cst_85 {dimension_numbers = #tpu.dot_dimension_numbers<[1], [0], [0], [1], [0, 0, 1, 1], [], []>} : vector<16x32xf32>, vector<32x32xf32>, vector<16x32xf32> -> vector<16x32xf32>
    %132 = vector.shape_cast %131 : vector<16x32xf32> to vector<2x8x32xf32>
    %c0_86 = arith.constant 0 : index
    %c2_87 = arith.constant 2 : index
    %c3_88 = arith.constant 3 : index
    %c0_89 = arith.constant 0 : index
    %c0_90 = arith.constant 0 : index
    %133 = vector.load %arg3[%c0_86, %c2_87, %c3_88, %c0_89, %c0_90] : memref<2x4x4x32x32xf32, #tpu.memory_space<vmem>>, vector<1x1x1x32x32xf32>
    %134 = vector.shape_cast %133 : vector<1x1x1x32x32xf32> to vector<32x32xf32>
    %cst_91 = arith.constant dense<0.000000e+00> : vector<16x32xf32>
    %135 = tpu.matmul %118, %134, %cst_91 {dimension_numbers = #tpu.dot_dimension_numbers<[1], [0], [0], [1], [0, 0, 1, 1], [], []>} : vector<16x32xf32>, vector<32x32xf32>, vector<16x32xf32> -> vector<16x32xf32>
    %136 = vector.shape_cast %135 : vector<16x32xf32> to vector<2x8x32xf32>
    %137 = tpu.concatenate %124, %128, %132, %136 in 0 : vector<2x8x32xf32>, vector<2x8x32xf32>, vector<2x8x32xf32>, vector<2x8x32xf32> -> vector<8x8x32xf32>
    %c0_92 = arith.constant 0 : index
    %c3_93 = arith.constant 3 : index
    %c0_94 = arith.constant 0 : index
    %c0_95 = arith.constant 0 : index
    %c0_96 = arith.constant 0 : index
    %138 = vector.load %arg3[%c0_92, %c3_93, %c0_94, %c0_95, %c0_96] : memref<2x4x4x32x32xf32, #tpu.memory_space<vmem>>, vector<1x1x1x32x32xf32>
    %139 = vector.shape_cast %138 : vector<1x1x1x32x32xf32> to vector<32x32xf32>
    %cst_97 = arith.constant dense<0.000000e+00> : vector<16x32xf32>
    %140 = tpu.matmul %39, %139, %cst_97 {dimension_numbers = #tpu.dot_dimension_numbers<[1], [0], [0], [1], [0, 0, 1, 1], [], []>} : vector<16x32xf32>, vector<32x32xf32>, vector<16x32xf32> -> vector<16x32xf32>
    %141 = vector.shape_cast %140 : vector<16x32xf32> to vector<2x8x32xf32>
    %c0_98 = arith.constant 0 : index
    %c3_99 = arith.constant 3 : index
    %c1_100 = arith.constant 1 : index
    %c0_101 = arith.constant 0 : index
    %c0_102 = arith.constant 0 : index
    %142 = vector.load %arg3[%c0_98, %c3_99, %c1_100, %c0_101, %c0_102] : memref<2x4x4x32x32xf32, #tpu.memory_space<vmem>>, vector<1x1x1x32x32xf32>
    %143 = vector.shape_cast %142 : vector<1x1x1x32x32xf32> to vector<32x32xf32>
    %cst_103 = arith.constant dense<0.000000e+00> : vector<16x32xf32>
    %144 = tpu.matmul %39, %143, %cst_103 {dimension_numbers = #tpu.dot_dimension_numbers<[1], [0], [0], [1], [0, 0, 1, 1], [], []>} : vector<16x32xf32>, vector<32x32xf32>, vector<16x32xf32> -> vector<16x32xf32>
    %145 = vector.shape_cast %144 : vector<16x32xf32> to vector<2x8x32xf32>
    %c0_104 = arith.constant 0 : index
    %c3_105 = arith.constant 3 : index
    %c2_106 = arith.constant 2 : index
    %c0_107 = arith.constant 0 : index
    %c0_108 = arith.constant 0 : index
    %146 = vector.load %arg3[%c0_104, %c3_105, %c2_106, %c0_107, %c0_108] : memref<2x4x4x32x32xf32, #tpu.memory_space<vmem>>, vector<1x1x1x32x32xf32>
    %147 = vector.shape_cast %146 : vector<1x1x1x32x32xf32> to vector<32x32xf32>
    %cst_109 = arith.constant dense<0.000000e+00> : vector<16x32xf32>
    %148 = tpu.matmul %39, %147, %cst_109 {dimension_numbers = #tpu.dot_dimension_numbers<[1], [0], [0], [1], [0, 0, 1, 1], [], []>} : vector<16x32xf32>, vector<32x32xf32>, vector<16x32xf32> -> vector<16x32xf32>
    %149 = vector.shape_cast %148 : vector<16x32xf32> to vector<2x8x32xf32>
    %c0_110 = arith.constant 0 : index
    %c3_111 = arith.constant 3 : index
    %c3_112 = arith.constant 3 : index
    %c0_113 = arith.constant 0 : index
    %c0_114 = arith.constant 0 : index
    %150 = vector.load %arg3[%c0_110, %c3_111, %c3_112, %c0_113, %c0_114] : memref<2x4x4x32x32xf32, #tpu.memory_space<vmem>>, vector<1x1x1x32x32xf32>
    %151 = vector.shape_cast %150 : vector<1x1x1x32x32xf32> to vector<32x32xf32>
    %cst_115 = arith.constant dense<0.000000e+00> : vector<16x32xf32>
    %152 = tpu.matmul %39, %151, %cst_115 {dimension_numbers = #tpu.dot_dimension_numbers<[1], [0], [0], [1], [0, 0, 1, 1], [], []>} : vector<16x32xf32>, vector<32x32xf32>, vector<16x32xf32> -> vector<16x32xf32>
    %153 = vector.shape_cast %152 : vector<16x32xf32> to vector<2x8x32xf32>
    %154 = tpu.concatenate %141, %145, %149, %153 in 0 : vector<2x8x32xf32>, vector<2x8x32xf32>, vector<2x8x32xf32>, vector<2x8x32xf32> -> vector<8x8x32xf32>
    %155 = vector.shape_cast %39 : vector<16x32xf32> to vector<2x8x32xf32>
    %156 = vector.shape_cast %155 : vector<2x8x32xf32> to vector<1x2x8x32xf32>
    %157 = vector.shape_cast %156 : vector<1x2x8x32xf32> to vector<1x2x8x32xf32>
    %158 = vector.broadcast %157 : vector<1x2x8x32xf32> to vector<4x2x8x32xf32>
    %159 = vector.shape_cast %158 : vector<4x2x8x32xf32> to vector<8x8x32xf32>
    "tpu.trace_start"() <{level = 10 : i32, message = "bqd,bkd->bqk"}> : () -> ()
    %cst_116 = arith.constant dense<0.000000e+00> : vector<8x8x8xf32>
    %160 = tpu.matmul %137, %159, %cst_116 {dimension_numbers = #tpu.dot_dimension_numbers<[2], [2], [1], [1], [0, 0, 0, 1, 1, 1], [0], [0]>} : vector<8x8x32xf32>, vector<8x8x32xf32>, vector<8x8x8xf32> -> vector<8x8x8xf32>
    "tpu.trace_stop"() : () -> ()
    %161 = arith.addf %160, %13 : vector<8x8x8xf32>
    %cst_117 = arith.constant dense<0xFF800000> : vector<8x8xf32>
    %162 = vector.multi_reduction <maximumf>, %161, %cst_117 [2] : vector<8x8x8xf32> to vector<8x8xf32>
    %163 = vector.shape_cast %162 : vector<8x8xf32> to vector<8x8x1xf32>
    %164 = vector.broadcast %163 : vector<8x8x1xf32> to vector<8x8x8xf32>
    %165 = arith.subf %161, %164 : vector<8x8x8xf32>
    %166 = math.exp %165 : vector<8x8x8xf32>
    %cst_118 = arith.constant dense<0.000000e+00> : vector<8x8xf32>
    %167 = vector.multi_reduction <add>, %166, %cst_118 [2] : vector<8x8x8xf32> to vector<8x8xf32>
    %168 = vector.shape_cast %167 : vector<8x8xf32> to vector<8x8x1xf32>
    %169 = tpu.reciprocal %168 : vector<8x8x1xf32> -> vector<8x8x1xf32>
    %170 = vector.broadcast %169 : vector<8x8x1xf32> to vector<8x8x8xf32>
    %171 = arith.mulf %166, %170 : vector<8x8x8xf32>
    "tpu.trace_start"() <{level = 10 : i32, message = "bqk,bkd->bqd"}> : () -> ()
    %cst_119 = arith.constant dense<0.000000e+00> : vector<8x8x32xf32>
    %172 = tpu.matmul %171, %154, %cst_119 {dimension_numbers = #tpu.dot_dimension_numbers<[2], [1], [1], [2], [0, 0, 0, 1, 1, 2], [0], [0]>} : vector<8x8x8xf32>, vector<8x8x32xf32>, vector<8x8x32xf32> -> vector<8x8x32xf32>
    "tpu.trace_stop"() : () -> ()
    %173 = vector.shape_cast %172 : vector<8x8x32xf32> to vector<4x16x32xf32>
    %cst_120 = arith.constant dense<0.000000e+00> : vector<16x32xf32>
    %174 = vector.multi_reduction <add>, %173, %cst_120 [0] : vector<4x16x32xf32> to vector<16x32xf32>
    %175 = arith.addf %174, %118 : vector<16x32xf32>
    %cst_121 = arith.constant dense<0.000000e+00> : vector<16xf32>
    %176 = vector.multi_reduction <add>, %175, %cst_121 [1] : vector<16x32xf32> to vector<16xf32>
    %177 = vector.shape_cast %176 : vector<16xf32> to vector<16x1xf32>
    %cst_122 = arith.constant 3.200000e+01 : f32
    %178 = vector.broadcast %cst_122 : f32 to vector<16x1xf32>
    %179 = arith.divf %177, %178 : vector<16x1xf32>
    %180 = arith.mulf %175, %175 : vector<16x32xf32>
    %cst_123 = arith.constant dense<0.000000e+00> : vector<16xf32>
    %181 = vector.multi_reduction <add>, %180, %cst_123 [1] : vector<16x32xf32> to vector<16xf32>
    %182 = vector.shape_cast %181 : vector<16xf32> to vector<16x1xf32>
    %cst_124 = arith.constant 3.200000e+01 : f32
    %183 = vector.broadcast %cst_124 : f32 to vector<16x1xf32>
    %184 = arith.divf %182, %183 : vector<16x1xf32>
    %185 = vector.broadcast %179 : vector<16x1xf32> to vector<16x32xf32>
    %186 = arith.subf %175, %185 : vector<16x32xf32>
    %187 = arith.mulf %179, %179 : vector<16x1xf32>
    %188 = arith.subf %184, %187 : vector<16x1xf32>
    %cst_125 = arith.constant 9.99999997E-7 : f32
    %189 = vector.broadcast %cst_125 : f32 to vector<16x1xf32>
    %190 = arith.addf %188, %189 : vector<16x1xf32>
    %191 = math.rsqrt %190 : vector<16x1xf32>
    %192 = vector.broadcast %191 : vector<16x1xf32> to vector<16x32xf32>
    %193 = arith.mulf %186, %192 : vector<16x32xf32>
    %194 = vector.broadcast %119 : vector<1x32xf32> to vector<16x32xf32>
    %195 = arith.mulf %193, %194 : vector<16x32xf32>
    %196 = vector.broadcast %120 : vector<1x32xf32> to vector<16x32xf32>
    %197 = arith.addf %195, %196 : vector<16x32xf32>
    %c0_126 = arith.constant 0 : index
    %c0_127 = arith.constant 0 : index
    %c0_128 = arith.constant 0 : index
    %c0_129 = arith.constant 0 : index
    %198 = vector.load %arg4[%c0_126, %c0_127, %c0_128, %c0_129] : memref<2x2x32x64xf32, #tpu.memory_space<vmem>>, vector<1x1x32x64xf32>
    %199 = vector.shape_cast %198 : vector<1x1x32x64xf32> to vector<32x64xf32>
    %cst_130 = arith.constant dense<0.000000e+00> : vector<16x64xf32>
    %200 = tpu.matmul %197, %199, %cst_130 {dimension_numbers = #tpu.dot_dimension_numbers<[1], [0], [0], [1], [0, 0, 1, 1], [], []>} : vector<16x32xf32>, vector<32x64xf32>, vector<16x64xf32> -> vector<16x64xf32>
    %201 = vector.extract_strided_slice %0 {offsets = [8, 0], sizes = [1, 64], strides = [1, 1]} : vector<18x64xf32> to vector<1x64xf32>
    %202 = vector.broadcast %201 : vector<1x64xf32> to vector<16x64xf32>
    %203 = arith.addf %200, %202 : vector<16x64xf32>
    %cst_131 = arith.constant 0.000000e+00 : f32
    %204 = vector.broadcast %cst_131 : f32 to vector<16x64xf32>
    %205 = arith.maximumf %203, %204 : vector<16x64xf32>
    %c0_132 = arith.constant 0 : index
    %c1_133 = arith.constant 1 : index
    %c0_134 = arith.constant 0 : index
    %c0_135 = arith.constant 0 : index
    %206 = vector.load %arg4[%c0_132, %c1_133, %c0_134, %c0_135] : memref<2x2x32x64xf32, #tpu.memory_space<vmem>>, vector<1x1x32x64xf32>
    %207 = vector.shape_cast %206 : vector<1x1x32x64xf32> to vector<32x64xf32>
    %cst_136 = arith.constant dense<0.000000e+00> : vector<16x32xf32>
    %208 = tpu.matmul %205, %207, %cst_136 {dimension_numbers = #tpu.dot_dimension_numbers<[1], [1], [0], [0], [0, 0, 1, 0], [], []>} : vector<16x64xf32>, vector<32x64xf32>, vector<16x32xf32> -> vector<16x32xf32>
    %209 = vector.extract_strided_slice %0 {offsets = [9, 0], sizes = [1, 32], strides = [1, 1]} : vector<18x64xf32> to vector<1x32xf32>
    %210 = vector.broadcast %209 : vector<1x32xf32> to vector<16x32xf32>
    %211 = arith.addf %208, %210 : vector<16x32xf32>
    %212 = arith.addf %211, %197 : vector<16x32xf32>
    %213 = vector.extract_strided_slice %0 {offsets = [6, 0], sizes = [1, 32], strides = [1, 1]} : vector<18x64xf32> to vector<1x32xf32>
    %214 = vector.extract_strided_slice %0 {offsets = [7, 0], sizes = [1, 32], strides = [1, 1]} : vector<18x64xf32> to vector<1x32xf32>
    %cst_137 = arith.constant dense<0.000000e+00> : vector<16xf32>
    %215 = vector.multi_reduction <add>, %212, %cst_137 [1] : vector<16x32xf32> to vector<16xf32>
    %216 = vector.shape_cast %215 : vector<16xf32> to vector<16x1xf32>
    %cst_138 = arith.constant 3.200000e+01 : f32
    %217 = vector.broadcast %cst_138 : f32 to vector<16x1xf32>
    %218 = arith.divf %216, %217 : vector<16x1xf32>
    %219 = arith.mulf %212, %212 : vector<16x32xf32>
    %cst_139 = arith.constant dense<0.000000e+00> : vector<16xf32>
    %220 = vector.multi_reduction <add>, %219, %cst_139 [1] : vector<16x32xf32> to vector<16xf32>
    %221 = vector.shape_cast %220 : vector<16xf32> to vector<16x1xf32>
    %cst_140 = arith.constant 3.200000e+01 : f32
    %222 = vector.broadcast %cst_140 : f32 to vector<16x1xf32>
    %223 = arith.divf %221, %222 : vector<16x1xf32>
    %224 = vector.broadcast %218 : vector<16x1xf32> to vector<16x32xf32>
    %225 = arith.subf %212, %224 : vector<16x32xf32>
    %226 = arith.mulf %218, %218 : vector<16x1xf32>
    %227 = arith.subf %223, %226 : vector<16x1xf32>
    %cst_141 = arith.constant 9.99999997E-7 : f32
    %228 = vector.broadcast %cst_141 : f32 to vector<16x1xf32>
    %229 = arith.addf %227, %228 : vector<16x1xf32>
    %230 = math.rsqrt %229 : vector<16x1xf32>
    %231 = vector.broadcast %230 : vector<16x1xf32> to vector<16x32xf32>
    %232 = arith.mulf %225, %231 : vector<16x32xf32>
    %233 = vector.broadcast %213 : vector<1x32xf32> to vector<16x32xf32>
    %234 = arith.mulf %232, %233 : vector<16x32xf32>
    %235 = vector.broadcast %214 : vector<1x32xf32> to vector<16x32xf32>
    %236 = arith.addf %234, %235 : vector<16x32xf32>
    %237 = vector.extract_strided_slice %0 {offsets = [10, 0], sizes = [1, 32], strides = [1, 1]} : vector<18x64xf32> to vector<1x32xf32>
    %238 = vector.extract_strided_slice %0 {offsets = [11, 0], sizes = [1, 32], strides = [1, 1]} : vector<18x64xf32> to vector<1x32xf32>
    %c1_142 = arith.constant 1 : index
    %c0_143 = arith.constant 0 : index
    %c0_144 = arith.constant 0 : index
    %c0_145 = arith.constant 0 : index
    %c0_146 = arith.constant 0 : index
    %239 = vector.load %arg3[%c1_142, %c0_143, %c0_144, %c0_145, %c0_146] : memref<2x4x4x32x32xf32, #tpu.memory_space<vmem>>, vector<1x1x1x32x32xf32>
    %240 = vector.shape_cast %239 : vector<1x1x1x32x32xf32> to vector<32x32xf32>
    %cst_147 = arith.constant dense<0.000000e+00> : vector<16x32xf32>
    %241 = tpu.matmul %236, %240, %cst_147 {dimension_numbers = #tpu.dot_dimension_numbers<[1], [0], [0], [1], [0, 0, 1, 1], [], []>} : vector<16x32xf32>, vector<32x32xf32>, vector<16x32xf32> -> vector<16x32xf32>
    %242 = vector.shape_cast %241 : vector<16x32xf32> to vector<2x8x32xf32>
    %c1_148 = arith.constant 1 : index
    %c0_149 = arith.constant 0 : index
    %c1_150 = arith.constant 1 : index
    %c0_151 = arith.constant 0 : index
    %c0_152 = arith.constant 0 : index
    %243 = vector.load %arg3[%c1_148, %c0_149, %c1_150, %c0_151, %c0_152] : memref<2x4x4x32x32xf32, #tpu.memory_space<vmem>>, vector<1x1x1x32x32xf32>
    %244 = vector.shape_cast %243 : vector<1x1x1x32x32xf32> to vector<32x32xf32>
    %cst_153 = arith.constant dense<0.000000e+00> : vector<16x32xf32>
    %245 = tpu.matmul %236, %244, %cst_153 {dimension_numbers = #tpu.dot_dimension_numbers<[1], [0], [0], [1], [0, 0, 1, 1], [], []>} : vector<16x32xf32>, vector<32x32xf32>, vector<16x32xf32> -> vector<16x32xf32>
    %246 = vector.shape_cast %245 : vector<16x32xf32> to vector<2x8x32xf32>
    %c1_154 = arith.constant 1 : index
    %c0_155 = arith.constant 0 : index
    %c2_156 = arith.constant 2 : index
    %c0_157 = arith.constant 0 : index
    %c0_158 = arith.constant 0 : index
    %247 = vector.load %arg3[%c1_154, %c0_155, %c2_156, %c0_157, %c0_158] : memref<2x4x4x32x32xf32, #tpu.memory_space<vmem>>, vector<1x1x1x32x32xf32>
    %248 = vector.shape_cast %247 : vector<1x1x1x32x32xf32> to vector<32x32xf32>
    %cst_159 = arith.constant dense<0.000000e+00> : vector<16x32xf32>
    %249 = tpu.matmul %236, %248, %cst_159 {dimension_numbers = #tpu.dot_dimension_numbers<[1], [0], [0], [1], [0, 0, 1, 1], [], []>} : vector<16x32xf32>, vector<32x32xf32>, vector<16x32xf32> -> vector<16x32xf32>
    %250 = vector.shape_cast %249 : vector<16x32xf32> to vector<2x8x32xf32>
    %c1_160 = arith.constant 1 : index
    %c0_161 = arith.constant 0 : index
    %c3_162 = arith.constant 3 : index
    %c0_163 = arith.constant 0 : index
    %c0_164 = arith.constant 0 : index
    %251 = vector.load %arg3[%c1_160, %c0_161, %c3_162, %c0_163, %c0_164] : memref<2x4x4x32x32xf32, #tpu.memory_space<vmem>>, vector<1x1x1x32x32xf32>
    %252 = vector.shape_cast %251 : vector<1x1x1x32x32xf32> to vector<32x32xf32>
    %cst_165 = arith.constant dense<0.000000e+00> : vector<16x32xf32>
    %253 = tpu.matmul %236, %252, %cst_165 {dimension_numbers = #tpu.dot_dimension_numbers<[1], [0], [0], [1], [0, 0, 1, 1], [], []>} : vector<16x32xf32>, vector<32x32xf32>, vector<16x32xf32> -> vector<16x32xf32>
    %254 = vector.shape_cast %253 : vector<16x32xf32> to vector<2x8x32xf32>
    %255 = tpu.concatenate %242, %246, %250, %254 in 0 : vector<2x8x32xf32>, vector<2x8x32xf32>, vector<2x8x32xf32>, vector<2x8x32xf32> -> vector<8x8x32xf32>
    %c1_166 = arith.constant 1 : index
    %c1_167 = arith.constant 1 : index
    %c0_168 = arith.constant 0 : index
    %c0_169 = arith.constant 0 : index
    %c0_170 = arith.constant 0 : index
    %256 = vector.load %arg3[%c1_166, %c1_167, %c0_168, %c0_169, %c0_170] : memref<2x4x4x32x32xf32, #tpu.memory_space<vmem>>, vector<1x1x1x32x32xf32>
    %257 = vector.shape_cast %256 : vector<1x1x1x32x32xf32> to vector<32x32xf32>
    %cst_171 = arith.constant dense<0.000000e+00> : vector<16x32xf32>
    %258 = tpu.matmul %236, %257, %cst_171 {dimension_numbers = #tpu.dot_dimension_numbers<[1], [0], [0], [1], [0, 0, 1, 1], [], []>} : vector<16x32xf32>, vector<32x32xf32>, vector<16x32xf32> -> vector<16x32xf32>
    %259 = vector.shape_cast %258 : vector<16x32xf32> to vector<2x8x32xf32>
    %c1_172 = arith.constant 1 : index
    %c1_173 = arith.constant 1 : index
    %c1_174 = arith.constant 1 : index
    %c0_175 = arith.constant 0 : index
    %c0_176 = arith.constant 0 : index
    %260 = vector.load %arg3[%c1_172, %c1_173, %c1_174, %c0_175, %c0_176] : memref<2x4x4x32x32xf32, #tpu.memory_space<vmem>>, vector<1x1x1x32x32xf32>
    %261 = vector.shape_cast %260 : vector<1x1x1x32x32xf32> to vector<32x32xf32>
    %cst_177 = arith.constant dense<0.000000e+00> : vector<16x32xf32>
    %262 = tpu.matmul %236, %261, %cst_177 {dimension_numbers = #tpu.dot_dimension_numbers<[1], [0], [0], [1], [0, 0, 1, 1], [], []>} : vector<16x32xf32>, vector<32x32xf32>, vector<16x32xf32> -> vector<16x32xf32>
    %263 = vector.shape_cast %262 : vector<16x32xf32> to vector<2x8x32xf32>
    %c1_178 = arith.constant 1 : index
    %c1_179 = arith.constant 1 : index
    %c2_180 = arith.constant 2 : index
    %c0_181 = arith.constant 0 : index
    %c0_182 = arith.constant 0 : index
    %264 = vector.load %arg3[%c1_178, %c1_179, %c2_180, %c0_181, %c0_182] : memref<2x4x4x32x32xf32, #tpu.memory_space<vmem>>, vector<1x1x1x32x32xf32>
    %265 = vector.shape_cast %264 : vector<1x1x1x32x32xf32> to vector<32x32xf32>
    %cst_183 = arith.constant dense<0.000000e+00> : vector<16x32xf32>
    %266 = tpu.matmul %236, %265, %cst_183 {dimension_numbers = #tpu.dot_dimension_numbers<[1], [0], [0], [1], [0, 0, 1, 1], [], []>} : vector<16x32xf32>, vector<32x32xf32>, vector<16x32xf32> -> vector<16x32xf32>
    %267 = vector.shape_cast %266 : vector<16x32xf32> to vector<2x8x32xf32>
    %c1_184 = arith.constant 1 : index
    %c1_185 = arith.constant 1 : index
    %c3_186 = arith.constant 3 : index
    %c0_187 = arith.constant 0 : index
    %c0_188 = arith.constant 0 : index
    %268 = vector.load %arg3[%c1_184, %c1_185, %c3_186, %c0_187, %c0_188] : memref<2x4x4x32x32xf32, #tpu.memory_space<vmem>>, vector<1x1x1x32x32xf32>
    %269 = vector.shape_cast %268 : vector<1x1x1x32x32xf32> to vector<32x32xf32>
    %cst_189 = arith.constant dense<0.000000e+00> : vector<16x32xf32>
    %270 = tpu.matmul %236, %269, %cst_189 {dimension_numbers = #tpu.dot_dimension_numbers<[1], [0], [0], [1], [0, 0, 1, 1], [], []>} : vector<16x32xf32>, vector<32x32xf32>, vector<16x32xf32> -> vector<16x32xf32>
    %271 = vector.shape_cast %270 : vector<16x32xf32> to vector<2x8x32xf32>
    %272 = tpu.concatenate %259, %263, %267, %271 in 0 : vector<2x8x32xf32>, vector<2x8x32xf32>, vector<2x8x32xf32>, vector<2x8x32xf32> -> vector<8x8x32xf32>
    %273 = vector.shape_cast %236 : vector<16x32xf32> to vector<2x8x32xf32>
    %274 = vector.shape_cast %273 : vector<2x8x32xf32> to vector<1x2x8x32xf32>
    %275 = vector.shape_cast %274 : vector<1x2x8x32xf32> to vector<1x2x8x32xf32>
    %276 = vector.broadcast %275 : vector<1x2x8x32xf32> to vector<4x2x8x32xf32>
    %277 = vector.shape_cast %276 : vector<4x2x8x32xf32> to vector<8x8x32xf32>
    "tpu.trace_start"() <{level = 10 : i32, message = "bqd,bkd->bqk"}> : () -> ()
    %cst_190 = arith.constant dense<0.000000e+00> : vector<8x8x8xf32>
    %278 = tpu.matmul %255, %277, %cst_190 {dimension_numbers = #tpu.dot_dimension_numbers<[2], [2], [1], [1], [0, 0, 0, 1, 1, 1], [0], [0]>} : vector<8x8x32xf32>, vector<8x8x32xf32>, vector<8x8x8xf32> -> vector<8x8x8xf32>
    "tpu.trace_stop"() : () -> ()
    %279 = arith.addf %278, %7 : vector<8x8x8xf32>
    %cst_191 = arith.constant dense<0xFF800000> : vector<8x8xf32>
    %280 = vector.multi_reduction <maximumf>, %279, %cst_191 [2] : vector<8x8x8xf32> to vector<8x8xf32>
    %281 = vector.shape_cast %280 : vector<8x8xf32> to vector<8x8x1xf32>
    %282 = vector.broadcast %281 : vector<8x8x1xf32> to vector<8x8x8xf32>
    %283 = arith.subf %279, %282 : vector<8x8x8xf32>
    %284 = math.exp %283 : vector<8x8x8xf32>
    %cst_192 = arith.constant dense<0.000000e+00> : vector<8x8xf32>
    %285 = vector.multi_reduction <add>, %284, %cst_192 [2] : vector<8x8x8xf32> to vector<8x8xf32>
    %286 = vector.shape_cast %285 : vector<8x8xf32> to vector<8x8x1xf32>
    %287 = tpu.reciprocal %286 : vector<8x8x1xf32> -> vector<8x8x1xf32>
    %288 = vector.broadcast %287 : vector<8x8x1xf32> to vector<8x8x8xf32>
    %289 = arith.mulf %284, %288 : vector<8x8x8xf32>
    "tpu.trace_start"() <{level = 10 : i32, message = "bqk,bkd->bqd"}> : () -> ()
    %cst_193 = arith.constant dense<0.000000e+00> : vector<8x8x32xf32>
    %290 = tpu.matmul %289, %272, %cst_193 {dimension_numbers = #tpu.dot_dimension_numbers<[2], [1], [1], [2], [0, 0, 0, 1, 1, 2], [0], [0]>} : vector<8x8x8xf32>, vector<8x8x32xf32>, vector<8x8x32xf32> -> vector<8x8x32xf32>
    "tpu.trace_stop"() : () -> ()
    %291 = vector.shape_cast %290 : vector<8x8x32xf32> to vector<4x16x32xf32>
    %cst_194 = arith.constant dense<0.000000e+00> : vector<16x32xf32>
    %292 = vector.multi_reduction <add>, %291, %cst_194 [0] : vector<4x16x32xf32> to vector<16x32xf32>
    %293 = arith.addf %292, %236 : vector<16x32xf32>
    %cst_195 = arith.constant dense<0.000000e+00> : vector<16xf32>
    %294 = vector.multi_reduction <add>, %293, %cst_195 [1] : vector<16x32xf32> to vector<16xf32>
    %295 = vector.shape_cast %294 : vector<16xf32> to vector<16x1xf32>
    %cst_196 = arith.constant 3.200000e+01 : f32
    %296 = vector.broadcast %cst_196 : f32 to vector<16x1xf32>
    %297 = arith.divf %295, %296 : vector<16x1xf32>
    %298 = arith.mulf %293, %293 : vector<16x32xf32>
    %cst_197 = arith.constant dense<0.000000e+00> : vector<16xf32>
    %299 = vector.multi_reduction <add>, %298, %cst_197 [1] : vector<16x32xf32> to vector<16xf32>
    %300 = vector.shape_cast %299 : vector<16xf32> to vector<16x1xf32>
    %cst_198 = arith.constant 3.200000e+01 : f32
    %301 = vector.broadcast %cst_198 : f32 to vector<16x1xf32>
    %302 = arith.divf %300, %301 : vector<16x1xf32>
    %303 = vector.broadcast %297 : vector<16x1xf32> to vector<16x32xf32>
    %304 = arith.subf %293, %303 : vector<16x32xf32>
    %305 = arith.mulf %297, %297 : vector<16x1xf32>
    %306 = arith.subf %302, %305 : vector<16x1xf32>
    %cst_199 = arith.constant 9.99999997E-7 : f32
    %307 = vector.broadcast %cst_199 : f32 to vector<16x1xf32>
    %308 = arith.addf %306, %307 : vector<16x1xf32>
    %309 = math.rsqrt %308 : vector<16x1xf32>
    %310 = vector.broadcast %309 : vector<16x1xf32> to vector<16x32xf32>
    %311 = arith.mulf %304, %310 : vector<16x32xf32>
    %312 = vector.broadcast %237 : vector<1x32xf32> to vector<16x32xf32>
    %313 = arith.mulf %311, %312 : vector<16x32xf32>
    %314 = vector.broadcast %238 : vector<1x32xf32> to vector<16x32xf32>
    %315 = arith.addf %313, %314 : vector<16x32xf32>
    %316 = vector.extract_strided_slice %0 {offsets = [12, 0], sizes = [1, 32], strides = [1, 1]} : vector<18x64xf32> to vector<1x32xf32>
    %317 = vector.extract_strided_slice %0 {offsets = [13, 0], sizes = [1, 32], strides = [1, 1]} : vector<18x64xf32> to vector<1x32xf32>
    %c1_200 = arith.constant 1 : index
    %c2_201 = arith.constant 2 : index
    %c0_202 = arith.constant 0 : index
    %c0_203 = arith.constant 0 : index
    %c0_204 = arith.constant 0 : index
    %318 = vector.load %arg3[%c1_200, %c2_201, %c0_202, %c0_203, %c0_204] : memref<2x4x4x32x32xf32, #tpu.memory_space<vmem>>, vector<1x1x1x32x32xf32>
    %319 = vector.shape_cast %318 : vector<1x1x1x32x32xf32> to vector<32x32xf32>
    %cst_205 = arith.constant dense<0.000000e+00> : vector<16x32xf32>
    %320 = tpu.matmul %315, %319, %cst_205 {dimension_numbers = #tpu.dot_dimension_numbers<[1], [0], [0], [1], [0, 0, 1, 1], [], []>} : vector<16x32xf32>, vector<32x32xf32>, vector<16x32xf32> -> vector<16x32xf32>
    %321 = vector.shape_cast %320 : vector<16x32xf32> to vector<2x8x32xf32>
    %c1_206 = arith.constant 1 : index
    %c2_207 = arith.constant 2 : index
    %c1_208 = arith.constant 1 : index
    %c0_209 = arith.constant 0 : index
    %c0_210 = arith.constant 0 : index
    %322 = vector.load %arg3[%c1_206, %c2_207, %c1_208, %c0_209, %c0_210] : memref<2x4x4x32x32xf32, #tpu.memory_space<vmem>>, vector<1x1x1x32x32xf32>
    %323 = vector.shape_cast %322 : vector<1x1x1x32x32xf32> to vector<32x32xf32>
    %cst_211 = arith.constant dense<0.000000e+00> : vector<16x32xf32>
    %324 = tpu.matmul %315, %323, %cst_211 {dimension_numbers = #tpu.dot_dimension_numbers<[1], [0], [0], [1], [0, 0, 1, 1], [], []>} : vector<16x32xf32>, vector<32x32xf32>, vector<16x32xf32> -> vector<16x32xf32>
    %325 = vector.shape_cast %324 : vector<16x32xf32> to vector<2x8x32xf32>
    %c1_212 = arith.constant 1 : index
    %c2_213 = arith.constant 2 : index
    %c2_214 = arith.constant 2 : index
    %c0_215 = arith.constant 0 : index
    %c0_216 = arith.constant 0 : index
    %326 = vector.load %arg3[%c1_212, %c2_213, %c2_214, %c0_215, %c0_216] : memref<2x4x4x32x32xf32, #tpu.memory_space<vmem>>, vector<1x1x1x32x32xf32>
    %327 = vector.shape_cast %326 : vector<1x1x1x32x32xf32> to vector<32x32xf32>
    %cst_217 = arith.constant dense<0.000000e+00> : vector<16x32xf32>
    %328 = tpu.matmul %315, %327, %cst_217 {dimension_numbers = #tpu.dot_dimension_numbers<[1], [0], [0], [1], [0, 0, 1, 1], [], []>} : vector<16x32xf32>, vector<32x32xf32>, vector<16x32xf32> -> vector<16x32xf32>
    %329 = vector.shape_cast %328 : vector<16x32xf32> to vector<2x8x32xf32>
    %c1_218 = arith.constant 1 : index
    %c2_219 = arith.constant 2 : index
    %c3_220 = arith.constant 3 : index
    %c0_221 = arith.constant 0 : index
    %c0_222 = arith.constant 0 : index
    %330 = vector.load %arg3[%c1_218, %c2_219, %c3_220, %c0_221, %c0_222] : memref<2x4x4x32x32xf32, #tpu.memory_space<vmem>>, vector<1x1x1x32x32xf32>
    %331 = vector.shape_cast %330 : vector<1x1x1x32x32xf32> to vector<32x32xf32>
    %cst_223 = arith.constant dense<0.000000e+00> : vector<16x32xf32>
    %332 = tpu.matmul %315, %331, %cst_223 {dimension_numbers = #tpu.dot_dimension_numbers<[1], [0], [0], [1], [0, 0, 1, 1], [], []>} : vector<16x32xf32>, vector<32x32xf32>, vector<16x32xf32> -> vector<16x32xf32>
    %333 = vector.shape_cast %332 : vector<16x32xf32> to vector<2x8x32xf32>
    %334 = tpu.concatenate %321, %325, %329, %333 in 0 : vector<2x8x32xf32>, vector<2x8x32xf32>, vector<2x8x32xf32>, vector<2x8x32xf32> -> vector<8x8x32xf32>
    %c1_224 = arith.constant 1 : index
    %c3_225 = arith.constant 3 : index
    %c0_226 = arith.constant 0 : index
    %c0_227 = arith.constant 0 : index
    %c0_228 = arith.constant 0 : index
    %335 = vector.load %arg3[%c1_224, %c3_225, %c0_226, %c0_227, %c0_228] : memref<2x4x4x32x32xf32, #tpu.memory_space<vmem>>, vector<1x1x1x32x32xf32>
    %336 = vector.shape_cast %335 : vector<1x1x1x32x32xf32> to vector<32x32xf32>
    %cst_229 = arith.constant dense<0.000000e+00> : vector<16x32xf32>
    %337 = tpu.matmul %39, %336, %cst_229 {dimension_numbers = #tpu.dot_dimension_numbers<[1], [0], [0], [1], [0, 0, 1, 1], [], []>} : vector<16x32xf32>, vector<32x32xf32>, vector<16x32xf32> -> vector<16x32xf32>
    %338 = vector.shape_cast %337 : vector<16x32xf32> to vector<2x8x32xf32>
    %c1_230 = arith.constant 1 : index
    %c3_231 = arith.constant 3 : index
    %c1_232 = arith.constant 1 : index
    %c0_233 = arith.constant 0 : index
    %c0_234 = arith.constant 0 : index
    %339 = vector.load %arg3[%c1_230, %c3_231, %c1_232, %c0_233, %c0_234] : memref<2x4x4x32x32xf32, #tpu.memory_space<vmem>>, vector<1x1x1x32x32xf32>
    %340 = vector.shape_cast %339 : vector<1x1x1x32x32xf32> to vector<32x32xf32>
    %cst_235 = arith.constant dense<0.000000e+00> : vector<16x32xf32>
    %341 = tpu.matmul %39, %340, %cst_235 {dimension_numbers = #tpu.dot_dimension_numbers<[1], [0], [0], [1], [0, 0, 1, 1], [], []>} : vector<16x32xf32>, vector<32x32xf32>, vector<16x32xf32> -> vector<16x32xf32>
    %342 = vector.shape_cast %341 : vector<16x32xf32> to vector<2x8x32xf32>
    %c1_236 = arith.constant 1 : index
    %c3_237 = arith.constant 3 : index
    %c2_238 = arith.constant 2 : index
    %c0_239 = arith.constant 0 : index
    %c0_240 = arith.constant 0 : index
    %343 = vector.load %arg3[%c1_236, %c3_237, %c2_238, %c0_239, %c0_240] : memref<2x4x4x32x32xf32, #tpu.memory_space<vmem>>, vector<1x1x1x32x32xf32>
    %344 = vector.shape_cast %343 : vector<1x1x1x32x32xf32> to vector<32x32xf32>
    %cst_241 = arith.constant dense<0.000000e+00> : vector<16x32xf32>
    %345 = tpu.matmul %39, %344, %cst_241 {dimension_numbers = #tpu.dot_dimension_numbers<[1], [0], [0], [1], [0, 0, 1, 1], [], []>} : vector<16x32xf32>, vector<32x32xf32>, vector<16x32xf32> -> vector<16x32xf32>
    %346 = vector.shape_cast %345 : vector<16x32xf32> to vector<2x8x32xf32>
    %c1_242 = arith.constant 1 : index
    %c3_243 = arith.constant 3 : index
    %c3_244 = arith.constant 3 : index
    %c0_245 = arith.constant 0 : index
    %c0_246 = arith.constant 0 : index
    %347 = vector.load %arg3[%c1_242, %c3_243, %c3_244, %c0_245, %c0_246] : memref<2x4x4x32x32xf32, #tpu.memory_space<vmem>>, vector<1x1x1x32x32xf32>
    %348 = vector.shape_cast %347 : vector<1x1x1x32x32xf32> to vector<32x32xf32>
    %cst_247 = arith.constant dense<0.000000e+00> : vector<16x32xf32>
    %349 = tpu.matmul %39, %348, %cst_247 {dimension_numbers = #tpu.dot_dimension_numbers<[1], [0], [0], [1], [0, 0, 1, 1], [], []>} : vector<16x32xf32>, vector<32x32xf32>, vector<16x32xf32> -> vector<16x32xf32>
    %350 = vector.shape_cast %349 : vector<16x32xf32> to vector<2x8x32xf32>
    %351 = tpu.concatenate %338, %342, %346, %350 in 0 : vector<2x8x32xf32>, vector<2x8x32xf32>, vector<2x8x32xf32>, vector<2x8x32xf32> -> vector<8x8x32xf32>
    %352 = vector.shape_cast %39 : vector<16x32xf32> to vector<2x8x32xf32>
    %353 = vector.shape_cast %352 : vector<2x8x32xf32> to vector<1x2x8x32xf32>
    %354 = vector.shape_cast %353 : vector<1x2x8x32xf32> to vector<1x2x8x32xf32>
    %355 = vector.broadcast %354 : vector<1x2x8x32xf32> to vector<4x2x8x32xf32>
    %356 = vector.shape_cast %355 : vector<4x2x8x32xf32> to vector<8x8x32xf32>
    "tpu.trace_start"() <{level = 10 : i32, message = "bqd,bkd->bqk"}> : () -> ()
    %cst_248 = arith.constant dense<0.000000e+00> : vector<8x8x8xf32>
    %357 = tpu.matmul %334, %356, %cst_248 {dimension_numbers = #tpu.dot_dimension_numbers<[2], [2], [1], [1], [0, 0, 0, 1, 1, 1], [0], [0]>} : vector<8x8x32xf32>, vector<8x8x32xf32>, vector<8x8x8xf32> -> vector<8x8x8xf32>
    "tpu.trace_stop"() : () -> ()
    %358 = arith.addf %357, %13 : vector<8x8x8xf32>
    %cst_249 = arith.constant dense<0xFF800000> : vector<8x8xf32>
    %359 = vector.multi_reduction <maximumf>, %358, %cst_249 [2] : vector<8x8x8xf32> to vector<8x8xf32>
    %360 = vector.shape_cast %359 : vector<8x8xf32> to vector<8x8x1xf32>
    %361 = vector.broadcast %360 : vector<8x8x1xf32> to vector<8x8x8xf32>
    %362 = arith.subf %358, %361 : vector<8x8x8xf32>
    %363 = math.exp %362 : vector<8x8x8xf32>
    %cst_250 = arith.constant dense<0.000000e+00> : vector<8x8xf32>
    %364 = vector.multi_reduction <add>, %363, %cst_250 [2] : vector<8x8x8xf32> to vector<8x8xf32>
    %365 = vector.shape_cast %364 : vector<8x8xf32> to vector<8x8x1xf32>
    %366 = tpu.reciprocal %365 : vector<8x8x1xf32> -> vector<8x8x1xf32>
    %367 = vector.broadcast %366 : vector<8x8x1xf32> to vector<8x8x8xf32>
    %368 = arith.mulf %363, %367 : vector<8x8x8xf32>
    "tpu.trace_start"() <{level = 10 : i32, message = "bqk,bkd->bqd"}> : () -> ()
    %cst_251 = arith.constant dense<0.000000e+00> : vector<8x8x32xf32>
    %369 = tpu.matmul %368, %351, %cst_251 {dimension_numbers = #tpu.dot_dimension_numbers<[2], [1], [1], [2], [0, 0, 0, 1, 1, 2], [0], [0]>} : vector<8x8x8xf32>, vector<8x8x32xf32>, vector<8x8x32xf32> -> vector<8x8x32xf32>
    "tpu.trace_stop"() : () -> ()
    %370 = vector.shape_cast %369 : vector<8x8x32xf32> to vector<4x16x32xf32>
    %cst_252 = arith.constant dense<0.000000e+00> : vector<16x32xf32>
    %371 = vector.multi_reduction <add>, %370, %cst_252 [0] : vector<4x16x32xf32> to vector<16x32xf32>
    %372 = arith.addf %371, %315 : vector<16x32xf32>
    %cst_253 = arith.constant dense<0.000000e+00> : vector<16xf32>
    %373 = vector.multi_reduction <add>, %372, %cst_253 [1] : vector<16x32xf32> to vector<16xf32>
    %374 = vector.shape_cast %373 : vector<16xf32> to vector<16x1xf32>
    %cst_254 = arith.constant 3.200000e+01 : f32
    %375 = vector.broadcast %cst_254 : f32 to vector<16x1xf32>
    %376 = arith.divf %374, %375 : vector<16x1xf32>
    %377 = arith.mulf %372, %372 : vector<16x32xf32>
    %cst_255 = arith.constant dense<0.000000e+00> : vector<16xf32>
    %378 = vector.multi_reduction <add>, %377, %cst_255 [1] : vector<16x32xf32> to vector<16xf32>
    %379 = vector.shape_cast %378 : vector<16xf32> to vector<16x1xf32>
    %cst_256 = arith.constant 3.200000e+01 : f32
    %380 = vector.broadcast %cst_256 : f32 to vector<16x1xf32>
    %381 = arith.divf %379, %380 : vector<16x1xf32>
    %382 = vector.broadcast %376 : vector<16x1xf32> to vector<16x32xf32>
    %383 = arith.subf %372, %382 : vector<16x32xf32>
    %384 = arith.mulf %376, %376 : vector<16x1xf32>
    %385 = arith.subf %381, %384 : vector<16x1xf32>
    %cst_257 = arith.constant 9.99999997E-7 : f32
    %386 = vector.broadcast %cst_257 : f32 to vector<16x1xf32>
    %387 = arith.addf %385, %386 : vector<16x1xf32>
    %388 = math.rsqrt %387 : vector<16x1xf32>
    %389 = vector.broadcast %388 : vector<16x1xf32> to vector<16x32xf32>
    %390 = arith.mulf %383, %389 : vector<16x32xf32>
    %391 = vector.broadcast %316 : vector<1x32xf32> to vector<16x32xf32>
    %392 = arith.mulf %390, %391 : vector<16x32xf32>
    %393 = vector.broadcast %317 : vector<1x32xf32> to vector<16x32xf32>
    %394 = arith.addf %392, %393 : vector<16x32xf32>
    %c1_258 = arith.constant 1 : index
    %c0_259 = arith.constant 0 : index
    %c0_260 = arith.constant 0 : index
    %c0_261 = arith.constant 0 : index
    %395 = vector.load %arg4[%c1_258, %c0_259, %c0_260, %c0_261] : memref<2x2x32x64xf32, #tpu.memory_space<vmem>>, vector<1x1x32x64xf32>
    %396 = vector.shape_cast %395 : vector<1x1x32x64xf32> to vector<32x64xf32>
    %cst_262 = arith.constant dense<0.000000e+00> : vector<16x64xf32>
    %397 = tpu.matmul %394, %396, %cst_262 {dimension_numbers = #tpu.dot_dimension_numbers<[1], [0], [0], [1], [0, 0, 1, 1], [], []>} : vector<16x32xf32>, vector<32x64xf32>, vector<16x64xf32> -> vector<16x64xf32>
    %398 = vector.extract_strided_slice %0 {offsets = [16, 0], sizes = [1, 64], strides = [1, 1]} : vector<18x64xf32> to vector<1x64xf32>
    %399 = vector.broadcast %398 : vector<1x64xf32> to vector<16x64xf32>
    %400 = arith.addf %397, %399 : vector<16x64xf32>
    %cst_263 = arith.constant 0.000000e+00 : f32
    %401 = vector.broadcast %cst_263 : f32 to vector<16x64xf32>
    %402 = arith.maximumf %400, %401 : vector<16x64xf32>
    %c1_264 = arith.constant 1 : index
    %c1_265 = arith.constant 1 : index
    %c0_266 = arith.constant 0 : index
    %c0_267 = arith.constant 0 : index
    %403 = vector.load %arg4[%c1_264, %c1_265, %c0_266, %c0_267] : memref<2x2x32x64xf32, #tpu.memory_space<vmem>>, vector<1x1x32x64xf32>
    %404 = vector.shape_cast %403 : vector<1x1x32x64xf32> to vector<32x64xf32>
    %cst_268 = arith.constant dense<0.000000e+00> : vector<16x32xf32>
    %405 = tpu.matmul %402, %404, %cst_268 {dimension_numbers = #tpu.dot_dimension_numbers<[1], [1], [0], [0], [0, 0, 1, 0], [], []>} : vector<16x64xf32>, vector<32x64xf32>, vector<16x32xf32> -> vector<16x32xf32>
    %406 = vector.extract_strided_slice %0 {offsets = [17, 0], sizes = [1, 32], strides = [1, 1]} : vector<18x64xf32> to vector<1x32xf32>
    %407 = vector.broadcast %406 : vector<1x32xf32> to vector<16x32xf32>
    %408 = arith.addf %405, %407 : vector<16x32xf32>
    %409 = arith.addf %408, %394 : vector<16x32xf32>
    %410 = vector.extract_strided_slice %0 {offsets = [14, 0], sizes = [1, 32], strides = [1, 1]} : vector<18x64xf32> to vector<1x32xf32>
    %411 = vector.extract_strided_slice %0 {offsets = [15, 0], sizes = [1, 32], strides = [1, 1]} : vector<18x64xf32> to vector<1x32xf32>
    %cst_269 = arith.constant dense<0.000000e+00> : vector<16xf32>
    %412 = vector.multi_reduction <add>, %409, %cst_269 [1] : vector<16x32xf32> to vector<16xf32>
    %413 = vector.shape_cast %412 : vector<16xf32> to vector<16x1xf32>
    %cst_270 = arith.constant 3.200000e+01 : f32
    %414 = vector.broadcast %cst_270 : f32 to vector<16x1xf32>
    %415 = arith.divf %413, %414 : vector<16x1xf32>
    %416 = arith.mulf %409, %409 : vector<16x32xf32>
    %cst_271 = arith.constant dense<0.000000e+00> : vector<16xf32>
    %417 = vector.multi_reduction <add>, %416, %cst_271 [1] : vector<16x32xf32> to vector<16xf32>
    %418 = vector.shape_cast %417 : vector<16xf32> to vector<16x1xf32>
    %cst_272 = arith.constant 3.200000e+01 : f32
    %419 = vector.broadcast %cst_272 : f32 to vector<16x1xf32>
    %420 = arith.divf %418, %419 : vector<16x1xf32>
    %421 = vector.broadcast %415 : vector<16x1xf32> to vector<16x32xf32>
    %422 = arith.subf %409, %421 : vector<16x32xf32>
    %423 = arith.mulf %415, %415 : vector<16x1xf32>
    %424 = arith.subf %420, %423 : vector<16x1xf32>
    %cst_273 = arith.constant 9.99999997E-7 : f32
    %425 = vector.broadcast %cst_273 : f32 to vector<16x1xf32>
    %426 = arith.addf %424, %425 : vector<16x1xf32>
    %427 = math.rsqrt %426 : vector<16x1xf32>
    %428 = vector.broadcast %427 : vector<16x1xf32> to vector<16x32xf32>
    %429 = arith.mulf %422, %428 : vector<16x32xf32>
    %430 = vector.broadcast %410 : vector<1x32xf32> to vector<16x32xf32>
    %431 = arith.mulf %429, %430 : vector<16x32xf32>
    %432 = vector.broadcast %411 : vector<1x32xf32> to vector<16x32xf32>
    %433 = arith.addf %431, %432 : vector<16x32xf32>
    %c0_274 = arith.constant 0 : index
    %c0_275 = arith.constant 0 : index
    %434 = vector.load %arg6[%c0_274, %c0_275] : memref<16x32xf32, #tpu.memory_space<vmem>>, vector<16x32xf32>
    tpu.vector_store %arg6[%c0_274, %c0_275], %433 {strides = array<i32>} : memref<16x32xf32, #tpu.memory_space<vmem>>, vector<16x32xf32>,
    return
  }
}

</mosaic_0001>

<bundles_post_ra>
// kernel: lyrics_decoder_tc_forward.1
= control target key start
LH: loop header
LB: loop body
LE: loop exit
PB: predicated region body
PF: predicated region fallthrough
CT: control target
= control target key end

     0   :  { %11 = vsyncpa [#allocation3], 0  ;;  %s11160_s0 = inlined_call_operand.vmem [shape: f32[16,32], index: 0, kind: input, shape index: {}]   ;;  %s11161_s1 = inlined_call_operand.vmem [shape: f32[16,32], index: 1, kind: input, shape index: {}]   ;;  %s11162_s2 = inlined_call_operand.vmem [shape: f32[2,2,8,8], index: 2, kind: input, shape index: {}]   ;;  %s11163_s3 = inlined_call_operand.hbm [shape: f32[2,4,4,32,32], index: 3, kind: input, shape index: {}]   ;;  %s11164_s4 = inlined_call_operand.vmem [shape: f32[2,2,32,64], index: 4, kind: input, shape index: {}]   ;;  %s11165_s5 = inlined_call_operand.vmem [shape: f32[18,64], index: 5, kind: input, shape index: {}]   ;;  %s11166_s6 = inlined_call_operand.hbm [shape: f32[16,32], index: 6, kind: output, shape index: {}]  }
   0x1   :  { %12 = vsyncpa [#allocation4], 0  ;;  %s10196_s21 = smov [#allocation2]   ;;  %s10148_s25 = scalar_lea.hbm %s11163_s3, 16384 }
   0x2   :  { %s24_s22 = sshll.u32 %s10196_s21, 4  ;;  %p10149_p0 = scmp.ne.s32.totalorder %s11163_s3, %s10148_s25  ;;  %s25_s22 = int_to_ptr.vmem [resolvable:$true] %s24_s22 }
   0x3   :  { %p10152_p1 = scmp.lt.u32.totalorder %s10148_s25, %s11163_s3 }
   0x5   :  { %p10154_p2 = pnand %p10152_p1, %p10149_p0 }
   0x7   :  { %10157 = shalt.err (!%p10154_p2)
}
   0x8   :  { %s10158_s30 = scalar_lea.vmem %s25_s22, 16384  ;;  %p10163_p4 = scmp.lt.s32.totalorder %s25_s22, %s25_s22 }
   0x9   :  { %p10159_p3 = scmp.ne.s32.totalorder %s25_s22, %s10158_s30  ;;  %p10164_p5 = scmp.lt.s32.totalorder %s10158_s30, %s10158_s30 }
   0xb   :  { %p10165_p6 = por %p10164_p5, %p10163_p4 }
   0xd   :  { %p10166_p7 = pnand %p10165_p6, %p10159_p3 }
   0xf   :  { %10169 = shalt.err (!%p10166_p7)
}
  0x10   :  { %s10197_s7 = smov 128   ;;  %s10198_s8 = smov 8  }
  0x11   :  { %30 = dma.hbm_to_vmem [thread:$0]  %s11163_s3, 16384, %s25_s22, [#allocation3], %s10197_s7, %s10197_s7, %s10198_s8  }
  0x12   :  { %10192 = dma.done.wait [#allocation3], 16384  }
  0x13   :  { %10193 = vsyncadd [#allocation3], 4294950912  ;;  %vm47_vm0 = vcmask 261120   ;;  %v10255_v0 = vld [vmem:[%s11160_s0] sm:$0xff]  ;;  %v10260_v1 = vld [vmem:[%s11160_s0 + $0x8] sm:$0xff]  ;;  %v79_v34 = vlaneseq  ;;  %vm10200_vm1 = vmmov 0  }
  0x14   :  { %v48_v2 = vsel %vm47_vm0, %v10255_v0, 0.0  ;;  %v57_v3 = vmul.f32 %v10255_v0, %v10255_v0  ;;  %v58_v4 = vmul.f32 %v10260_v1, %v10260_v1  ;;  %v51_v6 = vsel %vm47_vm0, %v10260_v1, 0.0  ;;  %v93_v8 = vld [vmem:[#allocation2] sm:$0xff]  ;;  %v94_v9 = vld [vmem:[#allocation2 + $0x8] sm:$0xff]  ;;  %v95_v14 = vld [vmem:[#allocation2 + $0x10] sm:$0xff] }
  0x15   :  { %49 = vadd.xlane.f32.xlu0 %v48_v2  ;;  %v179_v10 = vld [vmem:[#allocation2 + $0x20] sm:$0xff]  ;;  %v9682_v11 = vpack.c.bf16 %v94_v9, %v93_v8  ;;  %v180_v12 = vld [vmem:[#allocation2 + $0x28] sm:$0xff]  ;;  %v96_v15 = vld [vmem:[#allocation2 + $0x18] sm:$0xff]  ;;  %v10272_v40 = vshrl.u32 %v79_v34, 7  ;;  %vm1322_vm2 = vcmask 64512   ;;  %vm4119_vm3 = vcmask 523264  }
  0x16   :  { %v59_v5 = vsel %vm47_vm0, %v57_v3, 0.0  ;;  %v62_v7 = vsel %vm47_vm0, %v58_v4, 0.0  ;;  %v9690_v13 = vpack.c.bf16 %v180_v12, %v179_v10  ;;  %v181_v16 = vld [vmem:[#allocation2 + $0x30] sm:$0xff]  ;;  %v9686_v17 = vpack.c.bf16 %v96_v15, %v95_v14  ;;  %v182_v18 = vld [vmem:[#allocation2 + $0x38] sm:$0xff]  ;;  %v259_v20 = vld [vmem:[#allocation2 + $0x40] sm:$0xff] }
  0x17   :  { %60 = vadd.xlane.f32.xlu1 %v59_v5  ;;  %9683 = vmatprep.subr.bf16.mxu0 %v9682_v11  ;;  %v9694_v19 = vpack.c.bf16 %v182_v18, %v181_v16  ;;  %v260_v21 = vld [vmem:[#allocation2 + $0x48] sm:$0xff]  ;;  %v339_v22 = vld [vmem:[#allocation2 + $0x60] sm:$0xff]  ;;  %v10275_v42 = vsub.s32 0, %v10272_v40  ;;  %v10283_v44 = vsub.s32 1, %v10272_v40  ;;  %v261_v55 = vld [vmem:[#allocation2 + $0x50] sm:$0xff] }
  0x18   :  { %9691 = vmatprep.subr.bf16.mxu1 %v9690_v13  ;;  %9685 = vmatpush3.bf16.msra.mxu0 %v9682_v11  ;;  %v9698_v23 = vpack.c.bf16 %v260_v21, %v259_v20  ;;  %v340_v24 = vld [vmem:[#allocation2 + $0x68] sm:$0xff]  ;;  %v10280_v43 = vld [vmem:[%s11165_s5] sm:$0xff]  ;;  %v262_v57 = vld [vmem:[#allocation2 + $0x58] sm:$0xff] }
  0x19   :  { %52 = vadd.xlane.f32.xlu0 %v51_v6  ;;  %9693 = vmatpush3.bf16.msra.mxu1 %v9690_v13  ;;  %v9706_v25 = vpack.c.bf16 %v340_v24, %v339_v22  ;;  %v82_v46 = vrot.slane %v10280_v43, %v10275_v42  ;;  %v88_v49 = vrot.slane %v10280_v43, %v10283_v44  ;;  %v341_v58 = vld [vmem:[#allocation2 + $0x70] sm:$0xff]  ;;  %v342_v59 = vld [vmem:[#allocation2 + $0x78] sm:$0xff]  ;;  %v419_v61 = vld [vmem:[#allocation2 + $0x80] sm:$0xff] }
  0x1a   :  { %9687 = vmatprep.subr.bf16.mxu0 %v9686_v17  ;;  %9695 = vmatprep.subr.bf16.mxu1 %v9694_v19  ;;  %v9702_v62 = vpack.c.bf16 %v262_v57, %v261_v55  ;;  %v9710_v63 = vpack.c.bf16 %v342_v59, %v341_v58  ;;  %v500_v2 = vld [vmem:[#allocation2 + $0xa8] sm:$0xff]  ;;  %v421_v5 = vld [vmem:[#allocation2 + $0x90] sm:$0xff]  ;;  %v422_v6 = vld [vmem:[#allocation2 + $0x98] sm:$0xff] }
  0x1b   :  { %63 = vadd.xlane.f32.xlu1 %v62_v7  ;;  %v501_v7 = vld [vmem:[#allocation2 + $0xb0] sm:$0xff]  ;;  %v502_v8 = vld [vmem:[#allocation2 + $0xb8] sm:$0xff]  ;;  %v9718_v9 = vpack.c.bf16 %v422_v6, %v421_v5  ;;  %v579_v11 = vld [vmem:[#allocation2 + $0xc0] sm:$0xff] }
  0x1c   :  { %9689 = vmatpush3.bf16.msra.mxu0 %v9686_v17  ;;  %v9726_v10 = vpack.c.bf16 %v502_v8, %v501_v7  ;;  %v580_v12 = vld [vmem:[#allocation2 + $0xc8] sm:$0xff]  ;;  %v659_v13 = vld [vmem:[#allocation2 + $0xe0] sm:$0xff]  ;;  %v581_v17 = vld [vmem:[#allocation2 + $0xd0] sm:$0xff] }
  0x1d   :  { %9697 = vmatpush3.bf16.msra.mxu1 %v9694_v19  ;;  %9699 = vmatprep.subr.bf16.mxu0 %v9698_v23  ;;  %v660_v14 = vld [vmem:[#allocation2 + $0xe8] sm:$0xff]  ;;  %v9730_v15 = vpack.c.bf16 %v580_v12, %v579_v11  ;;  %v582_v18 = vld [vmem:[#allocation2 + $0xd8] sm:$0xff]  ;;  %v661_v19 = vld [vmem:[#allocation2 + $0xf0] sm:$0xff] }
  0x1e   :  { %9707 = vmatprep.subr.bf16.mxu1 %v9706_v25  ;;  %v9738_v16 = vpack.c.bf16 %v660_v14, %v659_v13  ;;  %v662_v20 = vld [vmem:[#allocation2 + $0xf8] sm:$0xff]  ;;  %v9734_v21 = vpack.c.bf16 %v582_v18, %v581_v17  ;;  %vm10674_vm4 = vmpackc.low %vm4119_vm3, %vm4119_vm3 }
  0x1f   :  { %v9742_v22 = vpack.c.bf16 %v662_v20, %v661_v19 }
  0xa2   :  { %v50_v26 = vpop.xlane.xlu0 %49 }
  0xa3   :  { %v55_v27 = vmul.f32 0.03125, %v50_v26 }
  0xa4   :  { %v61_v28 = vpop.xlane.xlu1 %60 }
  0xa5   :  { %v69_v29 = vmul.f32 %v55_v27, %v55_v27  ;;  %v65_v30 = vmul.f32 0.03125, %v61_v28  ;;  %v67_v45 = vsub.f32 %v10255_v0, %v55_v27  ;;  %v420_v0 = vld [vmem:[#allocation2 + $0x88] sm:$0xff] }
  0xa6   :  { %v53_v31 = vpop.xlane.xlu0 %52  ;;  %v9714_v3 = vpack.c.bf16 %v420_v0, %v419_v61 }
  0xa7   :  { %v71_v32 = vsub.f32 %v65_v30, %v69_v29  ;;  %v56_v33 = vmul.f32 0.03125, %v53_v31 }
  0xa8   :  { %v64_v35 = vpop.xlane.xlu1 %63 }
  0xa9   :  { %v73_v36 = vadd.f32 1e-06, %v71_v32  ;;  %v70_v37 = vmul.f32 %v56_v33, %v56_v33  ;;  %v66_v38 = vmul.f32 0.03125, %v64_v35  ;;  %v68_v51 = vsub.f32 %v10260_v1, %v56_v33  ;;  %v499_v1 = vld [vmem:[#allocation2 + $0xa0] sm:$0xff] }
  0xaa   :  { %v9722_v4 = vpack.c.bf16 %v500_v2, %v499_v1 }
  0xab   :  { %9984 = vrsqrt.f32 %v73_v36  ;;  %v72_v39 = vsub.f32 %v66_v38, %v70_v37 }
  0xad   :  { %v74_v41 = vadd.f32 1e-06, %v72_v39 }
  0xaf   :  { %9986 = vrsqrt.f32 %v74_v41  ;;  %v41_v41 = vld [vmem:[%s11162_s2] sm:$0xff] }
  0xb5   :  { %v9985_v47 = vpop.eup %9984 }
  0xb6   :  { %v77_v48 = vmul.f32 %v9985_v47, %v67_v45 }
  0xb8   :  { %v83_v50 = vmul.f32 %v82_v46, %v77_v48 }
  0xb9   :  { %v9987_v52 = vpop.eup %9986 }
  0xba   :  { %v10291_v53 = vadd.f32 %v88_v49, %v83_v50  ;;  %v78_v54 = vmul.f32 %v9987_v52, %v68_v51  ;;  %v42_v51 = vld [vmem:[%s11162_s2 + $0x8] sm:$0xff] }
  0xbc   :  { %v84_v56 = vmul.f32 %v82_v46, %v78_v54  ;;  %8974 = vmatprep.mubr.msk.f32.mxu0 %vm47_vm0, %v10291_v53  ;;  %8985 = vmatprep.mubr.msk.f32.mxu1 %vm47_vm0, %v10291_v53 }
  0xbe   :  { %v10297_v60 = vadd.f32 %v88_v49, %v84_v56 }
  0xc0   :  { %8975 = vmatmul.mubr.msk.f32.vlgmr.msra.gmra.mrb[0].mxu0 %vm47_vm0, %v10297_v60  ;;  %8986 = vmatmul.mubr.msk.f32.vlgmr.msra.gmra.mrb[0].mxu1 %vm47_vm0, %v10297_v60 }
  0xc1   :  { %9701 = vmatpush3.bf16.msra.mxu0 %v9698_v23  ;;  %9709 = vmatpush3.bf16.msra.mxu1 %v9706_v25  ;;  %v10199_v23 = vmov 0.0  }
  0xc2   :  { %8996 = vmatprep.mubr.msk.f32.mxu0 %vm47_vm0, %v10291_v53  ;;  %9007 = vmatprep.mubr.msk.f32.mxu1 %vm47_vm0, %v10291_v53 }
  0xc3   :  { %9703 = vmatprep.subr.bf16.mxu0 %v9702_v62  ;;  %9711 = vmatprep.subr.bf16.mxu1 %v9710_v63 }
  0xc5   :  { %9705 = vmatpush3.bf16.msra.mxu0 %v9702_v62  ;;  %9713 = vmatpush3.bf16.msra.mxu1 %v9710_v63 }
  0xc6   :  { %9715 = vmatprep.subr.bf16.mxu0 %v9714_v3  ;;  %9723 = vmatprep.subr.bf16.mxu1 %v9722_v4 }
  0xc8   :  { %8997 = vmatmul.mubr.msk.f32.vlgmr.msra.gmra.mrb[2].mxu0 %vm47_vm0, %v10297_v60  ;;  %9008 = vmatmul.mubr.msk.f32.vlgmr.msra.gmra.mrb[2].mxu1 %vm47_vm0, %v10297_v60 }
  0xc9   :  { %9717 = vmatpush3.bf16.msra.mxu0 %v9714_v3  ;;  %9018 = vmatprep.mubr.msk.f32.mxu0 %vm47_vm0, %v10291_v53 }
  0xca   :  { %9725 = vmatpush3.bf16.msra.mxu1 %v9722_v4  ;;  %9029 = vmatprep.mubr.msk.f32.mxu1 %vm47_vm0, %v10291_v53 }
  0xcb   :  { %9719 = vmatprep.subr.bf16.mxu0 %v9718_v9  ;;  %9727 = vmatprep.subr.bf16.mxu1 %v9726_v10 }
  0xcd   :  { %9721 = vmatpush3.bf16.msra.mxu0 %v9718_v9 }
  0xce   :  { %9729 = vmatpush3.bf16.msra.mxu1 %v9726_v10  ;;  %9731 = vmatprep.subr.bf16.mxu0 %v9730_v15 }
  0xcf   :  { %9739 = vmatprep.subr.bf16.mxu1 %v9738_v16 }
  0xd0   :  { %9019 = vmatmul.mubr.msk.f32.vlgmr.msra.gmra.mrb[4].mxu0 %vm47_vm0, %v10297_v60 }
  0xd1   :  { %9030 = vmatmul.mubr.msk.f32.vlgmr.msra.gmra.mrb[4].mxu1 %vm47_vm0, %v10297_v60  ;;  %9733 = vmatpush3.bf16.msra.mxu0 %v9730_v15 }
  0xd2   :  { %9040 = vmatprep.mubr.msk.f32.mxu0 %vm47_vm0, %v10291_v53  ;;  %9741 = vmatpush3.bf16.msra.mxu1 %v9738_v16 }
  0xd3   :  { %9051 = vmatprep.mubr.msk.f32.mxu1 %vm47_vm0, %v10291_v53  ;;  %9735 = vmatprep.subr.bf16.mxu0 %v9734_v21 }
  0xd4   :  { %9743 = vmatprep.subr.bf16.mxu1 %v9742_v22 }
  0xd5   :  { %9737 = vmatpush3.bf16.msra.mxu0 %v9734_v21 }
  0xd6   :  { %9745 = vmatpush3.bf16.msra.mxu1 %v9742_v22  ;;  %9054 = vmatprep.subr.mxu0 %v10199_v23 }
  0xd7   :  { %9069 = vmatprep.subr.mxu1 %v10199_v23 }
  0xd8   :  { %9041 = vmatmul.mubr.msk.f32.vlgmr.msra.gmra.mrb[6].mxu0 %vm47_vm0, %v10297_v60 }
  0xd9   :  { %9052 = vmatmul.mubr.msk.f32.vlgmr.msra.gmra.mrb[6].mxu1 %vm47_vm0, %v10297_v60  ;;  %9056 = vmatprep.mubr.msk.f32.mxu0 %vm10200_vm1, %v10199_v23 }
  0xda   :  { %9071 = vmatprep.mubr.msk.f32.mxu1 %vm10200_vm1, %v10199_v23 }
  0xde   :  { %9055 = vmatpush3.xpose.msk.msra.mxu0 %vm47_vm0, %v10291_v53 }
  0xdf   :  { %9070 = vmatpush3.xpose.msk.msra.mxu1 %vm47_vm0, %v10297_v60  ;;  %9059 = vmatprep.subr.mxu0 %v10199_v23 }
  0xe0   :  { %9079 = vmatprep.subr.mxu1 %v10199_v23 }
 0x193   :  { %v8976_v24 = vpop.f32.mrb[0].mxu0  ;;  %v8987_v25 = vpop.f32.mrb[0].mxu1 }
 0x194   :  { %v169_v26 = vpop.f32.mrb[1].mxu0  ;;  %v249_v27 = vpop.f32.mrb[1].mxu1  ;;  %9072 = vmatmul.mubr.msk.f32.vlgmr.msra.gmra.mrb[8].mxu1 %vm47_vm0, %v8987_v25 }
 0x195   :  { %9080 = vmatpush3.xpose.msk.msra.mxu1 %vm47_vm0, %v10297_v60  ;;  %9057 = vmatmul.mubr.msk.f32.vlgmr.msra.gmra.mrb[8].mxu0 %vm47_vm0, %v169_v26 }
 0x196   :  { %9060 = vmatpush3.xpose.msk.msra.mxu0 %vm47_vm0, %v10297_v60  ;;  %9061 = vmatprep.mubr.msk.f32.mxu0 %vm10200_vm1, %v10199_v23 }
 0x197   :  { %9064 = vmatprep.subr.mxu0 %v10199_v23  ;;  %9081 = vmatprep.mubr.msk.f32.mxu1 %vm10200_vm1, %v10199_v23 }
 0x198   :  { %9089 = vmatprep.subr.mxu1 %v10199_v23 }
 0x199   :  { %9062 = vmatmul.mubr.msk.f32.vlgmr.msra.gmra.mrb[10].mxu0 %vm47_vm0, %v8976_v24 }
 0x19a   :  { %9065 = vmatpush3.xpose.msk.msra.mxu0 %vm47_vm0, %v10291_v53  ;;  %9066 = vmatprep.mubr.msk.f32.mxu0 %vm10200_vm1, %v10199_v23 }
 0x19b   :  { %v8998_v28 = vpop.f32.mrb[2].mxu0  ;;  %v9009_v29 = vpop.f32.mrb[2].mxu1  ;;  %9074 = vmatprep.subr.mxu0 %v10199_v23 }
 0x19c   :  { %v329_v30 = vpop.f32.mrb[3].mxu0  ;;  %v409_v31 = vpop.f32.mrb[3].mxu1  ;;  %9082 = vmatmul.mubr.msk.f32.vlgmr.msra.gmra.mrb[10].mxu1 %vm47_vm0, %v8998_v28 }
 0x19d   :  { %9090 = vmatpush3.xpose.msk.msra.mxu1 %vm47_vm0, %v10297_v60  ;;  %9067 = vmatmul.mubr.msk.f32.vlgmr.msra.gmra.mrb[12].mxu0 %vm47_vm0, %v249_v27 }
 0x19e   :  { %9075 = vmatpush3.xpose.msk.msra.mxu0 %vm47_vm0, %v10291_v53  ;;  %9091 = vmatprep.mubr.msk.f32.mxu1 %vm10200_vm1, %v10199_v23 }
 0x19f   :  { %9076 = vmatprep.mubr.msk.f32.mxu0 %vm10200_vm1, %v10199_v23  ;;  %9084 = vmatprep.subr.mxu0 %v10199_v23 }
 0x1a0   :  { %9092 = vmatmul.mubr.msk.f32.vlgmr.msra.gmra.mrb[12].mxu1 %vm47_vm0, %v9009_v29  ;;  %9099 = vmatprep.subr.mxu1 %v10199_v23 }
 0x1a1   :  { %9077 = vmatmul.mubr.msk.f32.vlgmr.msra.gmra.mrb[14].mxu0 %vm47_vm0, %v329_v30  ;;  %9101 = vmatprep.mubr.msk.f32.mxu1 %vm10200_vm1, %v10199_v23 }
 0x1a2   :  { %9085 = vmatpush3.xpose.msk.msra.mxu0 %vm47_vm0, %v10291_v53  ;;  %9086 = vmatprep.mubr.msk.f32.mxu0 %vm10200_vm1, %v10199_v23 }
 0x1a3   :  { %v9020_v32 = vpop.f32.mrb[4].mxu0  ;;  %9094 = vmatprep.subr.mxu0 %v10199_v23 }
 0x1a4   :  { %v10378_v33 = vpop.f32.mrb[4].mxu1  ;;  %v489_v34 = vpop.f32.mrb[5].mxu0  ;;  %9100 = vmatpush3.msra.mxu1 %v9020_v32 }
 0x1a5   :  { %v10380_v35 = vpop.f32.mrb[5].mxu1  ;;  %9087 = vmatmul.mubr.msk.f32.vlgmr.msra.gmra.mrb[16].mxu0 %vm47_vm0, %v409_v31  ;;  %9109 = vmatprep.subr.mxu1 %v10199_v23 }
 0x1a6   :  { %9095 = vmatpush3.msra.mxu0 %v489_v34  ;;  %9096 = vmatprep.mubr.msk.f32.mxu0 %vm10200_vm1, %v10199_v23 }
 0x1a7   :  { %9104 = vmatprep.subr.mxu0 %v10199_v23 }
 0x1ab   :  { %v10387_v36 = vpop.f32.mrb[6].mxu0 }
 0x1ac   :  { %v10389_v37 = vpop.f32.mrb[6].mxu1  ;;  %v10391_v38 = vpop.f32.mrb[7].mxu0 }
 0x1ad   :  { %v10393_v39 = vpop.f32.mrb[7].mxu1 }
 0x267   :  { %v1026_v45 = vpop.f32.mrb[8].mxu1 }
 0x268   :  { %v807_v46 = vpop.f32.mrb[8].mxu0  ;;  %v9073_v47 = vpop.f32.mrb[9].mxu1  ;;  %v1027_v56 = vadd.f32 %v1026_v45, %v42_v51 }
 0x269   :  { %v808_v48 = vadd.f32 %v807_v46, %v41_v41  ;;  %v9058_v49 = vpop.f32.mrb[9].mxu0 }
 0x26a   :  { %v1332_v2 = vsel %vm1322_vm2, %v1027_v56, -inf }
 0x26b   :  { %v1323_v50 = vsel %vm1322_vm2, %v808_v48, -inf }
 0x26c   :  { %1324 = vmax.xlane.f32.xlu0 %v1323_v50  ;;  %v880_v52 = vpop.f32.mrb[10].mxu0 }
 0x26d   :  { %v881_v54 = vadd.f32 %v880_v52, %v42_v51  ;;  %v9063_v55 = vpop.f32.mrb[11].mxu0 }
 0x26f   :  { %v1172_v57 = vpop.f32.mrb[10].mxu1  ;;  %v1326_v58 = vsel %vm1322_vm2, %v881_v54, -inf }
 0x270   :  { %v9083_v59 = vpop.f32.mrb[11].mxu1  ;;  %1327 = vmax.xlane.f32.xlu1 %v1326_v58  ;;  %v953_v61 = vpop.f32.mrb[12].mxu0  ;;  %v1173_v0 = vadd.f32 %v1172_v57, %v42_v51 }
 0x271   :  { %v954_v62 = vadd.f32 %v953_v61, %v41_v41  ;;  %v9068_v63 = vpop.f32.mrb[13].mxu0 }
 0x272   :  { %v1338_v9 = vsel %vm1322_vm2, %v1173_v0, -inf }
 0x273   :  { %v1318_v1 = vpop.f32.mrb[12].mxu1  ;;  %v1329_v3 = vsel %vm1322_vm2, %v954_v62, -inf }
 0x274   :  { %v9093_v4 = vpop.f32.mrb[13].mxu1  ;;  %1333 = vmax.xlane.f32.xlu1 %v1332_v2  ;;  %1330 = vmax.xlane.f32.xlu0 %v1329_v3  ;;  %v1099_v5 = vpop.f32.mrb[14].mxu0  ;;  %v1319_v8 = vadd.f32 %v1318_v1, %v42_v51 }
 0x275   :  { %v1100_v6 = vadd.f32 %v1099_v5, %v41_v41  ;;  %v9078_v7 = vpop.f32.mrb[15].mxu0 }
 0x276   :  { %v1344_v14 = vsel %vm1322_vm2, %v1319_v8, -inf }
 0x277   :  { %v1335_v10 = vsel %vm1322_vm2, %v1100_v6, -inf }
 0x278   :  { %1339 = vmax.xlane.f32.xlu1 %v1338_v9  ;;  %1336 = vmax.xlane.f32.xlu0 %v1335_v10  ;;  %v1245_v11 = vpop.f32.mrb[16].mxu0 }
 0x279   :  { %v1246_v12 = vadd.f32 %v1245_v11, %v41_v41  ;;  %v9088_v13 = vpop.f32.mrb[17].mxu0 }
 0x27b   :  { %v1341_v15 = vsel %vm1322_vm2, %v1246_v12, -inf }
 0x27c   :  { %1345 = vmax.xlane.f32.xlu1 %v1344_v14  ;;  %1342 = vmax.xlane.f32.xlu0 %v1341_v15 }
 0x2f9   :  { %v1325_v16 = vpop.xlane.xlu0 %1324 }
 0x2fa   :  { %v1347_v17 = vsub.f32 %v808_v48, %v1325_v16 }
 0x2fc   :  { %v1355_v18 = vmul.f32 1.442695, %v1347_v17 }
 0x2fd   :  { %v1328_v19 = vpop.xlane.xlu1 %1327 }
 0x2fe   :  { %9988 = vpow2.f32 %v1355_v18  ;;  %v1348_v20 = vsub.f32 %v881_v54, %v1328_v19 }
 0x300   :  { %v1357_v21 = vmul.f32 1.442695, %v1348_v20 }
 0x301   :  { %v1334_v22 = vpop.xlane.xlu1 %1333  ;;  %v1331_v24 = vpop.xlane.xlu0 %1330 }
 0x302   :  { %9990 = vpow2.f32 %v1357_v21  ;;  %v1350_v25 = vsub.f32 %v1027_v56, %v1334_v22  ;;  %v1349_v26 = vsub.f32 %v954_v62, %v1331_v24 }
 0x304   :  { %v1361_v27 = vmul.f32 1.442695, %v1350_v25  ;;  %v1359_v28 = vmul.f32 1.442695, %v1349_v26 }
 0x305   :  { %v1340_v29 = vpop.xlane.xlu1 %1339  ;;  %v1337_v30 = vpop.xlane.xlu0 %1336 }
 0x306   :  { %9992 = vpow2.f32 %v1361_v27  ;;  %v1352_v31 = vsub.f32 %v1173_v0, %v1340_v29  ;;  %v1351_v32 = vsub.f32 %v1100_v6, %v1337_v30 }
 0x307   :  { %9994 = vpow2.f32 %v1359_v28 }
 0x308   :  { %v9989_v34 = vpop.eup %9988  ;;  %v1365_v41 = vmul.f32 1.442695, %v1352_v31  ;;  %v1363_v45 = vmul.f32 1.442695, %v1351_v32 }
 0x309   :  { %v1346_v46 = vpop.xlane.xlu1 %1345  ;;  %v1343_v47 = vpop.xlane.xlu0 %1342  ;;  %v1371_v48 = vsel %vm1322_vm2, %v9989_v34, 0.0 }
 0x30a   :  { %9996 = vpow2.f32 %v1365_v41  ;;  %v1354_v49 = vsub.f32 %v1319_v8, %v1346_v46  ;;  %v1353_v50 = vsub.f32 %v1246_v12, %v1343_v47  ;;  %1372 = vadd.xlane.f32.xlu0 %v1371_v48 }
 0x30b   :  { %9998 = vpow2.f32 %v1363_v45 }
 0x30c   :  { %v9991_v51 = vpop.eup %9990  ;;  %v1369_v52 = vmul.f32 1.442695, %v1354_v49  ;;  %v1367_v54 = vmul.f32 1.442695, %v1353_v50 }
 0x30d   :  { %v1374_v55 = vsel %vm1322_vm2, %v9991_v51, 0.0 }
 0x30e   :  { %10000 = vpow2.f32 %v1369_v52  ;;  %1375 = vadd.xlane.f32.xlu1 %v1374_v55 }
 0x30f   :  { %10002 = vpow2.f32 %v1367_v54 }
 0x310   :  { %v9993_v56 = vpop.eup %9992 }
 0x311   :  { %v9995_v57 = vpop.eup %9994  ;;  %v1380_v58 = vsel %vm1322_vm2, %v9993_v56, 0.0 }
 0x312   :  { %1381 = vadd.xlane.f32.xlu1 %v1380_v58  ;;  %v1377_v59 = vsel %vm1322_vm2, %v9995_v57, 0.0 }
 0x313   :  { %1378 = vadd.xlane.f32.xlu0 %v1377_v59 }
 0x314   :  { %v9997_v61 = vpop.eup %9996 }
 0x315   :  { %v9999_v62 = vpop.eup %9998  ;;  %v1386_v63 = vsel %vm1322_vm2, %v9997_v61, 0.0 }
 0x316   :  { %1387 = vadd.xlane.f32.xlu1 %v1386_v63  ;;  %v1383_v0 = vsel %vm1322_vm2, %v9999_v62, 0.0 }
 0x317   :  { %1384 = vadd.xlane.f32.xlu0 %v1383_v0 }
 0x318   :  { %v10001_v1 = vpop.eup %10000 }
 0x319   :  { %v10003_v2 = vpop.eup %10002  ;;  %v1392_v3 = vsel %vm1322_vm2, %v10001_v1, 0.0 }
 0x31a   :  { %1393 = vadd.xlane.f32.xlu1 %v1392_v3  ;;  %v1389_v4 = vsel %vm1322_vm2, %v10003_v2, 0.0 }
 0x31b   :  { %1390 = vadd.xlane.f32.xlu0 %v1389_v4 }
 0x397   :  { %v1373_v5 = vpop.xlane.xlu0 %1372 }
 0x398   :  { %10004 = vrcp.f32 %v1373_v5 }
 0x39b   :  { %v1376_v6 = vpop.xlane.xlu1 %1375 }
 0x39c   :  { %10006 = vrcp.f32 %v1376_v6 }
 0x39f   :  { %v1382_v7 = vpop.xlane.xlu1 %1381 }
 0x3a0   :  { %10008 = vrcp.f32 %v1382_v7  ;;  %v1379_v8 = vpop.xlane.xlu0 %1378 }
 0x3a1   :  { %10010 = vrcp.f32 %v1379_v8  ;;  %v2054_v8 = vld [vmem:[#allocation2 + $0x100] sm:$0xff] }
 0x3a2   :  { %v10005_v9 = vpop.eup %10004 }
 0x3a3   :  { %v1403_v10 = vmul.f32 %v10005_v9, %v9989_v34  ;;  %v1388_v11 = vpop.xlane.xlu1 %1387  ;;  %v2055_v9 = vld [vmem:[#allocation2 + $0x108] sm:$0xff] }
 0x3a4   :  { %10012 = vrcp.f32 %v1388_v11  ;;  %v1385_v12 = vpop.xlane.xlu0 %1384  ;;  %v9746_v11 = vpack.c.bf16 %v2055_v9, %v2054_v8  ;;  %v2468_v8 = vld [vmem:[#allocation2 + $0x1b0] sm:$0xff]  ;;  %v2469_v9 = vld [vmem:[#allocation2 + $0x1b8] sm:$0xff] }
 0x3a5   :  { %10014 = vrcp.f32 %v1385_v12  ;;  %9097 = vmatmul.mubr.msk.f32.vlgmr.msra.gmra.mrb[18].mxu0 %vm1322_vm2, %v1403_v10  ;;  %v2140_v10 = vld [vmem:[#allocation2 + $0x120] sm:$0xff]  ;;  %v2141_v12 = vld [vmem:[#allocation2 + $0x128] sm:$0xff] }
 0x3a6   :  { %v10007_v13 = vpop.eup %10006  ;;  %9105 = vmatpush3.msra.mxu0 %v10380_v35  ;;  %9106 = vmatprep.mubr.msk.f32.mxu0 %vm10200_vm1, %v10199_v23 }
 0x3a7   :  { %v1404_v14 = vmul.f32 %v10007_v13, %v9991_v51  ;;  %v1394_v15 = vpop.xlane.xlu1 %1393  ;;  %9114 = vmatprep.subr.mxu0 %v10199_v23  ;;  %v9754_v13 = vpack.c.bf16 %v2141_v12, %v2140_v10  ;;  %v2546_v12 = vld [vmem:[#allocation2 + $0x1c0] sm:$0xff] }
 0x3a8   :  { %10016 = vrcp.f32 %v1394_v15  ;;  %v1391_v16 = vpop.xlane.xlu0 %1390  ;;  %v2057_v15 = vld [vmem:[#allocation2 + $0x118] sm:$0xff] }
 0x3a9   :  { %10018 = vrcp.f32 %v1391_v16  ;;  %9102 = vmatmul.mubr.msk.f32.vlgmr.msra.gmra.mrb[14].mxu1 %vm1322_vm2, %v1404_v14  ;;  %v2056_v14 = vld [vmem:[#allocation2 + $0x110] sm:$0xff] }
 0x3aa   :  { %v10009_v17 = vpop.eup %10008  ;;  %9110 = vmatpush3.msra.mxu1 %v10378_v33  ;;  %9111 = vmatprep.mubr.msk.f32.mxu1 %vm10200_vm1, %v10199_v23  ;;  %v2142_v16 = vld [vmem:[#allocation2 + $0x130] sm:$0xff] }
 0x3ab   :  { %v10011_v18 = vpop.eup %10010  ;;  %v1406_v35 = vmul.f32 %v10009_v17, %v9993_v56  ;;  %9119 = vmatprep.subr.mxu1 %v10199_v23  ;;  %v9750_v17 = vpack.c.bf16 %v2057_v15, %v2056_v14  ;;  %v2626_v14 = vld [vmem:[#allocation2 + $0x1e0] sm:$0xff]  ;;  %v2627_v15 = vld [vmem:[#allocation2 + $0x1e8] sm:$0xff] }
 0x3ac   :  { %v1405_v19 = vmul.f32 %v10011_v18, %v9995_v57  ;;  %v2143_v18 = vld [vmem:[#allocation2 + $0x138] sm:$0xff] }
 0x3ad   :  { %9112 = vmatmul.mubr.msk.f32.vlgmr.msra.gmra.mrb[16].mxu1 %vm1322_vm2, %v1406_v35  ;;  %v9758_v35 = vpack.c.bf16 %v2143_v18, %v2142_v16  ;;  %v10504_v16 = vld [vmem:[%s11161_s1] sm:$0xff]  ;;  %v9802_v18 = vpack.c.bf16 %v2627_v15, %v2626_v14 }
 0x3ae   :  { %v10013_v20 = vpop.eup %10012  ;;  %9107 = vmatmul.mubr.msk.f32.vlgmr.msra.gmra.mrb[20].mxu0 %vm1322_vm2, %v1405_v19  ;;  %9120 = vmatpush3.msra.mxu1 %v10387_v36  ;;  %v2220_v19 = vld [vmem:[#allocation2 + $0x140] sm:$0xff] }
 0x3af   :  { %v10015_v21 = vpop.eup %10014  ;;  %v1408_v22 = vmul.f32 %v10013_v20, %v9997_v61  ;;  %9115 = vmatpush3.msra.mxu0 %v10391_v38  ;;  %9116 = vmatprep.mubr.msk.f32.mxu0 %vm10200_vm1, %v10199_v23  ;;  %v2221_v20 = vld [vmem:[#allocation2 + $0x148] sm:$0xff] }
 0x3b0   :  { %v1407_v33 = vmul.f32 %v10015_v21, %v9999_v62  ;;  %9121 = vmatprep.mubr.msk.f32.mxu1 %vm10200_vm1, %v10199_v23  ;;  %9124 = vmatprep.subr.mxu0 %v10199_v23  ;;  %v2300_v21 = vld [vmem:[#allocation2 + $0x160] sm:$0xff] }
 0x3b1   :  { %9129 = vmatprep.subr.mxu1 %v10199_v23  ;;  %9122 = vmatmul.mubr.msk.f32.vlgmr.msra.gmra.mrb[18].mxu1 %vm1322_vm2, %v1408_v22  ;;  %v9762_v22 = vpack.c.bf16 %v2221_v20, %v2220_v19  ;;  %v2549_v19 = vld [vmem:[#allocation2 + $0x1d8] sm:$0xff]  ;;  %v2628_v20 = vld [vmem:[#allocation2 + $0x1f0] sm:$0xff] }
 0x3b2   :  { %v10017_v24 = vpop.eup %10016  ;;  %9117 = vmatmul.mubr.msk.f32.vlgmr.msra.gmra.mrb[22].mxu0 %vm1322_vm2, %v1407_v33  ;;  %9130 = vmatpush3.msra.mxu1 %v10389_v37  ;;  %v2301_v33 = vld [vmem:[#allocation2 + $0x168] sm:$0xff] }
 0x3b3   :  { %v10019_v36 = vpop.eup %10018  ;;  %v1410_v38 = vmul.f32 %v10017_v24, %v10001_v1  ;;  %9125 = vmatpush3.msra.mxu0 %v10393_v39  ;;  %9126 = vmatprep.mubr.msk.f32.mxu0 %vm10200_vm1, %v10199_v23  ;;  %v9770_v24 = vpack.c.bf16 %v2301_v33, %v2300_v21  ;;  %v2629_v21 = vld [vmem:[#allocation2 + $0x1f8] sm:$0xff] }
 0x3b4   :  { %v1409_v25 = vmul.f32 %v10019_v36, %v10003_v2  ;;  %9131 = vmatprep.mubr.msk.f32.mxu1 %vm10200_vm1, %v10199_v23  ;;  %9747 = vmatprep.subr.bf16.mxu0 %v9746_v11 }
 0x3b5   :  { %9132 = vmatmul.mubr.msk.f32.vlgmr.msra.gmra.mrb[20].mxu1 %vm1322_vm2, %v1410_v38  ;;  %9755 = vmatprep.subr.bf16.mxu1 %v9754_v13 }
 0x3b6   :  { %9127 = vmatmul.mubr.msk.f32.vlgmr.msra.gmra.mrb[24].mxu0 %vm1322_vm2, %v1409_v25  ;;  %9757 = vmatpush3.bf16.msra.mxu1 %v9754_v13  ;;  %v2547_v13 = vld [vmem:[#allocation2 + $0x1c8] sm:$0xff] }
 0x3b7   :  { %9749 = vmatpush3.bf16.msra.mxu0 %v9746_v11  ;;  %9759 = vmatprep.subr.bf16.mxu1 %v9758_v35  ;;  %v9790_v11 = vpack.c.bf16 %v2469_v9, %v2468_v8 }
 0x3b8   :  { %9751 = vmatprep.subr.bf16.mxu0 %v9750_v17 }
 0x3ba   :  { %9761 = vmatpush3.bf16.msra.mxu1 %v9758_v35  ;;  %v2548_v35 = vld [vmem:[#allocation2 + $0x1d0] sm:$0xff] }
 0x3bb   :  { %9753 = vmatpush3.bf16.msra.mxu0 %v9750_v17  ;;  %9771 = vmatprep.subr.bf16.mxu1 %v9770_v24  ;;  %v9794_v17 = vpack.c.bf16 %v2547_v13, %v2546_v12  ;;  %v9798_v33 = vpack.c.bf16 %v2549_v19, %v2548_v35 }
 0x3bc   :  { %9763 = vmatprep.subr.bf16.mxu0 %v9762_v22 }
 0x478   :  { %v1480_v26 = vpop.f32.mrb[18].mxu0 }
 0x479   :  { %v9098_v27 = vpop.f32.mrb[19].mxu0  ;;  %v1995_v34 = vsel %vm47_vm0, %v1480_v26, 0.0 }
 0x47c   :  { %v1553_v28 = vpop.f32.mrb[14].mxu1 }
 0x47d   :  { %v9103_v29 = vpop.f32.mrb[15].mxu1  ;;  %v2002_v30 = vsel %vm47_vm0, %v1553_v28, 0.0 }
 0x480   :  { %v1699_v37 = vpop.f32.mrb[16].mxu1 }
 0x481   :  { %v1626_v31 = vpop.f32.mrb[20].mxu0  ;;  %v2003_v39 = vsel %vm47_vm0, %v1699_v37, 0.0  ;;  %v9113_v32 = vpop.f32.mrb[17].mxu1 }
 0x482   :  { %v1996_v41 = vsel %vm47_vm0, %v1626_v31, 0.0  ;;  %v2004_v45 = vadd.f32 %v2003_v39, %v2002_v30  ;;  %v9108_v46 = vpop.f32.mrb[21].mxu0 }
 0x483   :  { %v1997_v47 = vadd.f32 %v1996_v41, %v1995_v34  ;;  %v2049_v46 = vsub.s32 3, %v10272_v40 }
 0x484   :  { %v1845_v48 = vpop.f32.mrb[18].mxu1 }
 0x485   :  { %v1772_v49 = vpop.f32.mrb[22].mxu0  ;;  %v2005_v50 = vsel %vm47_vm0, %v1845_v48, 0.0  ;;  %v9123_v51 = vpop.f32.mrb[19].mxu1 }
 0x486   :  { %v1998_v52 = vsel %vm47_vm0, %v1772_v49, 0.0  ;;  %v2006_v54 = vadd.f32 %v2005_v50, %v2004_v45  ;;  %v9118_v55 = vpop.f32.mrb[23].mxu0  ;;  %v2043_v45 = vsub.s32 2, %v10272_v40 }
 0x487   :  { %v1999_v56 = vadd.f32 %v1998_v52, %v1997_v47 }
 0x488   :  { %v1991_v57 = vpop.f32.mrb[20].mxu1  ;;  %v2044_v48 = vrot.slane %v10280_v43, %v2043_v45 }
 0x489   :  { %v1918_v58 = vpop.f32.mrb[24].mxu0  ;;  %v2007_v59 = vsel %vm47_vm0, %v1991_v57, 0.0  ;;  %v9133_v61 = vpop.f32.mrb[21].mxu1 }
 0x48a   :  { %v2000_v62 = vsel %vm47_vm0, %v1918_v58, 0.0  ;;  %v2008_v63 = vadd.f32 %v2007_v59, %v2006_v54  ;;  %v9128_v0 = vpop.f32.mrb[25].mxu0  ;;  %v2050_v54 = vrot.slane %v10280_v43, %v2049_v46  ;;  %v2222_v58 = vld [vmem:[#allocation2 + $0x150] sm:$0xff]  ;;  %v2223_v61 = vld [vmem:[#allocation2 + $0x158] sm:$0xff] }
 0x48b   :  { %v2001_v1 = vadd.f32 %v2000_v62, %v1999_v56  ;;  %v2302_v62 = vld [vmem:[#allocation2 + $0x170] sm:$0xff] }
 0x48c   :  { %v10456_v2 = vadd.f32 %v2008_v63, %v10297_v60  ;;  %v2303_v63 = vld [vmem:[#allocation2 + $0x178] sm:$0xff] }
 0x48d   :  { %v10459_v3 = vadd.f32 %v2001_v1, %v10291_v53  ;;  %v2380_v1 = vld [vmem:[#allocation2 + $0x180] sm:$0xff]  ;;  %v9774_v43 = vpack.c.bf16 %v2303_v63, %v2302_v62 }
 0x48e   :  { %v2014_v4 = vsel %vm47_vm0, %v10456_v2, 0.0  ;;  %v2020_v5 = vmul.f32 %v10456_v2, %v10456_v2 }
 0x48f   :  { %2015 = vadd.xlane.f32.xlu1 %v2014_v4  ;;  %v2011_v6 = vsel %vm47_vm0, %v10459_v3, 0.0  ;;  %v2019_v7 = vmul.f32 %v10459_v3, %v10459_v3  ;;  %v2466_v4 = vld [vmem:[#allocation2 + $0x1a0] sm:$0xff] }
 0x490   :  { %2012 = vadd.xlane.f32.xlu0 %v2011_v6  ;;  %v2024_v60 = vsel %vm47_vm0, %v2020_v5, 0.0  ;;  %v2467_v5 = vld [vmem:[#allocation2 + $0x1a8] sm:$0xff] }
 0x491   :  { %v2021_v53 = vsel %vm47_vm0, %v2019_v7, 0.0  ;;  %v9786_v7 = vpack.c.bf16 %v2467_v5, %v2466_v4 }
 0x493   :  { %2025 = vadd.xlane.f32.xlu1 %v2024_v60  ;;  %v2382_v60 = vld [vmem:[#allocation2 + $0x190] sm:$0xff] }
 0x494   :  { %2022 = vadd.xlane.f32.xlu0 %v2021_v53  ;;  %v2383_v53 = vld [vmem:[#allocation2 + $0x198] sm:$0xff] }
 0x495   :  { %v9782_v10 = vpack.c.bf16 %v2383_v53, %v2382_v60 }
 0x51c   :  { %v2016_v36 = vpop.xlane.xlu1 %2015 }
 0x51d   :  { %v2018_v38 = vmul.f32 0.03125, %v2016_v36  ;;  %v2013_v25 = vpop.xlane.xlu0 %2012 }
 0x51e   :  { %v2017_v26 = vmul.f32 0.03125, %v2013_v25 }
 0x51f   :  { %v2032_v28 = vmul.f32 %v2018_v38, %v2018_v38  ;;  %v2030_v47 = vsub.f32 %v10456_v2, %v2018_v38  ;;  %v9766_v2 = vpack.c.bf16 %v2223_v61, %v2222_v58 }
 0x520   :  { %v2026_v27 = vpop.xlane.xlu1 %2025  ;;  %v2031_v30 = vmul.f32 %v2017_v26, %v2017_v26  ;;  %v2029_v50 = vsub.f32 %v10459_v3, %v2017_v26  ;;  %v2381_v3 = vld [vmem:[#allocation2 + $0x188] sm:$0xff] }
 0x521   :  { %v2028_v29 = vmul.f32 0.03125, %v2026_v27  ;;  %v2023_v37 = vpop.xlane.xlu0 %2022  ;;  %v9778_v6 = vpack.c.bf16 %v2381_v3, %v2380_v1 }
 0x522   :  { %v2027_v31 = vmul.f32 0.03125, %v2023_v37 }
 0x523   :  { %v2034_v39 = vsub.f32 %v2028_v29, %v2032_v28 }
 0x524   :  { %v2033_v32 = vsub.f32 %v2027_v31, %v2031_v30 }
 0x525   :  { %v2036_v34 = vadd.f32 1e-06, %v2034_v39 }
 0x526   :  { %v2035_v41 = vadd.f32 1e-06, %v2033_v32 }
 0x527   :  { %10020 = vrsqrt.f32 %v2036_v34 }
 0x528   :  { %10022 = vrsqrt.f32 %v2035_v41 }
 0x531   :  { %v10021_v49 = vpop.eup %10020 }
 0x532   :  { %v10023_v51 = vpop.eup %10022  ;;  %v2040_v52 = vmul.f32 %v10021_v49, %v2030_v47  ;;  %v44_v49 = vld [vmem:[%s11162_s2 + $0x18] sm:$0xff] }
 0x533   :  { %v2039_v55 = vmul.f32 %v10023_v51, %v2029_v50  ;;  %v43_v50 = vld [vmem:[%s11162_s2 + $0x10] sm:$0xff] }
 0x534   :  { %v2046_v56 = vmul.f32 %v2044_v48, %v2040_v52 }
 0x535   :  { %v2045_v57 = vmul.f32 %v2044_v48, %v2039_v55 }
 0x536   :  { %v10481_v59 = vadd.f32 %v2050_v54, %v2046_v56 }
 0x537   :  { %v10483_v0 = vadd.f32 %v2050_v54, %v2045_v57 }
 0x539   :  { %9142 = vmatprep.mubr.msk.f32.mxu0 %vm47_vm0, %v10483_v0  ;;  %9153 = vmatprep.mubr.msk.f32.mxu1 %vm47_vm0, %v10483_v0 }
 0x53a   :  { %9143 = vmatmul.mubr.msk.f32.vlgmr.msra.gmra.mrb[26].mxu0 %vm47_vm0, %v10481_v59  ;;  %9154 = vmatmul.mubr.msk.f32.vlgmr.msra.gmra.mrb[22].mxu1 %vm47_vm0, %v10481_v59 }
 0x53b   :  { %9765 = vmatpush3.bf16.msra.mxu0 %v9762_v22  ;;  %9773 = vmatpush3.bf16.msra.mxu1 %v9770_v24  ;;  %v92_v22 = vld [vmem:[%s11161_s1 + $0x8] sm:$0xff]  ;;  %v9806_v24 = vpack.c.bf16 %v2629_v21, %v2628_v20 }
 0x53c   :  { %9164 = vmatprep.mubr.msk.f32.mxu0 %vm47_vm0, %v10483_v0  ;;  %9175 = vmatprep.mubr.msk.f32.mxu1 %vm47_vm0, %v10483_v0 }
 0x53d   :  { %9767 = vmatprep.subr.bf16.mxu0 %v9766_v2  ;;  %9775 = vmatprep.subr.bf16.mxu1 %v9774_v43 }
 0x53f   :  { %9769 = vmatpush3.bf16.msra.mxu0 %v9766_v2  ;;  %9777 = vmatpush3.bf16.msra.mxu1 %v9774_v43 }
 0x540   :  { %9779 = vmatprep.subr.bf16.mxu0 %v9778_v6  ;;  %9787 = vmatprep.subr.bf16.mxu1 %v9786_v7 }
 0x542   :  { %9165 = vmatmul.mubr.msk.f32.vlgmr.msra.gmra.mrb[28].mxu0 %vm47_vm0, %v10481_v59  ;;  %9176 = vmatmul.mubr.msk.f32.vlgmr.msra.gmra.mrb[24].mxu1 %vm47_vm0, %v10481_v59 }
 0x543   :  { %9781 = vmatpush3.bf16.msra.mxu0 %v9778_v6  ;;  %9789 = vmatpush3.bf16.msra.mxu1 %v9786_v7 }
 0x544   :  { %9783 = vmatprep.subr.bf16.mxu0 %v9782_v10  ;;  %9791 = vmatprep.subr.bf16.mxu1 %v9790_v11 }
 0x545   :  { %9186 = vmatprep.mubr.msk.f32.mxu0 %vm47_vm0, %v10504_v16  ;;  %9197 = vmatprep.mubr.msk.f32.mxu1 %vm47_vm0, %v10504_v16 }
 0x547   :  { %9785 = vmatpush3.bf16.msra.mxu0 %v9782_v10  ;;  %9793 = vmatpush3.bf16.msra.mxu1 %v9790_v11 }
 0x548   :  { %9795 = vmatprep.subr.bf16.mxu0 %v9794_v17  ;;  %9803 = vmatprep.subr.bf16.mxu1 %v9802_v18 }
 0x54a   :  { %9187 = vmatmul.mubr.msk.f32.vlgmr.msra.gmra.mrb[30].mxu0 %vm47_vm0, %v92_v22  ;;  %9198 = vmatmul.mubr.msk.f32.vlgmr.msra.gmra.mrb[26].mxu1 %vm47_vm0, %v92_v22 }
 0x54b   :  { %9797 = vmatpush3.bf16.msra.mxu0 %v9794_v17  ;;  %9805 = vmatpush3.bf16.msra.mxu1 %v9802_v18 }
 0x54c   :  { %9799 = vmatprep.subr.bf16.mxu0 %v9798_v33  ;;  %9807 = vmatprep.subr.bf16.mxu1 %v9806_v24 }
 0x54d   :  { %9208 = vmatprep.mubr.msk.f32.mxu0 %vm47_vm0, %v10504_v16  ;;  %9219 = vmatprep.mubr.msk.f32.mxu1 %vm47_vm0, %v10504_v16 }
 0x54f   :  { %9801 = vmatpush3.bf16.msra.mxu0 %v9798_v33  ;;  %9809 = vmatpush3.bf16.msra.mxu1 %v9806_v24 }
 0x550   :  { %9222 = vmatprep.subr.mxu0 %v10199_v23  ;;  %9227 = vmatprep.subr.mxu1 %v10199_v23 }
 0x552   :  { %9209 = vmatmul.mubr.msk.f32.vlgmr.msra.gmra.mrb[32].mxu0 %vm47_vm0, %v92_v22  ;;  %9220 = vmatmul.mubr.msk.f32.vlgmr.msra.gmra.mrb[28].mxu1 %vm47_vm0, %v92_v22 }
 0x553   :  { %9229 = vmatprep.mubr.msk.f32.mxu1 %vm10200_vm1, %v10199_v23  ;;  %9224 = vmatprep.mubr.msk.f32.mxu0 %vm10200_vm1, %v10199_v23 }
 0x558   :  { %9223 = vmatpush3.xpose.msk.msra.mxu0 %vm47_vm0, %v10504_v16  ;;  %9228 = vmatpush3.xpose.msk.msra.mxu1 %vm47_vm0, %v92_v22 }
 0x559   :  { %9232 = vmatprep.subr.mxu0 %v10199_v23  ;;  %9237 = vmatprep.subr.mxu1 %v10199_v23 }
 0x60d   :  { %v9144_v36 = vpop.f32.mrb[26].mxu0  ;;  %v9155_v38 = vpop.f32.mrb[22].mxu1 }
 0x60e   :  { %v2130_v25 = vpop.f32.mrb[27].mxu0  ;;  %v2210_v26 = vpop.f32.mrb[23].mxu1  ;;  %9230 = vmatmul.mubr.msk.f32.vlgmr.msra.gmra.mrb[30].mxu1 %vm47_vm0, %v9144_v36 }
 0x60f   :  { %9225 = vmatmul.mubr.msk.f32.vlgmr.msra.gmra.mrb[34].mxu0 %vm47_vm0, %v2130_v25  ;;  %9238 = vmatpush3.xpose.msk.msra.mxu1 %vm47_vm0, %v92_v22 }
 0x610   :  { %9233 = vmatpush3.xpose.msk.msra.mxu0 %vm47_vm0, %v10504_v16  ;;  %9239 = vmatprep.mubr.msk.f32.mxu1 %vm10200_vm1, %v10199_v23 }
 0x611   :  { %9234 = vmatprep.mubr.msk.f32.mxu0 %vm10200_vm1, %v10199_v23  ;;  %9242 = vmatprep.subr.mxu0 %v10199_v23 }
 0x612   :  { %9240 = vmatmul.mubr.msk.f32.vlgmr.msra.gmra.mrb[32].mxu1 %vm47_vm0, %v9155_v38  ;;  %9247 = vmatprep.subr.mxu1 %v10199_v23 }
 0x613   :  { %9235 = vmatmul.mubr.msk.f32.vlgmr.msra.gmra.mrb[36].mxu0 %vm47_vm0, %v2210_v26  ;;  %9248 = vmatpush3.xpose.msk.msra.mxu1 %vm47_vm0, %v92_v22 }
 0x614   :  { %9243 = vmatpush3.xpose.msk.msra.mxu0 %vm47_vm0, %v10504_v16  ;;  %9249 = vmatprep.mubr.msk.f32.mxu1 %vm10200_vm1, %v10199_v23 }
 0x615   :  { %v9166_v27 = vpop.f32.mrb[28].mxu0  ;;  %v9177_v28 = vpop.f32.mrb[24].mxu1  ;;  %9244 = vmatprep.mubr.msk.f32.mxu0 %vm10200_vm1, %v10199_v23  ;;  %9252 = vmatprep.subr.mxu0 %v10199_v23 }
 0x616   :  { %v2290_v29 = vpop.f32.mrb[29].mxu0  ;;  %v2370_v37 = vpop.f32.mrb[25].mxu1  ;;  %9250 = vmatmul.mubr.msk.f32.vlgmr.msra.gmra.mrb[34].mxu1 %vm47_vm0, %v9166_v27  ;;  %9257 = vmatprep.subr.mxu1 %v10199_v23 }
 0x617   :  { %9245 = vmatmul.mubr.msk.f32.vlgmr.msra.gmra.mrb[38].mxu0 %vm47_vm0, %v2290_v29  ;;  %9258 = vmatpush3.xpose.msk.msra.mxu1 %vm47_vm0, %v92_v22 }
 0x618   :  { %9253 = vmatpush3.xpose.msk.msra.mxu0 %vm47_vm0, %v10504_v16  ;;  %9259 = vmatprep.mubr.msk.f32.mxu1 %vm10200_vm1, %v10199_v23 }
 0x619   :  { %9254 = vmatprep.mubr.msk.f32.mxu0 %vm10200_vm1, %v10199_v23  ;;  %9262 = vmatprep.subr.mxu0 %v10199_v23 }
 0x61a   :  { %9260 = vmatmul.mubr.msk.f32.vlgmr.msra.gmra.mrb[36].mxu1 %vm47_vm0, %v9177_v28  ;;  %9267 = vmatprep.subr.mxu1 %v10199_v23 }
 0x61b   :  { %9255 = vmatmul.mubr.msk.f32.vlgmr.msra.gmra.mrb[40].mxu0 %vm47_vm0, %v2370_v37  ;;  %9269 = vmatprep.mubr.msk.f32.mxu1 %vm10200_vm1, %v10199_v23 }
 0x61c   :  { %9264 = vmatprep.mubr.msk.f32.mxu0 %vm10200_vm1, %v10199_v23 }
 0x61d   :  { %v9188_v30 = vpop.f32.mrb[30].mxu0  ;;  %v10571_v31 = vpop.f32.mrb[26].mxu1 }
 0x61e   :  { %v2456_v39 = vpop.f32.mrb[31].mxu0  ;;  %v10573_v32 = vpop.f32.mrb[27].mxu1  ;;  %9268 = vmatpush3.msra.mxu1 %v9188_v30 }
 0x61f   :  { %9263 = vmatpush3.msra.mxu0 %v2456_v39  ;;  %9277 = vmatprep.subr.mxu1 %v10199_v23 }
 0x620   :  { %9272 = vmatprep.subr.mxu0 %v10199_v23 }
 0x625   :  { %v10577_v34 = vpop.f32.mrb[32].mxu0  ;;  %v10579_v41 = vpop.f32.mrb[28].mxu1 }
 0x626   :  { %v10581_v47 = vpop.f32.mrb[33].mxu0  ;;  %v10583_v48 = vpop.f32.mrb[29].mxu1 }
 0x6e1   :  { %v2847_v51 = vpop.f32.mrb[30].mxu1 }
 0x6e2   :  { %v2848_v52 = vadd.f32 %v2847_v51, %v44_v49  ;;  %v2774_v54 = vpop.f32.mrb[34].mxu0  ;;  %v9231_v55 = vpop.f32.mrb[31].mxu1 }
 0x6e3   :  { %v2775_v56 = vadd.f32 %v2774_v54, %v43_v50  ;;  %v9226_v57 = vpop.f32.mrb[35].mxu0 }
 0x6e4   :  { %v3292_v58 = vsel %vm1322_vm2, %v2848_v52, -inf }
 0x6e5   :  { %3293 = vmax.xlane.f32.xlu1 %v3292_v58  ;;  %v2993_v61 = vpop.f32.mrb[32].mxu1  ;;  %v3289_v62 = vsel %vm1322_vm2, %v2775_v56, -inf }
 0x6e6   :  { %v2994_v63 = vadd.f32 %v2993_v61, %v44_v49  ;;  %v9241_v1 = vpop.f32.mrb[33].mxu1  ;;  %3290 = vmax.xlane.f32.xlu0 %v3289_v62  ;;  %v2920_v2 = vpop.f32.mrb[36].mxu0 }
 0x6e7   :  { %v2921_v43 = vadd.f32 %v2920_v2, %v43_v50  ;;  %v9236_v3 = vpop.f32.mrb[37].mxu0 }
 0x6e8   :  { %v3298_v4 = vsel %vm1322_vm2, %v2994_v63, -inf }
 0x6e9   :  { %3299 = vmax.xlane.f32.xlu1 %v3298_v4  ;;  %v3139_v5 = vpop.f32.mrb[34].mxu1  ;;  %v3295_v6 = vsel %vm1322_vm2, %v2921_v43, -inf }
 0x6ea   :  { %v3140_v7 = vadd.f32 %v3139_v5, %v44_v49  ;;  %v9251_v60 = vpop.f32.mrb[35].mxu1  ;;  %3296 = vmax.xlane.f32.xlu0 %v3295_v6  ;;  %v3066_v53 = vpop.f32.mrb[38].mxu0 }
 0x6eb   :  { %v3067_v8 = vadd.f32 %v3066_v53, %v43_v50  ;;  %v9246_v9 = vpop.f32.mrb[39].mxu0 }
 0x6ec   :  { %v3304_v10 = vsel %vm1322_vm2, %v3140_v7, -inf }
 0x6ed   :  { %3305 = vmax.xlane.f32.xlu1 %v3304_v10  ;;  %v3285_v11 = vpop.f32.mrb[36].mxu1  ;;  %v3301_v12 = vsel %vm1322_vm2, %v3067_v8, -inf }
 0x6ee   :  { %v3286_v13 = vadd.f32 %v3285_v11, %v44_v49  ;;  %v9261_v14 = vpop.f32.mrb[37].mxu1  ;;  %3302 = vmax.xlane.f32.xlu0 %v3301_v12  ;;  %v3212_v15 = vpop.f32.mrb[40].mxu0 }
 0x6ef   :  { %v3213_v16 = vadd.f32 %v3212_v15, %v43_v50  ;;  %v9256_v17 = vpop.f32.mrb[41].mxu0 }
 0x6f0   :  { %v3310_v18 = vsel %vm1322_vm2, %v3286_v13, -inf }
 0x6f1   :  { %3311 = vmax.xlane.f32.xlu1 %v3310_v18  ;;  %v3307_v35 = vsel %vm1322_vm2, %v3213_v16, -inf }
 0x6f2   :  { %3308 = vmax.xlane.f32.xlu0 %v3307_v35 }
 0x772   :  { %v3294_v19 = vpop.xlane.xlu1 %3293 }
 0x773   :  { %v3314_v20 = vsub.f32 %v2848_v52, %v3294_v19  ;;  %v3291_v21 = vpop.xlane.xlu0 %3290 }
 0x774   :  { %v3313_v22 = vsub.f32 %v2775_v56, %v3291_v21 }
 0x775   :  { %v3323_v33 = vmul.f32 1.442695, %v3314_v20 }
 0x776   :  { %v3321_v24 = vmul.f32 1.442695, %v3313_v22  ;;  %v3300_v36 = vpop.xlane.xlu1 %3299 }
 0x777   :  { %10024 = vpow2.f32 %v3323_v33  ;;  %v3316_v38 = vsub.f32 %v2994_v63, %v3300_v36  ;;  %v3297_v25 = vpop.xlane.xlu0 %3296 }
 0x778   :  { %10026 = vpow2.f32 %v3321_v24  ;;  %v3315_v26 = vsub.f32 %v2921_v43, %v3297_v25 }
 0x779   :  { %v3327_v27 = vmul.f32 1.442695, %v3316_v38 }
 0x77a   :  { %v3325_v28 = vmul.f32 1.442695, %v3315_v26  ;;  %v3306_v29 = vpop.xlane.xlu1 %3305 }
 0x77b   :  { %10028 = vpow2.f32 %v3327_v27  ;;  %v3318_v37 = vsub.f32 %v3140_v7, %v3306_v29  ;;  %v3303_v30 = vpop.xlane.xlu0 %3302 }
 0x77c   :  { %10030 = vpow2.f32 %v3325_v28  ;;  %v3317_v39 = vsub.f32 %v3067_v8, %v3303_v30 }
 0x77d   :  { %v3331_v49 = vmul.f32 1.442695, %v3318_v37 }
 0x77e   :  { %v3329_v50 = vmul.f32 1.442695, %v3317_v39  ;;  %v3312_v51 = vpop.xlane.xlu1 %3311 }
 0x77f   :  { %10032 = vpow2.f32 %v3331_v49  ;;  %v3320_v52 = vsub.f32 %v3286_v13, %v3312_v51  ;;  %v3309_v54 = vpop.xlane.xlu0 %3308 }
 0x780   :  { %10034 = vpow2.f32 %v3329_v50  ;;  %v3319_v55 = vsub.f32 %v3213_v16, %v3309_v54 }
 0x781   :  { %v10025_v56 = vpop.eup %10024  ;;  %v3335_v57 = vmul.f32 1.442695, %v3320_v52 }
 0x782   :  { %v10027_v58 = vpop.eup %10026  ;;  %v3333_v61 = vmul.f32 1.442695, %v3319_v55  ;;  %v3340_v62 = vsel %vm1322_vm2, %v10025_v56, 0.0 }
 0x783   :  { %10036 = vpow2.f32 %v3335_v57  ;;  %3341 = vadd.xlane.f32.xlu1 %v3340_v62  ;;  %v3337_v63 = vsel %vm1322_vm2, %v10027_v58, 0.0 }
 0x784   :  { %10038 = vpow2.f32 %v3333_v61  ;;  %3338 = vadd.xlane.f32.xlu0 %v3337_v63 }
 0x785   :  { %v10029_v1 = vpop.eup %10028 }
 0x786   :  { %v10031_v2 = vpop.eup %10030  ;;  %v3346_v43 = vsel %vm1322_vm2, %v10029_v1, 0.0 }
 0x787   :  { %3347 = vadd.xlane.f32.xlu1 %v3346_v43  ;;  %v3343_v3 = vsel %vm1322_vm2, %v10031_v2, 0.0 }
 0x788   :  { %3344 = vadd.xlane.f32.xlu0 %v3343_v3 }
 0x789   :  { %v10033_v4 = vpop.eup %10032 }
 0x78a   :  { %v10035_v5 = vpop.eup %10034  ;;  %v3352_v6 = vsel %vm1322_vm2, %v10033_v4, 0.0 }
 0x78b   :  { %3353 = vadd.xlane.f32.xlu1 %v3352_v6  ;;  %v3349_v7 = vsel %vm1322_vm2, %v10035_v5, 0.0 }
 0x78c   :  { %3350 = vadd.xlane.f32.xlu0 %v3349_v7 }
 0x78d   :  { %v10037_v60 = vpop.eup %10036 }
 0x78e   :  { %v10039_v53 = vpop.eup %10038  ;;  %v3358_v8 = vsel %vm1322_vm2, %v10037_v60, 0.0 }
 0x78f   :  { %3359 = vadd.xlane.f32.xlu1 %v3358_v8  ;;  %v3355_v9 = vsel %vm1322_vm2, %v10039_v53, 0.0 }
 0x790   :  { %3356 = vadd.xlane.f32.xlu0 %v3355_v9 }
 0x810   :  { %v3342_v10 = vpop.xlane.xlu1 %3341 }
 0x811   :  { %10040 = vrcp.f32 %v3342_v10  ;;  %v3339_v11 = vpop.xlane.xlu0 %3338 }
 0x812   :  { %10042 = vrcp.f32 %v3339_v11 }
 0x814   :  { %v3348_v12 = vpop.xlane.xlu1 %3347 }
 0x815   :  { %10044 = vrcp.f32 %v3348_v12  ;;  %v3345_v13 = vpop.xlane.xlu0 %3344 }
 0x816   :  { %10046 = vrcp.f32 %v3345_v13 }
 0x818   :  { %v3354_v14 = vpop.xlane.xlu1 %3353 }
 0x819   :  { %10048 = vrcp.f32 %v3354_v14  ;;  %v3351_v15 = vpop.xlane.xlu0 %3350 }
 0x81a   :  { %10050 = vrcp.f32 %v3351_v15 }
 0x81b   :  { %v10041_v16 = vpop.eup %10040 }
 0x81c   :  { %v10043_v17 = vpop.eup %10042  ;;  %v3370_v18 = vmul.f32 %v10041_v16, %v10025_v56  ;;  %v3360_v35 = vpop.xlane.xlu1 %3359 }
 0x81d   :  { %v3369_v19 = vmul.f32 %v10043_v17, %v10027_v58  ;;  %10052 = vrcp.f32 %v3360_v35  ;;  %v3357_v20 = vpop.xlane.xlu0 %3356  ;;  %v4021_v17 = vld [vmem:[%s11164_s4 + $0x10] sm:$0xff] }
 0x81e   :  { %10054 = vrcp.f32 %v3357_v20  ;;  %9270 = vmatmul.mubr.msk.f32.vlgmr.msra.gmra.mrb[38].mxu1 %vm1322_vm2, %v3370_v18  ;;  %v4022_v18 = vld [vmem:[%s11164_s4 + $0x18] sm:$0xff]  ;;  %v8517_v20 = vld [vmem:[%s11164_s4 + $0x28] sm:$0xff] }
 0x81f   :  { %v10045_v21 = vpop.eup %10044  ;;  %9278 = vmatpush3.msra.mxu1 %v10571_v31  ;;  %9265 = vmatmul.mubr.msk.f32.vlgmr.msra.gmra.mrb[42].mxu0 %vm1322_vm2, %v3369_v19  ;;  %v9814_v35 = vpack.c.bf16 %v4022_v18, %v4021_v17  ;;  %v8516_v19 = vld [vmem:[%s11164_s4 + $0x20] sm:$0xff] }
 0x820   :  { %v10047_v22 = vpop.eup %10046  ;;  %v3372_v33 = vmul.f32 %v10045_v21, %v10029_v1  ;;  %9273 = vmatpush3.msra.mxu0 %v10573_v32  ;;  %9279 = vmatprep.mubr.msk.f32.mxu1 %vm10200_vm1, %v10199_v23  ;;  %v8518_v21 = vld [vmem:[%s11164_s4 + $0x30] sm:$0xff] }
 0x821   :  { %v3371_v24 = vmul.f32 %v10047_v22, %v10031_v2  ;;  %9287 = vmatprep.subr.mxu1 %v10199_v23  ;;  %9274 = vmatprep.mubr.msk.f32.mxu0 %vm10200_vm1, %v10199_v23  ;;  %v9818_v22 = vpack.c.bf16 %v8517_v20, %v8516_v19  ;;  %v4259_v19 = vld [vmem:[#allocation2 + $0x208] sm:$0xff]  ;;  %v4424_v20 = vld [vmem:[#allocation2 + $0x240] sm:$0xff] }
 0x822   :  { %9280 = vmatmul.mubr.msk.f32.vlgmr.msra.gmra.mrb[40].mxu1 %vm1322_vm2, %v3372_v33  ;;  %9282 = vmatprep.subr.mxu0 %v10199_v23  ;;  %v11116_v33 = vld [vmem:[%s11165_s5 + $0x8] sm:$0xff] }
 0x823   :  { %v10049_v31 = vpop.eup %10048  ;;  %9288 = vmatpush3.msra.mxu1 %v10577_v34  ;;  %9275 = vmatmul.mubr.msk.f32.vlgmr.msra.gmra.mrb[44].mxu0 %vm1322_vm2, %v3371_v24  ;;  %v8519_v24 = vld [vmem:[%s11164_s4 + $0x38] sm:$0xff] }
 0x824   :  { %v10051_v36 = vpop.eup %10050  ;;  %v3374_v32 = vmul.f32 %v10049_v31, %v10033_v4  ;;  %9283 = vmatpush3.msra.mxu0 %v10581_v47  ;;  %9289 = vmatprep.mubr.msk.f32.mxu1 %vm10200_vm1, %v10199_v23  ;;  %v9824_v31 = vpack.c.bf16 %v8519_v24, %v8518_v21 }
 0x825   :  { %v3373_v38 = vmul.f32 %v10051_v36, %v10035_v5  ;;  %9297 = vmatprep.subr.mxu1 %v10199_v23  ;;  %9284 = vmatprep.mubr.msk.f32.mxu0 %vm10200_vm1, %v10199_v23 }
 0x826   :  { %9290 = vmatmul.mubr.msk.f32.vlgmr.msra.gmra.mrb[42].mxu1 %vm1322_vm2, %v3374_v32  ;;  %9292 = vmatprep.subr.mxu0 %v10199_v23 }
 0x827   :  { %v10053_v34 = vpop.eup %10052  ;;  %9298 = vmatpush3.msra.mxu1 %v10579_v41  ;;  %9285 = vmatmul.mubr.msk.f32.vlgmr.msra.gmra.mrb[46].mxu0 %vm1322_vm2, %v3373_v38 }
 0x828   :  { %v10055_v25 = vpop.eup %10054  ;;  %v3376_v47 = vmul.f32 %v10053_v34, %v10037_v60  ;;  %9293 = vmatpush3.msra.mxu0 %v10583_v48  ;;  %9299 = vmatprep.mubr.msk.f32.mxu1 %vm10200_vm1, %v10199_v23 }
 0x829   :  { %v3375_v26 = vmul.f32 %v10055_v25, %v10039_v53  ;;  %9294 = vmatprep.mubr.msk.f32.mxu0 %vm10200_vm1, %v10199_v23  ;;  %9820 = vmatprep.subr.msk.bf16.mxu1 %vm10674_vm4, %v9818_v22 }
 0x82a   :  { %9300 = vmatmul.mubr.msk.f32.vlgmr.msra.gmra.mrb[44].mxu1 %vm1322_vm2, %v3376_v47 }
 0x82b   :  { %9295 = vmatmul.mubr.msk.f32.vlgmr.msra.gmra.mrb[48].mxu0 %vm1322_vm2, %v3375_v26 }
 0x82e   :  { %9823 = vmatpush3.bf16.xpose.msk.msra.mxu1 %vm10674_vm4, %v9818_v22  ;;  %v4425_v22 = vld [vmem:[#allocation2 + $0x248] sm:$0xff] }
 0x82f   :  { %9826 = vmatprep.subr.msk.bf16.mxu1 %vm10674_vm4, %v9824_v31  ;;  %v9846_v24 = vpack.c.bf16 %v4425_v22, %v4424_v20  ;;  %v4506_v22 = vld [vmem:[#allocation2 + $0x270] sm:$0xff] }
 0x836   :  { %9829 = vmatpush3.bf16.xpose.msk.msra.mxu1 %vm10674_vm4, %v9824_v31  ;;  %v4260_v31 = vld [vmem:[#allocation2 + $0x210] sm:$0xff] }
 0x837   :  { %9847 = vmatprep.subr.bf16.mxu1 %v9846_v24 }
 0x8f1   :  { %v3519_v27 = vpop.f32.mrb[38].mxu1 }
 0x8f2   :  { %v3446_v28 = vpop.f32.mrb[42].mxu0  ;;  %v9271_v41 = vpop.f32.mrb[39].mxu1  ;;  %v3968_v30 = vsel %vm47_vm0, %v3519_v27, 0.0 }
 0x8f3   :  { %v9266_v29 = vpop.f32.mrb[43].mxu0  ;;  %v3961_v50 = vsel %vm47_vm0, %v3446_v28, 0.0 }
 0x8f5   :  { %v3665_v37 = vpop.f32.mrb[40].mxu1 }
 0x8f6   :  { %v3969_v48 = vsel %vm47_vm0, %v3665_v37, 0.0  ;;  %v3592_v39 = vpop.f32.mrb[44].mxu0  ;;  %v9281_v49 = vpop.f32.mrb[41].mxu1 }
 0x8f7   :  { %v3970_v51 = vadd.f32 %v3969_v48, %v3968_v30  ;;  %v3962_v52 = vsel %vm47_vm0, %v3592_v39, 0.0  ;;  %v9276_v54 = vpop.f32.mrb[45].mxu0  ;;  %v4009_v39 = vsub.s32 4, %v10272_v40  ;;  %v4015_v49 = vsub.s32 5, %v10272_v40 }
 0x8f8   :  { %v3963_v55 = vadd.f32 %v3962_v52, %v3961_v50 }
 0x8f9   :  { %v3811_v56 = vpop.f32.mrb[42].mxu1 }
 0x8fa   :  { %v3971_v57 = vsel %vm47_vm0, %v3811_v56, 0.0  ;;  %v3738_v58 = vpop.f32.mrb[46].mxu0  ;;  %v9291_v61 = vpop.f32.mrb[43].mxu1 }
 0x8fb   :  { %v3972_v62 = vadd.f32 %v3971_v57, %v3970_v51  ;;  %v3964_v63 = vsel %vm47_vm0, %v3738_v58, 0.0  ;;  %v9286_v1 = vpop.f32.mrb[47].mxu0  ;;  %v10694_v51 = vld [vmem:[%s11165_s5] sm:$0xff] }
 0x8fc   :  { %v3965_v2 = vadd.f32 %v3964_v63, %v3963_v55  ;;  %v4010_v52 = vrot.slane %v10694_v51, %v4009_v39  ;;  %v4016_v61 = vrot.slane %v10694_v51, %v4015_v49 }
 0x8fd   :  { %v3957_v43 = vpop.f32.mrb[44].mxu1 }
 0x8fe   :  { %v3973_v3 = vsel %vm47_vm0, %v3957_v43, 0.0  ;;  %v3884_v4 = vpop.f32.mrb[48].mxu0  ;;  %v9301_v5 = vpop.f32.mrb[45].mxu1  ;;  %v10707_v43 = vld [vmem:[%s11165_s5 + $0x8] sm:$0xff] }
 0x8ff   :  { %v3974_v6 = vadd.f32 %v3973_v3, %v3972_v62  ;;  %v3966_v7 = vsel %vm47_vm0, %v3884_v4, 0.0  ;;  %v9296_v60 = vpop.f32.mrb[49].mxu0  ;;  %v4026_v3 = vrot.slane %v10707_v43, %v10275_v42 }
 0x900   :  { %v3967_v53 = vadd.f32 %v3966_v7, %v3965_v2 }
 0x901   :  { %v3976_v8 = vadd.f32 %v3974_v6, %v10481_v59  ;;  %v4019_v59 = vld [vmem:[%s11164_s4] sm:$0xff] }
 0x902   :  { %v3975_v9 = vadd.f32 %v3967_v53, %v10483_v0  ;;  %v4020_v0 = vld [vmem:[%s11164_s4 + $0x8] sm:$0xff] }
 0x903   :  { %v3980_v10 = vsel %vm47_vm0, %v3976_v8, 0.0  ;;  %v3986_v11 = vmul.f32 %v3976_v8, %v3976_v8  ;;  %v9810_v16 = vpack.c.bf16 %v4020_v0, %v4019_v59 }
 0x904   :  { %3981 = vadd.xlane.f32.xlu1 %v3980_v10  ;;  %v3977_v12 = vsel %vm47_vm0, %v3975_v9, 0.0  ;;  %v3985_v13 = vmul.f32 %v3975_v9, %v3975_v9 }
 0x905   :  { %3978 = vadd.xlane.f32.xlu0 %v3977_v12  ;;  %v3990_v14 = vsel %vm47_vm0, %v3986_v11, 0.0  ;;  %9811 = vmatprep.subr.bf16.mxu0 %v9810_v16 }
 0x906   :  { %v3987_v15 = vsel %vm47_vm0, %v3985_v13, 0.0  ;;  %9813 = vmatpush3.bf16.msra.mxu0 %v9810_v16 }
 0x907   :  { %9815 = vmatprep.subr.bf16.mxu0 %v9814_v35 }
 0x908   :  { %3991 = vadd.xlane.f32.xlu1 %v3990_v14 }
 0x909   :  { %3988 = vadd.xlane.f32.xlu0 %v3987_v15 }
 0x90a   :  { %9817 = vmatpush3.bf16.msra.mxu0 %v9814_v35  ;;  %v4258_v35 = vld [vmem:[#allocation2 + $0x200] sm:$0xff] }
 0x90b   :  { %v9830_v21 = vpack.c.bf16 %v4259_v19, %v4258_v35  ;;  %v4744_v35 = vld [vmem:[#allocation2 + $0x2c0] sm:$0xff]  ;;  %v4745_v19 = vld [vmem:[#allocation2 + $0x2c8] sm:$0xff] }
 0x90d   :  { %9831 = vmatprep.subr.bf16.mxu0 %v9830_v21 }
 0x991   :  { %v3982_v36 = vpop.xlane.xlu1 %3981 }
 0x992   :  { %v3984_v32 = vmul.f32 0.03125, %v3982_v36  ;;  %v3979_v38 = vpop.xlane.xlu0 %3978  ;;  %v4261_v36 = vld [vmem:[#allocation2 + $0x218] sm:$0xff] }
 0x993   :  { %v3983_v34 = vmul.f32 0.03125, %v3979_v38  ;;  %v9834_v38 = vpack.c.bf16 %v4261_v36, %v4260_v31  ;;  %v4746_v31 = vld [vmem:[#allocation2 + $0x2d0] sm:$0xff]  ;;  %v4747_v36 = vld [vmem:[#allocation2 + $0x2d8] sm:$0xff] }
 0x994   :  { %v3998_v47 = vmul.f32 %v3984_v32, %v3984_v32  ;;  %v3996_v50 = vsub.f32 %v3976_v8, %v3984_v32  ;;  %v4118_v8 = vrot.slane %v10707_v43, %v10283_v44  ;;  %v4426_v32 = vld [vmem:[#allocation2 + $0x250] sm:$0xff] }
 0x995   :  { %v3992_v25 = vpop.xlane.xlu1 %3991  ;;  %v3997_v28 = vmul.f32 %v3983_v34, %v3983_v34  ;;  %v3995_v55 = vsub.f32 %v3975_v9, %v3983_v34  ;;  %v4427_v34 = vld [vmem:[#allocation2 + $0x258] sm:$0xff] }
 0x996   :  { %v3994_v26 = vmul.f32 0.03125, %v3992_v25  ;;  %v3989_v27 = vpop.xlane.xlu0 %3988  ;;  %v9850_v25 = vpack.c.bf16 %v4427_v34, %v4426_v32  ;;  %v4664_v34 = vld [vmem:[#allocation2 + $0x2a0] sm:$0xff] }
 0x997   :  { %v3993_v41 = vmul.f32 0.03125, %v3989_v27  ;;  %v4584_v27 = vld [vmem:[#allocation2 + $0x280] sm:$0xff] }
 0x998   :  { %v4000_v29 = vsub.f32 %v3994_v26, %v3998_v47  ;;  %v4344_v47 = vld [vmem:[#allocation2 + $0x220] sm:$0xff]  ;;  %v4345_v26 = vld [vmem:[#allocation2 + $0x228] sm:$0xff] }
 0x999   :  { %v3999_v37 = vsub.f32 %v3993_v41, %v3997_v28  ;;  %v9838_v28 = vpack.c.bf16 %v4345_v26, %v4344_v47  ;;  %v4585_v41 = vld [vmem:[#allocation2 + $0x288] sm:$0xff]  ;;  %v4666_v26 = vld [vmem:[#allocation2 + $0x2b0] sm:$0xff] }
 0x99a   :  { %v4002_v30 = vadd.f32 1e-06, %v4000_v29  ;;  %v9862_v29 = vpack.c.bf16 %v4585_v41, %v4584_v27  ;;  %v4667_v27 = vld [vmem:[#allocation2 + $0x2b8] sm:$0xff]  ;;  %v4824_v41 = vld [vmem:[#allocation2 + $0x2e0] sm:$0xff] }
 0x99b   :  { %v4001_v48 = vadd.f32 1e-06, %v3999_v37 }
 0x99c   :  { %10056 = vrsqrt.f32 %v4002_v30 }
 0x99d   :  { %10058 = vrsqrt.f32 %v4001_v48 }
 0x9a6   :  { %v10057_v54 = vpop.eup %10056 }
 0x9a7   :  { %v10059_v56 = vpop.eup %10058  ;;  %v4006_v57 = vmul.f32 %v10057_v54, %v3996_v50 }
 0x9a8   :  { %v4005_v58 = vmul.f32 %v10059_v56, %v3995_v55 }
 0x9a9   :  { %v4012_v62 = vmul.f32 %v4010_v52, %v4006_v57 }
 0x9aa   :  { %v4011_v63 = vmul.f32 %v4010_v52, %v4005_v58 }
 0x9ab   :  { %v4018_v2 = vadd.f32 %v4016_v61, %v4012_v62 }
 0x9ac   :  { %v4017_v1 = vadd.f32 %v4016_v61, %v4011_v63 }
 0x9ae   :  { %9310 = vmatprep.mubr.msk.f32.mxu0 %vm47_vm0, %v4017_v1 }
 0x9af   :  { %9311 = vmatmul.mubr.msk.f32.vlgmr.msra.gmra.mrb[50].mxu0 %vm47_vm0, %v4018_v2 }
 0x9b0   :  { %9833 = vmatpush3.bf16.msra.mxu0 %v9830_v21  ;;  %v9878_v21 = vpack.c.bf16 %v4745_v19, %v4744_v35 }
 0x9b1   :  { %9835 = vmatprep.subr.bf16.mxu0 %v9834_v38 }
 0x9b4   :  { %9837 = vmatpush3.bf16.msra.mxu0 %v9834_v38  ;;  %v9882_v38 = vpack.c.bf16 %v4747_v36, %v4746_v31 }
 0x9b5   :  { %9839 = vmatprep.subr.bf16.mxu0 %v9838_v28 }
 0xa82   :  { %v9312_v4 = vpop.f32.mrb[50].mxu0 }
 0xa83   :  { %v4105_v5 = vadd.f32 %v9312_v4, %v4026_v3  ;;  %v4099_v6 = vpop.f32.mrb[51].mxu0 }
 0xa84   :  { %v4100_v7 = vadd.f32 %v4099_v6, %v4026_v3  ;;  %v4253_v3 = vsub.s32 7, %v10272_v40 }
 0xa85   :  { %v4109_v53 = vmax.f32 %v4105_v5, 0.0 }
 0xa86   :  { %v4108_v60 = vmax.f32 %v4100_v7, 0.0 }
 0xa88   :  { %9321 = vmatprep.mubr.msk.f32.mxu1 %vm4119_vm3, %v4108_v60 }
 0xa89   :  { %9322 = vmatmul.mubr.msk.f32.vlgmr.msra.gmra.mrb[46].mxu1 %vm4119_vm3, %v4109_v53 }
 0xa8a   :  { %9849 = vmatpush3.bf16.msra.mxu1 %v9846_v24  ;;  %v4507_v24 = vld [vmem:[#allocation2 + $0x278] sm:$0xff] }
 0xa8b   :  { %9851 = vmatprep.subr.bf16.mxu1 %v9850_v25  ;;  %v9858_v32 = vpack.c.bf16 %v4507_v24, %v4506_v22 }
 0xa8e   :  { %9853 = vmatpush3.bf16.msra.mxu1 %v9850_v25  ;;  %v4665_v25 = vld [vmem:[#allocation2 + $0x2a8] sm:$0xff] }
 0xa8f   :  { %9863 = vmatprep.subr.bf16.mxu1 %v9862_v29  ;;  %v9870_v47 = vpack.c.bf16 %v4665_v25, %v4664_v34 }
 0xb5c   :  { %v9323_v9 = vpop.f32.mrb[46].mxu1 }
 0xb5d   :  { %v4210_v10 = vadd.f32 %v9323_v9, %v4118_v8  ;;  %v4204_v11 = vpop.f32.mrb[47].mxu1 }
 0xb5e   :  { %v4205_v12 = vadd.f32 %v4204_v11, %v4118_v8  ;;  %v4254_v8 = vrot.slane %v10694_v51, %v4253_v3 }
 0xb5f   :  { %v10715_v13 = vadd.f32 %v4210_v10, %v4018_v2  ;;  %v4247_v2 = vsub.s32 6, %v10272_v40 }
 0xb60   :  { %v10717_v14 = vadd.f32 %v4205_v12, %v4017_v1  ;;  %v4346_v12 = vld [vmem:[#allocation2 + $0x230] sm:$0xff] }
 0xb61   :  { %v4218_v15 = vsel %vm47_vm0, %v10715_v13, 0.0  ;;  %v4224_v59 = vmul.f32 %v10715_v13, %v10715_v13  ;;  %v4248_v5 = vrot.slane %v10694_v51, %v4247_v2 }
 0xb62   :  { %4219 = vadd.xlane.f32.xlu1 %v4218_v15  ;;  %v4215_v0 = vsel %vm47_vm0, %v10717_v14, 0.0  ;;  %v4223_v16 = vmul.f32 %v10717_v14, %v10717_v14  ;;  %v4347_v15 = vld [vmem:[#allocation2 + $0x238] sm:$0xff] }
 0xb63   :  { %4216 = vadd.xlane.f32.xlu0 %v4215_v0  ;;  %v4228_v17 = vsel %vm47_vm0, %v4224_v59, 0.0  ;;  %v4586_v59 = vld [vmem:[#allocation2 + $0x290] sm:$0xff] }
 0xb64   :  { %v4225_v18 = vsel %vm47_vm0, %v4223_v16, 0.0 }
 0xb66   :  { %4229 = vadd.xlane.f32.xlu1 %v4228_v17  ;;  %v4504_v17 = vld [vmem:[#allocation2 + $0x260] sm:$0xff] }
 0xb67   :  { %4226 = vadd.xlane.f32.xlu0 %v4225_v18  ;;  %v4505_v18 = vld [vmem:[#allocation2 + $0x268] sm:$0xff] }
 0xb68   :  { %v9854_v20 = vpack.c.bf16 %v4505_v18, %v4504_v17 }
 0xbef   :  { %v4220_v37 = vpop.xlane.xlu1 %4219 }
 0xbf0   :  { %v4222_v30 = vmul.f32 0.03125, %v4220_v37  ;;  %v4217_v48 = vpop.xlane.xlu0 %4216 }
 0xbf1   :  { %v4221_v50 = vmul.f32 0.03125, %v4217_v48  ;;  %v4827_v48 = vld [vmem:[#allocation2 + $0x2f8] sm:$0xff] }
 0xbf2   :  { %v4236_v54 = vmul.f32 %v4222_v30, %v4222_v30  ;;  %v4234_v4 = vsub.f32 %v10715_v13, %v4222_v30  ;;  %v4587_v13 = vld [vmem:[#allocation2 + $0x298] sm:$0xff]  ;;  %v4826_v30 = vld [vmem:[#allocation2 + $0x2f0] sm:$0xff] }
 0xbf3   :  { %v4230_v52 = vpop.xlane.xlu1 %4229  ;;  %v4235_v57 = vmul.f32 %v4221_v50, %v4221_v50  ;;  %v4233_v7 = vsub.f32 %v10717_v14, %v4221_v50  ;;  %v9842_v14 = vpack.c.bf16 %v4347_v15, %v4346_v12  ;;  %v9866_v51 = vpack.c.bf16 %v4587_v13, %v4586_v59  ;;  %v10142_v59 = vld [vmem:[%s11162_s2 + $0x8] sm:$0xff] }
 0xbf4   :  { %v4232_v55 = vmul.f32 0.03125, %v4230_v52  ;;  %v4227_v56 = vpop.xlane.xlu0 %4226  ;;  %v9890_v50 = vpack.c.bf16 %v4827_v48, %v4826_v30 }
 0xbf5   :  { %v4231_v58 = vmul.f32 0.03125, %v4227_v56 }
 0xbf6   :  { %v4238_v61 = vsub.f32 %v4232_v55, %v4236_v54 }
 0xbf7   :  { %v4237_v62 = vsub.f32 %v4231_v58, %v4235_v57 }
 0xbf8   :  { %v4240_v63 = vadd.f32 1e-06, %v4238_v61 }
 0xbf9   :  { %v4239_v1 = vadd.f32 1e-06, %v4237_v62 }
 0xbfa   :  { %10060 = vrsqrt.f32 %v4240_v63 }
 0xbfb   :  { %10062 = vrsqrt.f32 %v4239_v1 }
 0xc04   :  { %v10061_v6 = vpop.eup %10060 }
 0xc05   :  { %v10063_v60 = vpop.eup %10062  ;;  %v4244_v53 = vmul.f32 %v10061_v6, %v4234_v4 }
 0xc06   :  { %v4243_v9 = vmul.f32 %v10063_v60, %v4233_v7 }
 0xc07   :  { %v4250_v10 = vmul.f32 %v4248_v5, %v4244_v53 }
 0xc08   :  { %v4249_v11 = vmul.f32 %v4248_v5, %v4243_v9  ;;  %v10141_v9 = vld [vmem:[%s11162_s2] sm:$0xff] }
 0xc09   :  { %v10741_v16 = vadd.f32 %v4254_v8, %v4250_v10 }
 0xc0a   :  { %v10739_v0 = vadd.f32 %v4254_v8, %v4249_v11 }
 0xc0c   :  { %9332 = vmatprep.mubr.msk.f32.mxu0 %vm47_vm0, %v10739_v0  ;;  %9354 = vmatprep.mubr.msk.f32.mxu1 %vm47_vm0, %v10739_v0 }
 0xc0d   :  { %9333 = vmatmul.mubr.msk.f32.vlgmr.msra.gmra.mrb[52].mxu0 %vm47_vm0, %v10741_v16  ;;  %9355 = vmatmul.mubr.msk.f32.vlgmr.msra.gmra.mrb[48].mxu1 %vm47_vm0, %v10741_v16 }
 0xc0e   :  { %9841 = vmatpush3.bf16.msra.mxu0 %v9838_v28  ;;  %9865 = vmatpush3.bf16.msra.mxu1 %v9862_v29  ;;  %v9874_v28 = vpack.c.bf16 %v4667_v27, %v4666_v26  ;;  %v4825_v29 = vld [vmem:[#allocation2 + $0x2e8] sm:$0xff] }
 0xc0f   :  { %9343 = vmatprep.mubr.msk.f32.mxu0 %vm47_vm0, %v10739_v0  ;;  %9376 = vmatprep.mubr.msk.f32.mxu1 %vm47_vm0, %v10739_v0  ;;  %v9886_v37 = vpack.c.bf16 %v4825_v29, %v4824_v41 }
 0xc10   :  { %9843 = vmatprep.subr.bf16.mxu0 %v9842_v14  ;;  %9867 = vmatprep.subr.bf16.mxu1 %v9866_v51 }
 0xc12   :  { %9845 = vmatpush3.bf16.msra.mxu0 %v9842_v14  ;;  %9869 = vmatpush3.bf16.msra.mxu1 %v9866_v51 }
 0xc13   :  { %9855 = vmatprep.subr.bf16.mxu0 %v9854_v20  ;;  %9879 = vmatprep.subr.bf16.mxu1 %v9878_v21 }
 0xc15   :  { %9344 = vmatmul.mubr.msk.f32.vlgmr.msra.gmra.mrb[54].mxu0 %vm47_vm0, %v10741_v16  ;;  %9377 = vmatmul.mubr.msk.f32.vlgmr.msra.gmra.mrb[50].mxu1 %vm47_vm0, %v10741_v16 }
 0xc16   :  { %9857 = vmatpush3.bf16.msra.mxu0 %v9854_v20  ;;  %9365 = vmatprep.mubr.msk.f32.mxu0 %vm47_vm0, %v10739_v0 }
 0xc17   :  { %9881 = vmatpush3.bf16.msra.mxu1 %v9878_v21  ;;  %9398 = vmatprep.mubr.msk.f32.mxu1 %vm47_vm0, %v10739_v0 }
 0xc18   :  { %9859 = vmatprep.subr.bf16.mxu0 %v9858_v32  ;;  %9883 = vmatprep.subr.bf16.mxu1 %v9882_v38 }
 0xc1a   :  { %9861 = vmatpush3.bf16.msra.mxu0 %v9858_v32 }
 0xc1b   :  { %9885 = vmatpush3.bf16.msra.mxu1 %v9882_v38  ;;  %9871 = vmatprep.subr.bf16.mxu0 %v9870_v47 }
 0xc1c   :  { %9412 = vmatprep.subr.mxu1 %v10199_v23 }
 0xc1d   :  { %9366 = vmatmul.mubr.msk.f32.vlgmr.msra.gmra.mrb[56].mxu0 %vm47_vm0, %v10741_v16 }
 0xc1e   :  { %9399 = vmatmul.mubr.msk.f32.vlgmr.msra.gmra.mrb[52].mxu1 %vm47_vm0, %v10741_v16  ;;  %9873 = vmatpush3.bf16.msra.mxu0 %v9870_v47 }
 0xc1f   :  { %9387 = vmatprep.mubr.msk.f32.mxu0 %vm47_vm0, %v10739_v0  ;;  %9875 = vmatprep.subr.bf16.mxu0 %v9874_v28 }
 0xc20   :  { %9414 = vmatprep.mubr.msk.f32.mxu1 %vm10200_vm1, %v10199_v23 }
 0xc22   :  { %9877 = vmatpush3.bf16.msra.mxu0 %v9874_v28 }
 0xc23   :  { %9887 = vmatprep.subr.bf16.mxu0 %v9886_v37 }
 0xc24   :  { %9413 = vmatpush3.xpose.msk.msra.mxu1 %vm47_vm0, %v10739_v0 }
 0xc25   :  { %9388 = vmatmul.mubr.msk.f32.vlgmr.msra.gmra.mrb[58].mxu0 %vm47_vm0, %v10741_v16  ;;  %9417 = vmatprep.subr.mxu1 %v10199_v23 }
 0xc26   :  { %9889 = vmatpush3.bf16.msra.mxu0 %v9886_v37  ;;  %9409 = vmatprep.mubr.msk.f32.mxu0 %vm47_vm0, %v10739_v0 }
 0xc27   :  { %9891 = vmatprep.subr.bf16.mxu0 %v9890_v50 }
 0xc2a   :  { %9893 = vmatpush3.bf16.msra.mxu0 %v9890_v50 }
 0xc2b   :  { %9422 = vmatprep.subr.mxu0 %v10199_v23 }
 0xc2d   :  { %9410 = vmatmul.mubr.msk.f32.vlgmr.msra.gmra.mrb[60].mxu0 %vm47_vm0, %v10741_v16 }
 0xc2e   :  { %9424 = vmatprep.mubr.msk.f32.mxu0 %vm10200_vm1, %v10199_v23 }
 0xc33   :  { %9423 = vmatpush3.xpose.msk.msra.mxu0 %vm47_vm0, %v10739_v0 }
 0xc34   :  { %9432 = vmatprep.subr.mxu0 %v10199_v23 }
 0xce0   :  { %v9334_v52 = vpop.f32.mrb[52].mxu0  ;;  %v9356_v54 = vpop.f32.mrb[48].mxu1 }
 0xce1   :  { %v4334_v55 = vpop.f32.mrb[53].mxu0  ;;  %v4494_v56 = vpop.f32.mrb[49].mxu1 }
 0xce2   :  { %9415 = vmatmul.mubr.msk.f32.vlgmr.msra.gmra.mrb[54].mxu1 %vm47_vm0, %v4334_v55 }
 0xce3   :  { %9418 = vmatpush3.xpose.msk.msra.mxu1 %vm47_vm0, %v10741_v16  ;;  %9419 = vmatprep.mubr.msk.f32.mxu1 %vm10200_vm1, %v10199_v23 }
 0xce4   :  { %9427 = vmatprep.subr.mxu1 %v10199_v23 }
 0xce6   :  { %9420 = vmatmul.mubr.msk.f32.vlgmr.msra.gmra.mrb[56].mxu1 %vm47_vm0, %v9334_v52 }
 0xce7   :  { %9428 = vmatpush3.xpose.msk.msra.mxu1 %vm47_vm0, %v10741_v16  ;;  %9429 = vmatprep.mubr.msk.f32.mxu1 %vm10200_vm1, %v10199_v23 }
 0xce8   :  { %v9345_v57 = vpop.f32.mrb[54].mxu0  ;;  %v9378_v58 = vpop.f32.mrb[50].mxu1  ;;  %9437 = vmatprep.subr.mxu1 %v10199_v23 }
 0xce9   :  { %v4414_v61 = vpop.f32.mrb[55].mxu0  ;;  %v4654_v62 = vpop.f32.mrb[51].mxu1 }
 0xcea   :  { %9425 = vmatmul.mubr.msk.f32.vlgmr.msra.gmra.mrb[62].mxu0 %vm47_vm0, %v4414_v61  ;;  %9430 = vmatmul.mubr.msk.f32.vlgmr.msra.gmra.mrb[58].mxu1 %vm47_vm0, %v9345_v57 }
 0xceb   :  { %9433 = vmatpush3.xpose.msk.msra.mxu0 %vm47_vm0, %v10739_v0  ;;  %9438 = vmatpush3.xpose.msk.msra.mxu1 %vm47_vm0, %v10741_v16 }
 0xcec   :  { %9434 = vmatprep.mubr.msk.f32.mxu0 %vm10200_vm1, %v10199_v23  ;;  %9442 = vmatprep.subr.mxu0 %v10199_v23 }
 0xced   :  { %9439 = vmatprep.mubr.msk.f32.mxu1 %vm10200_vm1, %v10199_v23  ;;  %9447 = vmatprep.subr.mxu1 %v10199_v23 }
 0xcee   :  { %9435 = vmatmul.mubr.msk.f32.vlgmr.msra.gmra.mrb[64].mxu0 %vm47_vm0, %v4494_v56  ;;  %9440 = vmatmul.mubr.msk.f32.vlgmr.msra.gmra.mrb[60].mxu1 %vm47_vm0, %v9356_v54 }
 0xcef   :  { %9443 = vmatpush3.xpose.msk.msra.mxu0 %vm47_vm0, %v10739_v0  ;;  %9448 = vmatpush3.xpose.msk.msra.mxu1 %vm47_vm0, %v10741_v16 }
 0xcf0   :  { %v9367_v63 = vpop.f32.mrb[56].mxu0  ;;  %9444 = vmatprep.mubr.msk.f32.mxu0 %vm10200_vm1, %v10199_v23  ;;  %9452 = vmatprep.subr.mxu0 %v10199_v23 }
 0xcf1   :  { %v10820_v1 = vpop.f32.mrb[52].mxu1  ;;  %v4574_v4 = vpop.f32.mrb[57].mxu0  ;;  %9449 = vmatprep.mubr.msk.f32.mxu1 %vm10200_vm1, %v10199_v23  ;;  %9457 = vmatprep.subr.mxu1 %v10199_v23 }
 0xcf2   :  { %v10825_v5 = vpop.f32.mrb[53].mxu1  ;;  %9445 = vmatmul.mubr.msk.f32.vlgmr.msra.gmra.mrb[66].mxu0 %vm47_vm0, %v4574_v4  ;;  %9450 = vmatmul.mubr.msk.f32.vlgmr.msra.gmra.mrb[62].mxu1 %vm47_vm0, %v9367_v63 }
 0xcf3   :  { %9453 = vmatpush3.msra.mxu0 %v4654_v62  ;;  %9458 = vmatpush3.msra.mxu1 %v9378_v58 }
 0xcf4   :  { %9454 = vmatprep.mubr.msk.f32.mxu0 %vm10200_vm1, %v10199_v23  ;;  %9462 = vmatprep.subr.mxu0 %v10199_v23 }
 0xcf5   :  { %9459 = vmatprep.mubr.msk.f32.mxu1 %vm10200_vm1, %v10199_v23  ;;  %9467 = vmatprep.subr.mxu1 %v10199_v23 }
 0xcf8   :  { %v10835_v6 = vpop.f32.mrb[58].mxu0 }
 0xcf9   :  { %v10837_v7 = vpop.f32.mrb[59].mxu0 }
 0xd00   :  { %v10839_v60 = vpop.f32.mrb[60].mxu0 }
 0xd01   :  { %v10841_v53 = vpop.f32.mrb[61].mxu0 }
 0xdb5   :  { %v4972_v8 = vpop.f32.mrb[54].mxu1 }
 0xdb6   :  { %v4973_v10 = vadd.f32 %v10141_v9, %v4972_v8  ;;  %v9416_v11 = vpop.f32.mrb[55].mxu1 }
 0xdb8   :  { %v5487_v12 = vsel %vm1322_vm2, %v4973_v10, -inf }
 0xdb9   :  { %5488 = vmax.xlane.f32.xlu0 %v5487_v12  ;;  %v5045_v15 = vpop.f32.mrb[56].mxu1 }
 0xdba   :  { %v5046_v13 = vadd.f32 %v10142_v59, %v5045_v15  ;;  %v9421_v17 = vpop.f32.mrb[57].mxu1 }
 0xdbc   :  { %v5490_v14 = vsel %vm1322_vm2, %v5046_v13, -inf }
 0xdbd   :  { %v5118_v51 = vpop.f32.mrb[62].mxu0  ;;  %5491 = vmax.xlane.f32.xlu1 %v5490_v14  ;;  %v5191_v18 = vpop.f32.mrb[58].mxu1 }
 0xdbe   :  { %v5119_v35 = vadd.f32 %v10141_v9, %v5118_v51  ;;  %v9426_v19 = vpop.f32.mrb[63].mxu0  ;;  %v5192_v20 = vadd.f32 %v10142_v59, %v5191_v18  ;;  %v9431_v21 = vpop.f32.mrb[59].mxu1 }
 0xdc0   :  { %v5493_v22 = vsel %vm1322_vm2, %v5119_v35, -inf  ;;  %v5496_v24 = vsel %vm1322_vm2, %v5192_v20, -inf }
 0xdc1   :  { %5494 = vmax.xlane.f32.xlu0 %v5493_v22  ;;  %v5264_v31 = vpop.f32.mrb[64].mxu0  ;;  %5497 = vmax.xlane.f32.xlu1 %v5496_v24  ;;  %v5337_v36 = vpop.f32.mrb[60].mxu1 }
 0xdc2   :  { %v5265_v32 = vadd.f32 %v10141_v9, %v5264_v31  ;;  %v9436_v38 = vpop.f32.mrb[65].mxu0  ;;  %v5338_v34 = vadd.f32 %v10142_v59, %v5337_v36  ;;  %v9441_v25 = vpop.f32.mrb[61].mxu1 }
 0xdc4   :  { %v5499_v47 = vsel %vm1322_vm2, %v5265_v32, -inf  ;;  %v5502_v26 = vsel %vm1322_vm2, %v5338_v34, -inf }
 0xdc5   :  { %5500 = vmax.xlane.f32.xlu0 %v5499_v47  ;;  %v5410_v27 = vpop.f32.mrb[66].mxu0  ;;  %5503 = vmax.xlane.f32.xlu1 %v5502_v26  ;;  %v5483_v28 = vpop.f32.mrb[62].mxu1 }
 0xdc6   :  { %v5411_v41 = vadd.f32 %v10141_v9, %v5410_v27  ;;  %v9446_v29 = vpop.f32.mrb[67].mxu0  ;;  %v5484_v37 = vadd.f32 %v10142_v59, %v5483_v28  ;;  %v9451_v30 = vpop.f32.mrb[63].mxu1 }
 0xdc8   :  { %v5505_v48 = vsel %vm1322_vm2, %v5411_v41, -inf  ;;  %v5508_v50 = vsel %vm1322_vm2, %v5484_v37, -inf }
 0xdc9   :  { %5506 = vmax.xlane.f32.xlu0 %v5505_v48  ;;  %5509 = vmax.xlane.f32.xlu1 %v5508_v50 }
 0xe46   :  { %v5489_v52 = vpop.xlane.xlu0 %5488 }
 0xe47   :  { %v5511_v54 = vsub.f32 %v4973_v10, %v5489_v52 }
 0xe49   :  { %v5519_v55 = vmul.f32 1.442695, %v5511_v54 }
 0xe4a   :  { %v5492_v56 = vpop.xlane.xlu1 %5491 }
 0xe4b   :  { %10064 = vpow2.f32 %v5519_v55  ;;  %v5512_v57 = vsub.f32 %v5046_v13, %v5492_v56 }
 0xe4d   :  { %v5521_v58 = vmul.f32 1.442695, %v5512_v57 }
 0xe4e   :  { %v5495_v61 = vpop.xlane.xlu0 %5494  ;;  %v5498_v62 = vpop.xlane.xlu1 %5497 }
 0xe4f   :  { %10066 = vpow2.f32 %v5521_v58  ;;  %v5513_v63 = vsub.f32 %v5119_v35, %v5495_v61  ;;  %v5514_v4 = vsub.f32 %v5192_v20, %v5498_v62 }
 0xe51   :  { %v5523_v8 = vmul.f32 1.442695, %v5513_v63  ;;  %v5525_v9 = vmul.f32 1.442695, %v5514_v4 }
 0xe52   :  { %v5501_v11 = vpop.xlane.xlu0 %5500  ;;  %v5504_v12 = vpop.xlane.xlu1 %5503 }
 0xe53   :  { %10068 = vpow2.f32 %v5523_v8  ;;  %v5515_v15 = vsub.f32 %v5265_v32, %v5501_v11  ;;  %v5516_v59 = vsub.f32 %v5338_v34, %v5504_v12 }
 0xe54   :  { %10070 = vpow2.f32 %v5525_v9 }
 0xe55   :  { %v10065_v17 = vpop.eup %10064  ;;  %v5527_v10 = vmul.f32 1.442695, %v5515_v15  ;;  %v5529_v14 = vmul.f32 1.442695, %v5516_v59 }
 0xe56   :  { %v5507_v51 = vpop.xlane.xlu0 %5506  ;;  %v5510_v18 = vpop.xlane.xlu1 %5509  ;;  %v5535_v13 = vsel %vm1322_vm2, %v10065_v17, 0.0 }
 0xe57   :  { %10072 = vpow2.f32 %v5527_v10  ;;  %v5517_v19 = vsub.f32 %v5411_v41, %v5507_v51  ;;  %v5518_v21 = vsub.f32 %v5484_v37, %v5510_v18  ;;  %5536 = vadd.xlane.f32.xlu0 %v5535_v13 }
 0xe58   :  { %10074 = vpow2.f32 %v5529_v14 }
 0xe59   :  { %v10067_v35 = vpop.eup %10066  ;;  %v5531_v20 = vmul.f32 1.442695, %v5517_v19  ;;  %v5533_v22 = vmul.f32 1.442695, %v5518_v21 }
 0xe5a   :  { %v5538_v24 = vsel %vm1322_vm2, %v10067_v35, 0.0 }
 0xe5b   :  { %10076 = vpow2.f32 %v5531_v20  ;;  %5539 = vadd.xlane.f32.xlu1 %v5538_v24 }
 0xe5c   :  { %10078 = vpow2.f32 %v5533_v22 }
 0xe5d   :  { %v10069_v31 = vpop.eup %10068 }
 0xe5e   :  { %v10071_v36 = vpop.eup %10070  ;;  %v5541_v32 = vsel %vm1322_vm2, %v10069_v31, 0.0 }
 0xe5f   :  { %5542 = vadd.xlane.f32.xlu0 %v5541_v32  ;;  %v5544_v38 = vsel %vm1322_vm2, %v10071_v36, 0.0 }
 0xe60   :  { %5545 = vadd.xlane.f32.xlu1 %v5544_v38 }
 0xe61   :  { %v10073_v34 = vpop.eup %10072 }
 0xe62   :  { %v10075_v25 = vpop.eup %10074  ;;  %v5547_v47 = vsel %vm1322_vm2, %v10073_v34, 0.0 }
 0xe63   :  { %5548 = vadd.xlane.f32.xlu0 %v5547_v47  ;;  %v5550_v26 = vsel %vm1322_vm2, %v10075_v25, 0.0 }
 0xe64   :  { %5551 = vadd.xlane.f32.xlu1 %v5550_v26 }
 0xe65   :  { %v10077_v27 = vpop.eup %10076 }
 0xe66   :  { %v10079_v28 = vpop.eup %10078  ;;  %v5553_v41 = vsel %vm1322_vm2, %v10077_v27, 0.0 }
 0xe67   :  { %5554 = vadd.xlane.f32.xlu0 %v5553_v41  ;;  %v5556_v29 = vsel %vm1322_vm2, %v10079_v28, 0.0 }
 0xe68   :  { %5557 = vadd.xlane.f32.xlu1 %v5556_v29 }
 0xee4   :  { %v5537_v37 = vpop.xlane.xlu0 %5536 }
 0xee5   :  { %10080 = vrcp.f32 %v5537_v37 }
 0xee8   :  { %v5540_v30 = vpop.xlane.xlu1 %5539 }
 0xee9   :  { %10082 = vrcp.f32 %v5540_v30 }
 0xeec   :  { %v5543_v48 = vpop.xlane.xlu0 %5542 }
 0xeed   :  { %10084 = vrcp.f32 %v5543_v48  ;;  %v5546_v50 = vpop.xlane.xlu1 %5545 }
 0xeee   :  { %10086 = vrcp.f32 %v5546_v50 }
 0xeef   :  { %v10081_v52 = vpop.eup %10080 }
 0xef0   :  { %v5567_v54 = vmul.f32 %v10081_v52, %v10065_v17  ;;  %v5549_v55 = vpop.xlane.xlu0 %5548 }
 0xef1   :  { %10088 = vrcp.f32 %v5549_v55  ;;  %v5552_v56 = vpop.xlane.xlu1 %5551 }
 0xef2   :  { %10090 = vrcp.f32 %v5552_v56  ;;  %9455 = vmatmul.mubr.msk.f32.vlgmr.msra.gmra.mrb[68].mxu0 %vm1322_vm2, %v5567_v54 }
 0xef3   :  { %v10083_v57 = vpop.eup %10082  ;;  %9463 = vmatpush3.msra.mxu0 %v10837_v7  ;;  %9464 = vmatprep.mubr.msk.f32.mxu0 %vm10200_vm1, %v10199_v23 }
 0xef4   :  { %v5568_v58 = vmul.f32 %v10083_v57, %v10067_v35  ;;  %v5555_v61 = vpop.xlane.xlu0 %5554  ;;  %9472 = vmatprep.subr.mxu0 %v10199_v23 }
 0xef5   :  { %10092 = vrcp.f32 %v5555_v61  ;;  %v5558_v62 = vpop.xlane.xlu1 %5557 }
 0xef6   :  { %10094 = vrcp.f32 %v5558_v62  ;;  %9460 = vmatmul.mubr.msk.f32.vlgmr.msra.gmra.mrb[64].mxu1 %vm1322_vm2, %v5568_v58 }
 0xef7   :  { %v10085_v63 = vpop.eup %10084  ;;  %9468 = vmatpush3.msra.mxu1 %v10835_v6  ;;  %9469 = vmatprep.mubr.msk.f32.mxu1 %vm10200_vm1, %v10199_v23 }
 0xef8   :  { %v10087_v4 = vpop.eup %10086  ;;  %v5569_v7 = vmul.f32 %v10085_v63, %v10069_v31  ;;  %9477 = vmatprep.subr.mxu1 %v10199_v23  ;;  %v6304_v63 = vld [vmem:[#allocation2 + $0x320] sm:$0xff] }
 0xef9   :  { %v5570_v8 = vmul.f32 %v10087_v4, %v10071_v36 }
 0xefa   :  { %9465 = vmatmul.mubr.msk.f32.vlgmr.msra.gmra.mrb[70].mxu0 %vm1322_vm2, %v5569_v7  ;;  %v6305_v7 = vld [vmem:[#allocation2 + $0x328] sm:$0xff] }
 0xefb   :  { %v10089_v9 = vpop.eup %10088  ;;  %9473 = vmatpush3.msra.mxu0 %v10825_v5  ;;  %9470 = vmatmul.mubr.msk.f32.vlgmr.msra.gmra.mrb[66].mxu1 %vm1322_vm2, %v5570_v8  ;;  %v9902_v8 = vpack.c.bf16 %v6305_v7, %v6304_v63  ;;  %v6547_v63 = vld [vmem:[#allocation2 + $0x398] sm:$0xff] }
 0xefc   :  { %v10091_v11 = vpop.eup %10090  ;;  %v5571_v12 = vmul.f32 %v10089_v9, %v10073_v34  ;;  %9478 = vmatpush3.msra.mxu1 %v10820_v1  ;;  %9474 = vmatprep.mubr.msk.f32.mxu0 %vm10200_vm1, %v10199_v23  ;;  %v6220_v9 = vld [vmem:[#allocation2 + $0x310] sm:$0xff]  ;;  %v6627_v7 = vld [vmem:[#allocation2 + $0x3b8] sm:$0xff] }
 0xefd   :  { %v5572_v6 = vmul.f32 %v10091_v11, %v10075_v25  ;;  %9482 = vmatprep.subr.mxu0 %v10199_v23  ;;  %9479 = vmatprep.mubr.msk.f32.mxu1 %vm10200_vm1, %v10199_v23  ;;  %v6221_v11 = vld [vmem:[#allocation2 + $0x318] sm:$0xff] }
 0xefe   :  { %9475 = vmatmul.mubr.msk.f32.vlgmr.msra.gmra.mrb[72].mxu0 %vm1322_vm2, %v5571_v12  ;;  %9487 = vmatprep.subr.mxu1 %v10199_v23  ;;  %v6306_v12 = vld [vmem:[#allocation2 + $0x330] sm:$0xff] }
 0xeff   :  { %v10093_v5 = vpop.eup %10092  ;;  %9483 = vmatpush3.msra.mxu0 %v10841_v53  ;;  %9480 = vmatmul.mubr.msk.f32.vlgmr.msra.gmra.mrb[68].mxu1 %vm1322_vm2, %v5572_v6  ;;  %v9898_v6 = vpack.c.bf16 %v6221_v11, %v6220_v9  ;;  %v6704_v11 = vld [vmem:[#allocation2 + $0x3c0] sm:$0xff] }
 0xf00   :  { %v10095_v15 = vpop.eup %10094  ;;  %v5573_v1 = vmul.f32 %v10093_v5, %v10077_v27  ;;  %9488 = vmatpush3.msra.mxu1 %v10839_v60  ;;  %9484 = vmatprep.mubr.msk.f32.mxu0 %vm10200_vm1, %v10199_v23  ;;  %v6307_v5 = vld [vmem:[#allocation2 + $0x338] sm:$0xff] }
 0xf01   :  { %v5574_v59 = vmul.f32 %v10095_v15, %v10079_v28  ;;  %9489 = vmatprep.mubr.msk.f32.mxu1 %vm10200_vm1, %v10199_v23  ;;  %9903 = vmatprep.subr.bf16.mxu1 %v9902_v8  ;;  %v9906_v15 = vpack.c.bf16 %v6307_v5, %v6306_v12  ;;  %v6705_v12 = vld [vmem:[#allocation2 + $0x3c8] sm:$0xff] }
 0xf02   :  { %9485 = vmatmul.mubr.msk.f32.vlgmr.msra.gmra.mrb[74].mxu0 %vm1322_vm2, %v5573_v1  ;;  %v6384_v1 = vld [vmem:[#allocation2 + $0x340] sm:$0xff]  ;;  %v6785_v5 = vld [vmem:[#allocation2 + $0x3e8] sm:$0xff] }
 0xf03   :  { %9490 = vmatmul.mubr.msk.f32.vlgmr.msra.gmra.mrb[70].mxu1 %vm1322_vm2, %v5574_v59  ;;  %v6385_v59 = vld [vmem:[#allocation2 + $0x348] sm:$0xff] }
 0xf04   :  { %9905 = vmatpush3.bf16.msra.mxu1 %v9902_v8 }
 0xf05   :  { %9907 = vmatprep.subr.bf16.mxu1 %v9906_v15 }
 0xf08   :  { %9909 = vmatpush3.bf16.msra.mxu1 %v9906_v15  ;;  %v9942_v15 = vpack.c.bf16 %v6705_v12, %v6704_v11 }
 0xfc5   :  { %v5644_v17 = vpop.f32.mrb[68].mxu0 }
 0xfc6   :  { %v9456_v10 = vpop.f32.mrb[69].mxu0  ;;  %v6159_v18 = vsel %vm47_vm0, %v5644_v17, 0.0  ;;  %v6464_v17 = vld [vmem:[#allocation2 + $0x360] sm:$0xff] }
 0xfc7   :  { %v9910_v10 = vpack.c.bf16 %v6385_v59, %v6384_v1  ;;  %v6706_v59 = vld [vmem:[#allocation2 + $0x3d0] sm:$0xff] }
 0xfc9   :  { %v5717_v53 = vpop.f32.mrb[64].mxu1 }
 0xfca   :  { %v9461_v14 = vpop.f32.mrb[65].mxu1  ;;  %v6166_v21 = vsel %vm47_vm0, %v5717_v53, 0.0  ;;  %v6465_v53 = vld [vmem:[#allocation2 + $0x368] sm:$0xff] }
 0xfcb   :  { %v9918_v14 = vpack.c.bf16 %v6465_v53, %v6464_v17  ;;  %v10143_v17 = vld [vmem:[%s11161_s1] sm:$0xff]  ;;  %v6786_v53 = vld [vmem:[#allocation2 + $0x3f0] sm:$0xff] }
 0xfcd   :  { %v5790_v51 = vpop.f32.mrb[70].mxu0  ;;  %9919 = vmatprep.subr.bf16.mxu1 %v9918_v14 }
 0xfce   :  { %v6160_v60 = vsel %vm47_vm0, %v5790_v51, 0.0  ;;  %v9466_v13 = vpop.f32.mrb[71].mxu0  ;;  %v5863_v19 = vpop.f32.mrb[66].mxu1 }
 0xfcf   :  { %v6161_v35 = vadd.f32 %v6160_v60, %v6159_v18  ;;  %v6167_v20 = vsel %vm47_vm0, %v5863_v19, 0.0  ;;  %v9471_v22 = vpop.f32.mrb[67].mxu1 }
 0xfd0   :  { %v6168_v24 = vadd.f32 %v6167_v20, %v6166_v21 }
 0xfd1   :  { %v5936_v31 = vpop.f32.mrb[72].mxu0 }
 0xfd2   :  { %v6162_v36 = vsel %vm47_vm0, %v5936_v31, 0.0  ;;  %v9476_v32 = vpop.f32.mrb[73].mxu0  ;;  %v6009_v38 = vpop.f32.mrb[68].mxu1 }
 0xfd3   :  { %v6163_v34 = vadd.f32 %v6162_v36, %v6161_v35  ;;  %v6169_v25 = vsel %vm47_vm0, %v6009_v38, 0.0  ;;  %v9481_v47 = vpop.f32.mrb[69].mxu1 }
 0xfd4   :  { %v6170_v26 = vadd.f32 %v6169_v25, %v6168_v24  ;;  %v6208_v25 = vrot.slane %v10707_v43, %v2043_v45  ;;  %v6544_v45 = vld [vmem:[#allocation2 + $0x380] sm:$0xff] }
 0xfd5   :  { %v6082_v27 = vpop.f32.mrb[74].mxu0 }
 0xfd6   :  { %v6164_v28 = vsel %vm47_vm0, %v6082_v27, 0.0  ;;  %v9486_v41 = vpop.f32.mrb[75].mxu0  ;;  %v6155_v29 = vpop.f32.mrb[70].mxu1 }
 0xfd7   :  { %v6165_v37 = vadd.f32 %v6164_v28, %v6163_v34  ;;  %v6171_v30 = vsel %vm47_vm0, %v6155_v29, 0.0  ;;  %v9491_v48 = vpop.f32.mrb[71].mxu1  ;;  %v6214_v41 = vrot.slane %v10707_v43, %v2049_v46  ;;  %v6545_v43 = vld [vmem:[#allocation2 + $0x388] sm:$0xff] }
 0xfd8   :  { %v6172_v50 = vadd.f32 %v6171_v30, %v6170_v26  ;;  %v6386_v30 = vld [vmem:[#allocation2 + $0x350] sm:$0xff] }
 0xfd9   :  { %v6173_v52 = vadd.f32 %v6165_v37, %v10739_v0  ;;  %v6218_v0 = vld [vmem:[#allocation2 + $0x300] sm:$0xff] }
 0xfda   :  { %v10905_v54 = vadd.f32 %v6172_v50, %v10741_v16  ;;  %v6219_v16 = vld [vmem:[#allocation2 + $0x308] sm:$0xff]  ;;  %v6387_v50 = vld [vmem:[#allocation2 + $0x358] sm:$0xff] }
 0xfdb   :  { %v6175_v55 = vsel %vm47_vm0, %v6173_v52, 0.0  ;;  %v6183_v56 = vmul.f32 %v6173_v52, %v6173_v52  ;;  %v9894_v4 = vpack.c.bf16 %v6219_v16, %v6218_v0  ;;  %v6546_v16 = vld [vmem:[#allocation2 + $0x390] sm:$0xff] }
 0xfdc   :  { %6176 = vadd.xlane.f32.xlu0 %v6175_v55  ;;  %v6178_v57 = vsel %vm47_vm0, %v10905_v54, 0.0  ;;  %v6184_v58 = vmul.f32 %v10905_v54, %v10905_v54  ;;  %v6466_v55 = vld [vmem:[#allocation2 + $0x370] sm:$0xff]  ;;  %v9930_v8 = vpack.c.bf16 %v6547_v63, %v6546_v16 }
 0xfdd   :  { %6179 = vadd.xlane.f32.xlu1 %v6178_v57  ;;  %v6185_v61 = vsel %vm47_vm0, %v6183_v56, 0.0  ;;  %9895 = vmatprep.subr.bf16.mxu0 %v9894_v4 }
 0xfde   :  { %v6188_v62 = vsel %vm47_vm0, %v6184_v58, 0.0  ;;  %9897 = vmatpush3.bf16.msra.mxu0 %v9894_v4  ;;  %v6624_v58 = vld [vmem:[#allocation2 + $0x3a0] sm:$0xff]  ;;  %v6626_v4 = vld [vmem:[#allocation2 + $0x3b0] sm:$0xff] }
 0xfdf   :  { %9899 = vmatprep.subr.bf16.mxu0 %v9898_v6  ;;  %v9938_v9 = vpack.c.bf16 %v6627_v7, %v6626_v4 }
 0xfe0   :  { %6186 = vadd.xlane.f32.xlu0 %v6185_v61  ;;  %v6625_v61 = vld [vmem:[#allocation2 + $0x3a8] sm:$0xff] }
 0xfe1   :  { %6189 = vadd.xlane.f32.xlu1 %v6188_v62  ;;  %v9926_v62 = vpack.c.bf16 %v6545_v43, %v6544_v45  ;;  %v9934_v0 = vpack.c.bf16 %v6625_v61, %v6624_v58 }
 0xfe2   :  { %9901 = vmatpush3.bf16.msra.mxu0 %v9898_v6  ;;  %v6784_v6 = vld [vmem:[#allocation2 + $0x3e0] sm:$0xff] }
 0xfe3   :  { %9911 = vmatprep.subr.bf16.mxu0 %v9910_v10  ;;  %v9950_v1 = vpack.c.bf16 %v6785_v5, %v6784_v6 }
0x1069   :  { %v6177_v51 = vpop.xlane.xlu0 %6176 }
0x106a   :  { %v6181_v18 = vmul.f32 0.03125, %v6177_v51  ;;  %v6180_v60 = vpop.xlane.xlu1 %6179 }
0x106b   :  { %v6182_v13 = vmul.f32 0.03125, %v6180_v60  ;;  %v10144_v60 = vld [vmem:[%s11161_s1 + $0x8] sm:$0xff] }
0x106c   :  { %v6195_v21 = vmul.f32 %v6181_v18, %v6181_v18  ;;  %v6193_v34 = vsub.f32 %v6173_v52, %v6181_v18  ;;  %v6467_v52 = vld [vmem:[#allocation2 + $0x378] sm:$0xff] }
0x106d   :  { %v6187_v19 = vpop.xlane.xlu0 %6186  ;;  %v6196_v22 = vmul.f32 %v6182_v13, %v6182_v13  ;;  %v6194_v26 = vsub.f32 %v10905_v54, %v6182_v13  ;;  %v9914_v54 = vpack.c.bf16 %v6387_v50, %v6386_v30  ;;  %v9922_v46 = vpack.c.bf16 %v6467_v52, %v6466_v55 }
0x106e   :  { %v6191_v35 = vmul.f32 0.03125, %v6187_v19  ;;  %v6190_v20 = vpop.xlane.xlu1 %6189 }
0x106f   :  { %v6192_v24 = vmul.f32 0.03125, %v6190_v20 }
0x1070   :  { %v6197_v31 = vsub.f32 %v6191_v35, %v6195_v21 }
0x1071   :  { %v6198_v36 = vsub.f32 %v6192_v24, %v6196_v22 }
0x1072   :  { %v6199_v32 = vadd.f32 1e-06, %v6197_v31 }
0x1073   :  { %v6200_v38 = vadd.f32 1e-06, %v6198_v36 }
0x1074   :  { %10096 = vrsqrt.f32 %v6199_v32 }
0x1075   :  { %10098 = vrsqrt.f32 %v6200_v38 }
0x107e   :  { %v10097_v47 = vpop.eup %10096 }
0x107f   :  { %v10099_v27 = vpop.eup %10098  ;;  %v6203_v28 = vmul.f32 %v10097_v47, %v6193_v34 }
0x1080   :  { %v6204_v29 = vmul.f32 %v10099_v27, %v6194_v26 }
0x1081   :  { %v6209_v37 = vmul.f32 %v6208_v25, %v6203_v28 }
0x1082   :  { %v6210_v48 = vmul.f32 %v6208_v25, %v6204_v29 }
0x1083   :  { %v10921_v56 = vadd.f32 %v6214_v41, %v6209_v37 }
0x1084   :  { %v10923_v57 = vadd.f32 %v6214_v41, %v6210_v48  ;;  %v10145_v41 = vld [vmem:[%s11162_s2 + $0x18] sm:$0xff]  ;;  %v10146_v48 = vld [vmem:[%s11162_s2 + $0x10] sm:$0xff] }
0x1085   :  { %9500 = vmatprep.mubr.msk.f32.mxu0 %vm47_vm0, %v10921_v56  ;;  %9511 = vmatprep.mubr.msk.f32.mxu1 %vm47_vm0, %v10921_v56 }
0x1086   :  { %9501 = vmatmul.mubr.msk.f32.vlgmr.msra.gmra.mrb[76].mxu0 %vm47_vm0, %v10923_v57  ;;  %9512 = vmatmul.mubr.msk.f32.vlgmr.msra.gmra.mrb[72].mxu1 %vm47_vm0, %v10923_v57 }
0x1087   :  { %9913 = vmatpush3.bf16.msra.mxu0 %v9910_v10  ;;  %9921 = vmatpush3.bf16.msra.mxu1 %v9918_v14  ;;  %v6707_v10 = vld [vmem:[#allocation2 + $0x3d8] sm:$0xff] }
0x1088   :  { %9522 = vmatprep.mubr.msk.f32.mxu0 %vm47_vm0, %v10921_v56  ;;  %9533 = vmatprep.mubr.msk.f32.mxu1 %vm47_vm0, %v10921_v56  ;;  %v6787_v14 = vld [vmem:[#allocation2 + $0x3f8] sm:$0xff]  ;;  %v9946_v51 = vpack.c.bf16 %v6707_v10, %v6706_v59 }
0x1089   :  { %9915 = vmatprep.subr.bf16.mxu0 %v9914_v54  ;;  %9923 = vmatprep.subr.bf16.mxu1 %v9922_v46  ;;  %v9954_v18 = vpack.c.bf16 %v6787_v14, %v6786_v53 }
0x108b   :  { %9917 = vmatpush3.bf16.msra.mxu0 %v9914_v54  ;;  %9925 = vmatpush3.bf16.msra.mxu1 %v9922_v46 }
0x108c   :  { %9927 = vmatprep.subr.bf16.mxu0 %v9926_v62  ;;  %9935 = vmatprep.subr.bf16.mxu1 %v9934_v0 }
0x108e   :  { %9523 = vmatmul.mubr.msk.f32.vlgmr.msra.gmra.mrb[78].mxu0 %vm47_vm0, %v10923_v57  ;;  %9534 = vmatmul.mubr.msk.f32.vlgmr.msra.gmra.mrb[74].mxu1 %vm47_vm0, %v10923_v57 }
0x108f   :  { %9929 = vmatpush3.bf16.msra.mxu0 %v9926_v62  ;;  %9937 = vmatpush3.bf16.msra.mxu1 %v9934_v0 }
0x1090   :  { %9931 = vmatprep.subr.bf16.mxu0 %v9930_v8  ;;  %9939 = vmatprep.subr.bf16.mxu1 %v9938_v9 }
0x1091   :  { %9544 = vmatprep.mubr.msk.f32.mxu0 %vm47_vm0, %v10143_v17  ;;  %9555 = vmatprep.mubr.msk.f32.mxu1 %vm47_vm0, %v10143_v17 }
0x1093   :  { %9933 = vmatpush3.bf16.msra.mxu0 %v9930_v8  ;;  %9941 = vmatpush3.bf16.msra.mxu1 %v9938_v9 }
0x1094   :  { %9943 = vmatprep.subr.bf16.mxu0 %v9942_v15  ;;  %9951 = vmatprep.subr.bf16.mxu1 %v9950_v1 }
0x1096   :  { %9545 = vmatmul.mubr.msk.f32.vlgmr.msra.gmra.mrb[80].mxu0 %vm47_vm0, %v10144_v60  ;;  %9556 = vmatmul.mubr.msk.f32.vlgmr.msra.gmra.mrb[76].mxu1 %vm47_vm0, %v10144_v60 }
0x1097   :  { %9945 = vmatpush3.bf16.msra.mxu0 %v9942_v15  ;;  %9953 = vmatpush3.bf16.msra.mxu1 %v9950_v1 }
0x1098   :  { %9947 = vmatprep.subr.bf16.mxu0 %v9946_v51  ;;  %9955 = vmatprep.subr.bf16.mxu1 %v9954_v18 }
0x1099   :  { %9566 = vmatprep.mubr.msk.f32.mxu0 %vm47_vm0, %v10143_v17  ;;  %9577 = vmatprep.mubr.msk.f32.mxu1 %vm47_vm0, %v10143_v17 }
0x109b   :  { %9949 = vmatpush3.bf16.msra.mxu0 %v9946_v51  ;;  %9957 = vmatpush3.bf16.msra.mxu1 %v9954_v18 }
0x109c   :  { %9580 = vmatprep.subr.mxu0 %v10199_v23  ;;  %9585 = vmatprep.subr.mxu1 %v10199_v23 }
0x109e   :  { %9567 = vmatmul.mubr.msk.f32.vlgmr.msra.gmra.mrb[82].mxu0 %vm47_vm0, %v10144_v60  ;;  %9578 = vmatmul.mubr.msk.f32.vlgmr.msra.gmra.mrb[78].mxu1 %vm47_vm0, %v10144_v60 }
0x109f   :  { %9587 = vmatprep.mubr.msk.f32.mxu1 %vm10200_vm1, %v10199_v23  ;;  %9582 = vmatprep.mubr.msk.f32.mxu0 %vm10200_vm1, %v10199_v23 }
0x10a4   :  { %9581 = vmatpush3.xpose.msk.msra.mxu0 %vm47_vm0, %v10143_v17  ;;  %9586 = vmatpush3.xpose.msk.msra.mxu1 %vm47_vm0, %v10144_v60 }
0x10a5   :  { %9590 = vmatprep.subr.mxu0 %v10199_v23  ;;  %9595 = vmatprep.subr.mxu1 %v10199_v23 }
0x1159   :  { %v9502_v13 = vpop.f32.mrb[76].mxu0  ;;  %v9513_v19 = vpop.f32.mrb[72].mxu1 }
0x115a   :  { %v6294_v21 = vpop.f32.mrb[77].mxu0  ;;  %v6374_v35 = vpop.f32.mrb[73].mxu1  ;;  %9588 = vmatmul.mubr.msk.f32.vlgmr.msra.gmra.mrb[80].mxu1 %vm47_vm0, %v9502_v13 }
0x115b   :  { %9583 = vmatmul.mubr.msk.f32.vlgmr.msra.gmra.mrb[84].mxu0 %vm47_vm0, %v6294_v21  ;;  %9596 = vmatpush3.xpose.msk.msra.mxu1 %vm47_vm0, %v10144_v60 }
0x115c   :  { %9591 = vmatpush3.xpose.msk.msra.mxu0 %vm47_vm0, %v10143_v17  ;;  %9597 = vmatprep.mubr.msk.f32.mxu1 %vm10200_vm1, %v10199_v23 }
0x115d   :  { %9592 = vmatprep.mubr.msk.f32.mxu0 %vm10200_vm1, %v10199_v23  ;;  %9600 = vmatprep.subr.mxu0 %v10199_v23 }
0x115e   :  { %9598 = vmatmul.mubr.msk.f32.vlgmr.msra.gmra.mrb[82].mxu1 %vm47_vm0, %v9513_v19  ;;  %9605 = vmatprep.subr.mxu1 %v10199_v23 }
0x115f   :  { %9593 = vmatmul.mubr.msk.f32.vlgmr.msra.gmra.mrb[86].mxu0 %vm47_vm0, %v6374_v35  ;;  %9606 = vmatpush3.xpose.msk.msra.mxu1 %vm47_vm0, %v10144_v60 }
0x1160   :  { %9601 = vmatpush3.xpose.msk.msra.mxu0 %vm47_vm0, %v10143_v17  ;;  %9607 = vmatprep.mubr.msk.f32.mxu1 %vm10200_vm1, %v10199_v23 }
0x1161   :  { %v9524_v20 = vpop.f32.mrb[78].mxu0  ;;  %v9535_v22 = vpop.f32.mrb[74].mxu1  ;;  %9602 = vmatprep.mubr.msk.f32.mxu0 %vm10200_vm1, %v10199_v23  ;;  %9610 = vmatprep.subr.mxu0 %v10199_v23 }
0x1162   :  { %v6454_v24 = vpop.f32.mrb[79].mxu0  ;;  %v6534_v31 = vpop.f32.mrb[75].mxu1  ;;  %9608 = vmatmul.mubr.msk.f32.vlgmr.msra.gmra.mrb[84].mxu1 %vm47_vm0, %v9524_v20  ;;  %9615 = vmatprep.subr.mxu1 %v10199_v23 }
0x1163   :  { %9603 = vmatmul.mubr.msk.f32.vlgmr.msra.gmra.mrb[88].mxu0 %vm47_vm0, %v6454_v24  ;;  %9616 = vmatpush3.xpose.msk.msra.mxu1 %vm47_vm0, %v10144_v60 }
0x1164   :  { %9611 = vmatpush3.xpose.msk.msra.mxu0 %vm47_vm0, %v10143_v17  ;;  %9617 = vmatprep.mubr.msk.f32.mxu1 %vm10200_vm1, %v10199_v23 }
0x1165   :  { %9612 = vmatprep.mubr.msk.f32.mxu0 %vm10200_vm1, %v10199_v23  ;;  %9620 = vmatprep.subr.mxu0 %v10199_v23 }
0x1166   :  { %9618 = vmatmul.mubr.msk.f32.vlgmr.msra.gmra.mrb[86].mxu1 %vm47_vm0, %v9535_v22  ;;  %9625 = vmatprep.subr.mxu1 %v10199_v23 }
0x1167   :  { %9613 = vmatmul.mubr.msk.f32.vlgmr.msra.gmra.mrb[90].mxu0 %vm47_vm0, %v6534_v31  ;;  %9627 = vmatprep.mubr.msk.f32.mxu1 %vm10200_vm1, %v10199_v23 }
0x1168   :  { %9622 = vmatprep.mubr.msk.f32.mxu0 %vm10200_vm1, %v10199_v23 }
0x1169   :  { %v9546_v36 = vpop.f32.mrb[80].mxu0  ;;  %v11001_v32 = vpop.f32.mrb[76].mxu1 }
0x116a   :  { %v6614_v38 = vpop.f32.mrb[81].mxu0  ;;  %v11003_v34 = vpop.f32.mrb[77].mxu1  ;;  %9626 = vmatpush3.msra.mxu1 %v9546_v36 }
0x116b   :  { %9621 = vmatpush3.msra.mxu0 %v6614_v38  ;;  %9635 = vmatprep.subr.mxu1 %v10199_v23 }
0x116c   :  { %9630 = vmatprep.subr.mxu0 %v10199_v23 }
0x1171   :  { %v11007_v25 = vpop.f32.mrb[82].mxu0  ;;  %v11009_v47 = vpop.f32.mrb[78].mxu1 }
0x1172   :  { %v11011_v26 = vpop.f32.mrb[83].mxu0  ;;  %v11013_v27 = vpop.f32.mrb[79].mxu1 }
0x122d   :  { %v7005_v28 = vpop.f32.mrb[80].mxu1 }
0x122e   :  { %v7006_v29 = vadd.f32 %v10145_v41, %v7005_v28  ;;  %v6932_v37 = vpop.f32.mrb[84].mxu0  ;;  %v9589_v30 = vpop.f32.mrb[81].mxu1 }
0x122f   :  { %v6933_v50 = vadd.f32 %v10146_v48, %v6932_v37  ;;  %v9584_v55 = vpop.f32.mrb[85].mxu0 }
0x1230   :  { %v7450_v52 = vsel %vm1322_vm2, %v7006_v29, -inf }
0x1231   :  { %7451 = vmax.xlane.f32.xlu1 %v7450_v52  ;;  %v7151_v45 = vpop.f32.mrb[82].mxu1  ;;  %v7447_v54 = vsel %vm1322_vm2, %v6933_v50, -inf }
0x1232   :  { %v7152_v46 = vadd.f32 %v10145_v41, %v7151_v45  ;;  %v9599_v43 = vpop.f32.mrb[83].mxu1  ;;  %7448 = vmax.xlane.f32.xlu0 %v7447_v54  ;;  %v7078_v58 = vpop.f32.mrb[86].mxu0 }
0x1233   :  { %v7079_v61 = vadd.f32 %v10146_v48, %v7078_v58  ;;  %v9594_v62 = vpop.f32.mrb[87].mxu0 }
0x1234   :  { %v7456_v0 = vsel %vm1322_vm2, %v7152_v46, -inf }
0x1235   :  { %7457 = vmax.xlane.f32.xlu1 %v7456_v0  ;;  %v7297_v16 = vpop.f32.mrb[84].mxu1  ;;  %v7453_v63 = vsel %vm1322_vm2, %v7079_v61, -inf }
0x1236   :  { %v7298_v4 = vadd.f32 %v10145_v41, %v7297_v16  ;;  %v9609_v7 = vpop.f32.mrb[85].mxu1  ;;  %7454 = vmax.xlane.f32.xlu0 %v7453_v63  ;;  %v7224_v8 = vpop.f32.mrb[88].mxu0 }
0x1237   :  { %v7225_v9 = vadd.f32 %v10146_v48, %v7224_v8  ;;  %v9604_v11 = vpop.f32.mrb[89].mxu0 }
0x1238   :  { %v7462_v12 = vsel %vm1322_vm2, %v7298_v4, -inf }
0x1239   :  { %7463 = vmax.xlane.f32.xlu1 %v7462_v12  ;;  %v7443_v6 = vpop.f32.mrb[86].mxu1  ;;  %v7459_v5 = vsel %vm1322_vm2, %v7225_v9, -inf }
0x123a   :  { %v7444_v15 = vadd.f32 %v10145_v41, %v7443_v6  ;;  %v9619_v1 = vpop.f32.mrb[87].mxu1  ;;  %7460 = vmax.xlane.f32.xlu0 %v7459_v5  ;;  %v7370_v59 = vpop.f32.mrb[90].mxu0 }
0x123b   :  { %v7371_v17 = vadd.f32 %v10146_v48, %v7370_v59  ;;  %v9614_v10 = vpop.f32.mrb[91].mxu0 }
0x123c   :  { %v7468_v53 = vsel %vm1322_vm2, %v7444_v15, -inf }
0x123d   :  { %7469 = vmax.xlane.f32.xlu1 %v7468_v53  ;;  %v7465_v14 = vsel %vm1322_vm2, %v7371_v17, -inf }
0x123e   :  { %7466 = vmax.xlane.f32.xlu0 %v7465_v14 }
0x12be   :  { %v7452_v51 = vpop.xlane.xlu1 %7451 }
0x12bf   :  { %v7472_v18 = vsub.f32 %v7006_v29, %v7452_v51  ;;  %v7449_v60 = vpop.xlane.xlu0 %7448 }
0x12c0   :  { %v7471_v13 = vsub.f32 %v6933_v50, %v7449_v60 }
0x12c1   :  { %v7481_v19 = vmul.f32 1.442695, %v7472_v18 }
0x12c2   :  { %v7479_v21 = vmul.f32 1.442695, %v7471_v13  ;;  %v7458_v35 = vpop.xlane.xlu1 %7457 }
0x12c3   :  { %10100 = vpow2.f32 %v7481_v19  ;;  %v7474_v20 = vsub.f32 %v7152_v46, %v7458_v35  ;;  %v7455_v22 = vpop.xlane.xlu0 %7454 }
0x12c4   :  { %10102 = vpow2.f32 %v7479_v21  ;;  %v7473_v24 = vsub.f32 %v7079_v61, %v7455_v22 }
0x12c5   :  { %v7485_v31 = vmul.f32 1.442695, %v7474_v20 }
0x12c6   :  { %v7483_v36 = vmul.f32 1.442695, %v7473_v24  ;;  %v7464_v38 = vpop.xlane.xlu1 %7463 }
0x12c7   :  { %10104 = vpow2.f32 %v7485_v31  ;;  %v7476_v28 = vsub.f32 %v7298_v4, %v7464_v38  ;;  %v7461_v41 = vpop.xlane.xlu0 %7460 }
0x12c8   :  { %10106 = vpow2.f32 %v7483_v36  ;;  %v7475_v37 = vsub.f32 %v7225_v9, %v7461_v41 }
0x12c9   :  { %v7489_v30 = vmul.f32 1.442695, %v7476_v28 }
0x12ca   :  { %v7487_v29 = vmul.f32 1.442695, %v7475_v37  ;;  %v7470_v48 = vpop.xlane.xlu1 %7469 }
0x12cb   :  { %10108 = vpow2.f32 %v7489_v30  ;;  %v7478_v50 = vsub.f32 %v7444_v15, %v7470_v48  ;;  %v7467_v55 = vpop.xlane.xlu0 %7466 }
0x12cc   :  { %10110 = vpow2.f32 %v7487_v29  ;;  %v7477_v52 = vsub.f32 %v7371_v17, %v7467_v55 }
0x12cd   :  { %v10101_v45 = vpop.eup %10100  ;;  %v7493_v54 = vmul.f32 1.442695, %v7478_v50 }
0x12ce   :  { %v10103_v46 = vpop.eup %10102  ;;  %v7491_v43 = vmul.f32 1.442695, %v7477_v52  ;;  %v7498_v58 = vsel %vm1322_vm2, %v10101_v45, 0.0 }
0x12cf   :  { %10112 = vpow2.f32 %v7493_v54  ;;  %7499 = vadd.xlane.f32.xlu1 %v7498_v58  ;;  %v7495_v61 = vsel %vm1322_vm2, %v10103_v46, 0.0 }
0x12d0   :  { %10114 = vpow2.f32 %v7491_v43  ;;  %7496 = vadd.xlane.f32.xlu0 %v7495_v61 }
0x12d1   :  { %v10105_v62 = vpop.eup %10104 }
0x12d2   :  { %v10107_v0 = vpop.eup %10106  ;;  %v7504_v16 = vsel %vm1322_vm2, %v10105_v62, 0.0 }
0x12d3   :  { %7505 = vadd.xlane.f32.xlu1 %v7504_v16  ;;  %v7501_v63 = vsel %vm1322_vm2, %v10107_v0, 0.0 }
0x12d4   :  { %7502 = vadd.xlane.f32.xlu0 %v7501_v63 }
0x12d5   :  { %v10109_v4 = vpop.eup %10108 }
0x12d6   :  { %v10111_v7 = vpop.eup %10110  ;;  %v7510_v8 = vsel %vm1322_vm2, %v10109_v4, 0.0 }
0x12d7   :  { %7511 = vadd.xlane.f32.xlu1 %v7510_v8  ;;  %v7507_v9 = vsel %vm1322_vm2, %v10111_v7, 0.0 }
0x12d8   :  { %7508 = vadd.xlane.f32.xlu0 %v7507_v9 }
0x12d9   :  { %v10113_v11 = vpop.eup %10112 }
0x12da   :  { %v10115_v12 = vpop.eup %10114  ;;  %v7516_v6 = vsel %vm1322_vm2, %v10113_v11, 0.0 }
0x12db   :  { %7517 = vadd.xlane.f32.xlu1 %v7516_v6  ;;  %v7513_v5 = vsel %vm1322_vm2, %v10115_v12, 0.0 }
0x12dc   :  { %7514 = vadd.xlane.f32.xlu0 %v7513_v5 }
0x135c   :  { %v7500_v15 = vpop.xlane.xlu1 %7499 }
0x135d   :  { %10116 = vrcp.f32 %v7500_v15  ;;  %v7497_v1 = vpop.xlane.xlu0 %7496 }
0x135e   :  { %10118 = vrcp.f32 %v7497_v1 }
0x1360   :  { %v7506_v59 = vpop.xlane.xlu1 %7505 }
0x1361   :  { %10120 = vrcp.f32 %v7506_v59  ;;  %v7503_v17 = vpop.xlane.xlu0 %7502 }
0x1362   :  { %10122 = vrcp.f32 %v7503_v17 }
0x1364   :  { %v7512_v10 = vpop.xlane.xlu1 %7511 }
0x1365   :  { %10124 = vrcp.f32 %v7512_v10  ;;  %v7509_v53 = vpop.xlane.xlu0 %7508 }
0x1366   :  { %10126 = vrcp.f32 %v7509_v53 }
0x1367   :  { %v10117_v14 = vpop.eup %10116 }
0x1368   :  { %v10119_v51 = vpop.eup %10118  ;;  %v7528_v18 = vmul.f32 %v10117_v14, %v10101_v45  ;;  %v7518_v60 = vpop.xlane.xlu1 %7517 }
0x1369   :  { %v7527_v13 = vmul.f32 %v10119_v51, %v10103_v46  ;;  %10128 = vrcp.f32 %v7518_v60  ;;  %v7515_v19 = vpop.xlane.xlu0 %7514  ;;  %v8608_v60 = vld [vmem:[%s11164_s4 + $0x50] sm:$0xff] }
0x136a   :  { %10130 = vrcp.f32 %v7515_v19  ;;  %9628 = vmatmul.mubr.msk.f32.vlgmr.msra.gmra.mrb[88].mxu1 %vm1322_vm2, %v7528_v18 }
0x136b   :  { %v10121_v21 = vpop.eup %10120  ;;  %9636 = vmatpush3.msra.mxu1 %v11001_v32  ;;  %9623 = vmatmul.mubr.msk.f32.vlgmr.msra.gmra.mrb[92].mxu0 %vm1322_vm2, %v7527_v13  ;;  %v8609_v13 = vld [vmem:[%s11164_s4 + $0x58] sm:$0xff] }
0x136c   :  { %v10123_v35 = vpop.eup %10122  ;;  %v7530_v20 = vmul.f32 %v10121_v21, %v10105_v62  ;;  %9631 = vmatpush3.msra.mxu0 %v11003_v34  ;;  %9637 = vmatprep.mubr.msk.f32.mxu1 %vm10200_vm1, %v10199_v23  ;;  %v9962_v19 = vpack.c.bf16 %v8609_v13, %v8608_v60  ;;  %v8612_v21 = vld [vmem:[%s11164_s4 + $0x60] sm:$0xff] }
0x136d   :  { %v7529_v22 = vmul.f32 %v10123_v35, %v10107_v0  ;;  %9645 = vmatprep.subr.mxu1 %v10199_v23  ;;  %9632 = vmatprep.mubr.msk.f32.mxu0 %vm10200_vm1, %v10199_v23  ;;  %v8613_v35 = vld [vmem:[%s11164_s4 + $0x68] sm:$0xff] }
0x136e   :  { %9638 = vmatmul.mubr.msk.f32.vlgmr.msra.gmra.mrb[90].mxu1 %vm1322_vm2, %v7530_v20  ;;  %9640 = vmatprep.subr.mxu0 %v10199_v23  ;;  %v8614_v20 = vld [vmem:[%s11164_s4 + $0x70] sm:$0xff] }
0x136f   :  { %v10125_v32 = vpop.eup %10124  ;;  %9646 = vmatpush3.msra.mxu1 %v11007_v25  ;;  %9633 = vmatmul.mubr.msk.f32.vlgmr.msra.gmra.mrb[94].mxu0 %vm1322_vm2, %v7529_v22  ;;  %v9966_v22 = vpack.c.bf16 %v8613_v35, %v8612_v21 }
0x1370   :  { %v10127_v24 = vpop.eup %10126  ;;  %v7532_v34 = vmul.f32 %v10125_v32, %v10109_v4  ;;  %9641 = vmatpush3.msra.mxu0 %v11011_v26  ;;  %9647 = vmatprep.mubr.msk.f32.mxu1 %vm10200_vm1, %v10199_v23  ;;  %v8615_v32 = vld [vmem:[%s11164_s4 + $0x78] sm:$0xff] }
0x1371   :  { %v7531_v31 = vmul.f32 %v10127_v24, %v10111_v7  ;;  %9655 = vmatprep.subr.mxu1 %v10199_v23  ;;  %9642 = vmatprep.mubr.msk.f32.mxu0 %vm10200_vm1, %v10199_v23  ;;  %v9972_v24 = vpack.c.bf16 %v8615_v32, %v8614_v20 }
0x1372   :  { %9648 = vmatmul.mubr.msk.f32.vlgmr.msra.gmra.mrb[92].mxu1 %vm1322_vm2, %v7532_v34  ;;  %9650 = vmatprep.subr.mxu0 %v10199_v23 }
0x1373   :  { %v10129_v25 = vpop.eup %10128  ;;  %9656 = vmatpush3.msra.mxu1 %v11009_v47  ;;  %9643 = vmatmul.mubr.msk.f32.vlgmr.msra.gmra.mrb[96].mxu0 %vm1322_vm2, %v7531_v31 }
0x1374   :  { %v10131_v36 = vpop.eup %10130  ;;  %v7534_v26 = vmul.f32 %v10129_v25, %v10113_v11  ;;  %9651 = vmatpush3.msra.mxu0 %v11013_v27  ;;  %9657 = vmatprep.mubr.msk.f32.mxu1 %vm10200_vm1, %v10199_v23 }
0x1375   :  { %v7533_v38 = vmul.f32 %v10131_v36, %v10115_v12  ;;  %9652 = vmatprep.mubr.msk.f32.mxu0 %vm10200_vm1, %v10199_v23  ;;  %9968 = vmatprep.subr.msk.bf16.mxu1 %vm10674_vm4, %v9966_v22 }
0x1376   :  { %9658 = vmatmul.mubr.msk.f32.vlgmr.msra.gmra.mrb[94].mxu1 %vm1322_vm2, %v7534_v26 }
0x1377   :  { %9653 = vmatmul.mubr.msk.f32.vlgmr.msra.gmra.mrb[98].mxu0 %vm1322_vm2, %v7533_v38 }
0x137a   :  { %9971 = vmatpush3.bf16.xpose.msk.msra.mxu1 %vm10674_vm4, %v9966_v22 }
0x137b   :  { %9974 = vmatprep.subr.msk.bf16.mxu1 %vm10674_vm4, %v9972_v24 }
0x1382   :  { %9977 = vmatpush3.bf16.xpose.msk.msra.mxu1 %vm10674_vm4, %v9972_v24 }
0x143d   :  { %v7677_v28 = vpop.f32.mrb[88].mxu1 }
0x143e   :  { %v7604_v41 = vpop.f32.mrb[92].mxu0  ;;  %v9629_v47 = vpop.f32.mrb[89].mxu1  ;;  %v8126_v29 = vsel %vm47_vm0, %v7677_v28, 0.0 }
0x143f   :  { %v9624_v37 = vpop.f32.mrb[93].mxu0  ;;  %v8119_v55 = vsel %vm47_vm0, %v7604_v41, 0.0 }
0x1441   :  { %v7823_v30 = vpop.f32.mrb[90].mxu1 }
0x1442   :  { %v8127_v27 = vsel %vm47_vm0, %v7823_v30, 0.0  ;;  %v7750_v48 = vpop.f32.mrb[94].mxu0  ;;  %v9639_v50 = vpop.f32.mrb[91].mxu1 }
0x1443   :  { %v8128_v52 = vadd.f32 %v8127_v27, %v8126_v29  ;;  %v8120_v23 = vsel %vm47_vm0, %v7750_v48, 0.0  ;;  %v9634_v45 = vpop.f32.mrb[95].mxu0 }
0x1444   :  { %v8121_v54 = vadd.f32 %v8120_v23, %v8119_v55  ;;  %v8168_v55 = vrot.slane %v11116_v33, %v4009_v39  ;;  %v40_v39 = vld [vmem:[%s11165_s5 + $0x10] sm:$0x3]  ;;  %s10201_s5 = smov [#allocation5]  }
0x1445   :  { %v7969_v46 = vpop.f32.mrb[92].mxu1  ;;  %s8422_s28 = sshll.u32 %s10201_s5, 4  ;;  %s8423_s28 = int_to_ptr.vmem [resolvable:$true] %s8422_s28 }
0x1446   :  { %v8129_v43 = vsel %vm47_vm0, %v7969_v46, 0.0  ;;  %v7896_v58 = vpop.f32.mrb[96].mxu0  ;;  %v9649_v61 = vpop.f32.mrb[93].mxu1  ;;  %s10170_s29 = scalar_lea.vmem %s8423_s28, 256  ;;  %p10175_p9 = scmp.lt.s32.totalorder %s8423_s28, %s8423_s28 }
0x1447   :  { %v8130_v62 = vadd.f32 %v8129_v43, %v8128_v52  ;;  %v8122_v0 = vsel %vm47_vm0, %v7896_v58, 0.0  ;;  %v9644_v16 = vpop.f32.mrb[97].mxu0  ;;  %v8174_v43 = vrot.slane %v11116_v33, %v4015_v49  ;;  %p10171_p8 = scmp.ne.s32.totalorder %s8423_s28, %s10170_s29  ;;  %p10176_p10 = scmp.lt.s32.totalorder %s10170_s29, %s10170_s29 }
0x1448   :  { %v8123_v63 = vadd.f32 %v8122_v0, %v8121_v54  ;;  %v8185_v16 = vrot.slane %v40_v39, %v10275_v42 }
0x1449   :  { %v8115_v4 = vpop.f32.mrb[94].mxu1  ;;  %p10177_p11 = por %p10176_p10, %p10175_p9 }
0x144a   :  { %v8131_v7 = vsel %vm47_vm0, %v8115_v4, 0.0  ;;  %v8042_v8 = vpop.f32.mrb[98].mxu0  ;;  %v9659_v9 = vpop.f32.mrb[95].mxu1 }
0x144b   :  { %v8132_v11 = vadd.f32 %v8131_v7, %v8130_v62  ;;  %v8124_v12 = vsel %vm47_vm0, %v8042_v8, 0.0  ;;  %v9654_v6 = vpop.f32.mrb[99].mxu0  ;;  %p10178_p12 = pnand %p10177_p11, %p10171_p8 }
0x144c   :  { %v8125_v5 = vadd.f32 %v8124_v12, %v8123_v63 }
0x144d   :  { %v8134_v15 = vadd.f32 %v8132_v11, %v10923_v57  ;;  %v8606_v57 = vld [vmem:[%s11164_s4 + $0x40] sm:$0xff]  ;;  %v8277_v11 = vrot.slane %v40_v39, %v10283_v44 }
0x144e   :  { %v8133_v1 = vadd.f32 %v8125_v5, %v10921_v56  ;;  %v8607_v56 = vld [vmem:[%s11164_s4 + $0x48] sm:$0xff] }
0x144f   :  { %v8138_v59 = vsel %vm47_vm0, %v8134_v15, 0.0  ;;  %v8144_v17 = vmul.f32 %v8134_v15, %v8134_v15  ;;  %v9958_v18 = vpack.c.bf16 %v8607_v56, %v8606_v57 }
0x1450   :  { %8139 = vadd.xlane.f32.xlu1 %v8138_v59  ;;  %v8135_v10 = vsel %vm47_vm0, %v8133_v1, 0.0  ;;  %v8143_v53 = vmul.f32 %v8133_v1, %v8133_v1 }
0x1451   :  { %8136 = vadd.xlane.f32.xlu0 %v8135_v10  ;;  %v8148_v14 = vsel %vm47_vm0, %v8144_v17, 0.0  ;;  %9959 = vmatprep.subr.bf16.mxu0 %v9958_v18 }
0x1452   :  { %v8145_v51 = vsel %vm47_vm0, %v8143_v53, 0.0  ;;  %9961 = vmatpush3.bf16.msra.mxu0 %v9958_v18 }
0x1453   :  { %9963 = vmatprep.subr.bf16.mxu0 %v9962_v19 }
0x1454   :  { %8149 = vadd.xlane.f32.xlu1 %v8148_v14 }
0x1455   :  { %8146 = vadd.xlane.f32.xlu0 %v8145_v51 }
0x1456   :  { %9965 = vmatpush3.bf16.msra.mxu0 %v9962_v19 }
0x14dd   :  { %v8140_v34 = vpop.xlane.xlu1 %8139 }
0x14de   :  { %v8142_v31 = vmul.f32 0.03125, %v8140_v34  ;;  %v8137_v25 = vpop.xlane.xlu0 %8136 }
0x14df   :  { %v8141_v36 = vmul.f32 0.03125, %v8137_v25  ;;  %v8406_v25 = vrot.slane %v11116_v33, %v4247_v2 }
0x14e0   :  { %v8156_v38 = vmul.f32 %v8142_v31, %v8142_v31  ;;  %v8154_v50 = vsub.f32 %v8134_v15, %v8142_v31 }
0x14e1   :  { %v8150_v26 = vpop.xlane.xlu1 %8149  ;;  %v8155_v47 = vmul.f32 %v8141_v36, %v8141_v36  ;;  %v8153_v23 = vsub.f32 %v8133_v1, %v8141_v36 }
0x14e2   :  { %v8152_v28 = vmul.f32 0.03125, %v8150_v26  ;;  %v8147_v41 = vpop.xlane.xlu0 %8146 }
0x14e3   :  { %v8151_v37 = vmul.f32 0.03125, %v8147_v41  ;;  %v8412_v41 = vrot.slane %v11116_v33, %v4253_v3 }
0x14e4   :  { %v8158_v30 = vsub.f32 %v8152_v28, %v8156_v38 }
0x14e5   :  { %v8157_v29 = vsub.f32 %v8151_v37, %v8155_v47 }
0x14e6   :  { %v8160_v27 = vadd.f32 1e-06, %v8158_v30 }
0x14e7   :  { %v8159_v48 = vadd.f32 1e-06, %v8157_v29 }
0x14e8   :  { %10132 = vrsqrt.f32 %v8160_v27 }
0x14e9   :  { %10134 = vrsqrt.f32 %v8159_v48 }
0x14f2   :  { %v10133_v52 = vpop.eup %10132 }
0x14f3   :  { %v10135_v45 = vpop.eup %10134  ;;  %v8164_v54 = vmul.f32 %v10133_v52, %v8154_v50 }
0x14f4   :  { %v8163_v46 = vmul.f32 %v10135_v45, %v8153_v23 }
0x14f5   :  { %v8170_v58 = vmul.f32 %v8168_v55, %v8164_v54 }
0x14f6   :  { %v8169_v61 = vmul.f32 %v8168_v55, %v8163_v46 }
0x14f7   :  { %v8176_v0 = vadd.f32 %v8174_v43, %v8170_v58 }
0x14f8   :  { %v8175_v62 = vadd.f32 %v8174_v43, %v8169_v61 }
0x14fa   :  { %9668 = vmatprep.mubr.msk.f32.mxu0 %vm47_vm0, %v8175_v62 }
0x14fb   :  { %9669 = vmatmul.mubr.msk.f32.vlgmr.msra.gmra.mrb[100].mxu0 %vm47_vm0, %v8176_v0 }
0x15ce   :  { %v9670_v63 = vpop.f32.mrb[100].mxu0 }
0x15cf   :  { %v8264_v4 = vadd.f32 %v9670_v63, %v8185_v16  ;;  %v8258_v7 = vpop.f32.mrb[101].mxu0 }
0x15d0   :  { %v8259_v8 = vadd.f32 %v8258_v7, %v8185_v16 }
0x15d1   :  { %v8268_v49 = vmax.f32 %v8264_v4, 0.0 }
0x15d2   :  { %v8267_v9 = vmax.f32 %v8259_v8, 0.0 }
0x15d4   :  { %9679 = vmatprep.mubr.msk.f32.mxu1 %vm4119_vm3, %v8267_v9 }
0x15d5   :  { %9680 = vmatmul.mubr.msk.f32.vlgmr.msra.gmra.mrb[96].mxu1 %vm4119_vm3, %v8268_v49 }
0x16a8   :  { %v9681_v12 = vpop.f32.mrb[96].mxu1 }
0x16a9   :  { %v8368_v6 = vadd.f32 %v9681_v12, %v8277_v11  ;;  %v8362_v5 = vpop.f32.mrb[97].mxu1 }
0x16aa   :  { %v8363_v15 = vadd.f32 %v8362_v5, %v8277_v11 }
0x16ab   :  { %v8372_v1 = vadd.f32 %v8368_v6, %v8176_v0 }
0x16ac   :  { %v8371_v59 = vadd.f32 %v8363_v15, %v8175_v62 }
0x16ad   :  { %v8376_v42 = vsel %vm47_vm0, %v8372_v1, 0.0  ;;  %v8382_v17 = vmul.f32 %v8372_v1, %v8372_v1 }
0x16ae   :  { %8377 = vadd.xlane.f32.xlu1 %v8376_v42  ;;  %v8373_v10 = vsel %vm47_vm0, %v8371_v59, 0.0  ;;  %v8381_v53 = vmul.f32 %v8371_v59, %v8371_v59 }
0x16af   :  { %8374 = vadd.xlane.f32.xlu0 %v8373_v10  ;;  %v8386_v14 = vsel %vm47_vm0, %v8382_v17, 0.0 }
0x16b0   :  { %v8383_v51 = vsel %vm47_vm0, %v8381_v53, 0.0 }
0x16b2   :  { %8387 = vadd.xlane.f32.xlu1 %v8386_v14 }
0x16b3   :  { %8384 = vadd.xlane.f32.xlu0 %v8383_v51 }
0x173b   :  { %v8378_v44 = vpop.xlane.xlu1 %8377 }
0x173c   :  { %v8380_v57 = vmul.f32 0.03125, %v8378_v44  ;;  %v8375_v56 = vpop.xlane.xlu0 %8374 }
0x173d   :  { %v8379_v18 = vmul.f32 0.03125, %v8375_v56 }
0x173e   :  { %v8394_v13 = vmul.f32 %v8380_v57, %v8380_v57  ;;  %v8392_v31 = vsub.f32 %v8372_v1, %v8380_v57 }
0x173f   :  { %v8388_v60 = vpop.xlane.xlu1 %8387  ;;  %v8393_v35 = vmul.f32 %v8379_v18, %v8379_v18  ;;  %v8391_v26 = vsub.f32 %v8371_v59, %v8379_v18 }
0x1740   :  { %v8390_v19 = vmul.f32 0.03125, %v8388_v60  ;;  %v8385_v21 = vpop.xlane.xlu0 %8384 }
0x1741   :  { %v8389_v20 = vmul.f32 0.03125, %v8385_v21 }
0x1742   :  { %v8396_v22 = vsub.f32 %v8390_v19, %v8394_v13 }
0x1743   :  { %v8395_v32 = vsub.f32 %v8389_v20, %v8393_v35 }
0x1744   :  { %v8398_v24 = vadd.f32 1e-06, %v8396_v22 }
0x1745   :  { %v8397_v34 = vadd.f32 1e-06, %v8395_v32 }
0x1746   :  { %10136 = vrsqrt.f32 %v8398_v24 }
0x1747   :  { %10138 = vrsqrt.f32 %v8397_v34 }
0x1750   :  { %v10137_v36 = vpop.eup %10136 }
0x1751   :  { %v10139_v38 = vpop.eup %10138  ;;  %v8402_v28 = vmul.f32 %v10137_v36, %v8392_v31 }
0x1752   :  { %v8401_v47 = vmul.f32 %v10139_v38, %v8391_v26 }
0x1753   :  { %v8408_v37 = vmul.f32 %v8406_v25, %v8402_v28 }
0x1754   :  { %v8407_v30 = vmul.f32 %v8406_v25, %v8401_v47 }
0x1755   :  { %v8414_v29 = vadd.f32 %v8412_v41, %v8408_v37 }
0x1756   :  { %v8413_v27 = vadd.f32 %v8412_v41, %v8407_v30 }
0x1757   :  { %8416 = vst.msk [vmem:[#allocation5 + $0x8] sm:$0xff] %vm47_vm0, %v8414_v29 }
0x1758   :  { %8415 = vst.msk [vmem:[#allocation5] sm:$0xff] %vm47_vm0, %v8413_v27 }
0x1759   :  { %10181 = shalt.err (!%p10178_p12)
}
0x175a   :  { %s10182_s9 = scalar_lea.hbm %s11166_s6, 256 }
0x175b   :  { %p10183_p13 = scmp.ne.s32.totalorder %s11166_s6, %s10182_s9  ;;  %p10186_p0 = scmp.lt.u32.totalorder %s10182_s9, %s11166_s6 }
0x175d   :  { %p10188_p1 = pnand %p10186_p0, %p10183_p13 }
0x175f   :  { %10191 = shalt.err (!%p10188_p1)
}
0x1760   :  { %8428 = dma.vmem_to_hbm [thread:$0]  %s8423_s28, 256, %s11166_s6, [#allocation4], %s10197_s7, %s10197_s7, %s10198_s8  }
0x1761   :  { %10194 = dma.done.wait [#allocation4], 256  }
0x1762   :  { %10195 = vsyncadd [#allocation4], 4294967040 }
0x1763   :  { %8432 = vsyncpa [#allocation3], 1 }
0x1764   :  { %8433 = vsyncpa [#allocation4], 1 }

</bundles_post_ra>
